<compile_context>
chip_gen: v6e
topology: v6e:2x2x1
jax: 0.10.0
libtpu: 0.0.40
codegen_flags: <defaults>
</compile_context>

<pallas_src>
import jax
import jax.numpy as jnp
from jax import lax
from jax.experimental import pallas as pl
from jax.experimental.pallas import tpu as pltpu


# ---------------------------------------------------------------------------
# in-kernel building blocks
# ---------------------------------------------------------------------------

def _conv3x3(x, w_ref, b_row, relu):
    """PyTorch Conv2d(k=3, padding=1) (cross-correlation) + optional ReLU.

    x     : (1, H, W, Cin) f32 activation value (NHWC: C on lanes, W on sublanes).
    w_ref : (9*Cin, Cout) bf16 weight ref, rows ordered (dx, dy, cin).
    b_row : (1, >=Cout) f32 bias row.

    Single im2col matmul: taps x[i+dy-1, j+dx-1] are built as shifted copies
    (zero-filled at the borders) and concatenated along the lane (channel) dim,
    so one bf16 MXU matmul with f32 accumulation does the whole conv.
    """
    N, H, W, Cin = x.shape
    Cout = w_ref.shape[1]

    xb = x.astype(jnp.bfloat16)                        # MXU operand dtype, cast once
    zr = jnp.zeros((N, 1, W, Cin), jnp.bfloat16)
    # dy taps (x[i-1], x[i], x[i+1]) stacked on lanes -> (N, H, W, 3*Cin)
    x3 = jnp.concatenate([
        jnp.concatenate([zr, xb[:, :H - 1]], axis=1),      # dy = 0  -> x[i-1]
        xb,                                                # dy = 1  -> x[i]
        jnp.concatenate([xb[:, 1:], zr], axis=1),          # dy = 2  -> x[i+1]
    ], axis=-1)

    zc = jnp.zeros((N, H, 1, 3 * Cin), jnp.bfloat16)
    # dx taps of x3 stacked on lanes -> (N, H, W, 9*Cin), channel order (dx, dy, c)
    patches = jnp.concatenate([
        jnp.concatenate([zc, x3[:, :, :W - 1]], axis=2),   # dx = 0  -> x[j-1]
        x3,                                                # dx = 1  -> x[j]
        jnp.concatenate([x3[:, :, 1:], zc], axis=2),       # dx = 2  -> x[j+1]
    ], axis=-1).reshape(N * H * W, 9 * Cin)

    y = jnp.dot(patches, w_ref[...], preferred_element_type=jnp.float32)
    y = y + b_row[:, :Cout]                                # (1, Cout) broadcast over M
    if relu:
        y = jnp.maximum(y, 0.0)
    return y.reshape(N, H, W, Cout)


def _maxpool2(x):
    """nn.MaxPool2d(2): 2x2 window, stride 2.  x: (N, H, W, C) f32."""
    N, H, W, C = x.shape
    a = x.reshape(N, H // 2, 2, W, C)
    a = jnp.maximum(a[:, :, 0], a[:, :, 1])                # pool along H (leading dim)
    b = a.reshape(N, H // 2, W // 2, 2, C)
    return jnp.max(b, axis=3)                              # pool along W (sublane dim)


def _upsample2(x):
    """nn.Upsample(scale_factor=2), default mode='nearest'.  x: (N, H, W, C)."""
    N, H, W, C = x.shape
    a = jnp.broadcast_to(x[:, :, None, :, :], (N, H, 2, W, C)).reshape(N, 2 * H, W, C)
    b = jnp.broadcast_to(a[:, :, :, None, :], (N, 2 * H, W, 2, C))
    return b.reshape(N, 2 * H, 2 * W, C)


# ---------------------------------------------------------------------------
# fused kernel: entire SimpleRegUNet forward for one batch element per program
# ---------------------------------------------------------------------------

def _simple_reg_unet_kernel(x_ref, w1, w2, w3, w4, w5, w6, b_ref, o_ref):
    bias = b_ref[...]                                      # (6, Cmax) f32, loaded once
    x = x_ref[...]                                         # (1, H, W, in_ch) f32

    # encoder: Conv-ReLU-MaxPool, Conv-ReLU-MaxPool
    h = _conv3x3(x, w1, bias[0:1], relu=True)
    h = _maxpool2(h)
    h = _conv3x3(h, w2, bias[1:2], relu=True)
    h = _maxpool2(h)

    # decoder: Conv-ReLU-Up, Conv-ReLU-Up, Conv-ReLU
    h = _conv3x3(h, w3, bias[2:3], relu=True)
    h = _upsample2(h)
    h = _conv3x3(h, w4, bias[3:4], relu=True)
    h = _upsample2(h)
    h = _conv3x3(h, w5, bias[4:5], relu=True)

    # flow head: Conv only (no ReLU)
    o_ref[...] = _conv3x3(h, w6, bias[5:6], relu=False)


def simple_reg_unet_forward(x_nchw, params):
    """SimpleRegUNet.forward: x (N, in_ch, H, W) -> flow (N, out_ch, H, W)."""
    x = jnp.transpose(x_nchw, (0, 2, 3, 1)).astype(jnp.float32)   # NHWC
    N, H, W, in_ch = x.shape

    # Pack weights as (9*Cin, Cout) bf16 with row order (dx, dy, cin) to match
    # the in-kernel im2col lane order; pack all biases into one f32 table.
    ws, couts = [], []
    for i in range(1, 7):
        w = params[f"w{i}"]                                        # (3,3,Cin,Cout) = (dy,dx,c,o)
        cin, cout = w.shape[2], w.shape[3]
        ws.append(jnp.transpose(w, (1, 0, 2, 3))                   # (dx,dy,c,o)
                    .reshape(9 * cin, cout).astype(jnp.bfloat16))
        couts.append(cout)
    cmax = max(couts)
    bias = jnp.stack([jnp.pad(params[f"b{i}"], (0, cmax - couts[i - 1]))
                      for i in range(1, 7)], axis=0).astype(jnp.float32)   # (6, Cmax)
    out_ch = couts[-1]

    grid = (N,)   # one batch element per program; "parallel" feeds both v7x TCs
    in_specs = ([pl.BlockSpec((1, H, W, in_ch), lambda n: (n, 0, 0, 0))]
                + [pl.BlockSpec(w.shape, lambda n: (0, 0)) for w in ws]
                + [pl.BlockSpec(bias.shape, lambda n: (0, 0))])
    out_spec = pl.BlockSpec((1, H, W, out_ch), lambda n: (n, 0, 0, 0))

    flow_nhwc = pl.pallas_call(
        _simple_reg_unet_kernel,
        out_shape=jax.ShapeDtypeStruct((N, H, W, out_ch), jnp.float32),
        grid_spec=pltpu.PrefetchScalarGridSpec(
            num_scalar_prefetch=0, grid=grid,
            in_specs=in_specs, out_specs=out_spec),
        compiler_params=pltpu.CompilerParams(
            dimension_semantics=("parallel",),
            vmem_limit_bytes=32 * 1024 * 1024),
    )(x, *ws, bias)
    return jnp.transpose(flow_nhwc, (0, 3, 1, 2))


# ------------------------- pure-JAX reference (XLA, f32) ---------------------

def _reference_forward(x_nchw, params):
    def conv(x, w_hwio, b, relu):
        w = jnp.transpose(w_hwio, (3, 2, 0, 1))                    # OIHW
        y = lax.conv_general_dilated(
            x, w, window_strides=(1, 1), padding="SAME",
            dimension_numbers=("NCHW", "OIHW", "NCHW"),
            precision=lax.Precision.HIGHEST)
        y = y + b[None, :, None, None]
        return jnp.maximum(y, 0.0) if relu else y

    def pool(x):
        return lax.reduce_window(x, -jnp.inf, lax.max,
                                 (1, 1, 2, 2), (1, 1, 2, 2), "VALID")

    def up(x):
        return jnp.repeat(jnp.repeat(x, 2, axis=2), 2, axis=3)

    h = conv(x_nchw, params["w1"], params["b1"], True); h = pool(h)
    h = conv(h, params["w2"], params["b2"], True); h = pool(h)
    h = conv(h, params["w3"], params["b3"], True); h = up(h)
    h = conv(h, params["w4"], params["b4"], True); h = up(h)
    h = conv(h, params["w5"], params["b5"], True)
    return conv(h, params["w6"], params["b6"], False)


# ------------------------------ parameter init ------------------------------

def init_params(key, in_ch=2, out_ch=2):
    chans = [(in_ch, 16), (16, 32), (32, 64), (64, 32), (32, 16), (16, out_ch)]
    p = {}
    keys = jax.random.split(key, 2 * len(chans))
    for i, (cin, cout) in enumerate(chans, start=1):
        std = (1.0 / (9 * cin)) ** 0.5
        p[f"w{i}"] = std * jax.random.normal(keys[2 * i - 2], (3, 3, cin, cout), jnp.float32)
        p[f"b{i}"] = std * jax.random.normal(keys[2 * i - 1], (cout,), jnp.float32)
    return p


# ----------------------------------- main ------------------------------------

if __name__ == "__main__":
    key = jax.random.PRNGKey(0)
    kp, kx = jax.random.split(key)

    # SimpleRegUNet(in_ch=2, out_ch=2); input (N=2, C=2, H=16, W=16)
    params = init_params(kp, in_ch=2, out_ch=2)
    x = jax.random.normal(kx, (2, 2, 16, 16), jnp.float32)

    flow = jax.jit(simple_reg_unet_forward)(x, params)
    jax.block_until_ready(flow)

    assert flow.shape == (2, 2, 16, 16), flow.shape
    assert bool(jnp.all(jnp.isfinite(flow)))

    # numerical check against a plain-XLA f32 reference of the same forward.
    # Tolerance is scaled to the output magnitude and sized for bf16 MXU
    # operands over 6 conv layers (~1% relative); any semantic bug (wrong tap,
    # wrong pooling/upsampling) produces O(1) errors and still fails this.
    ref = _reference_forward(x, params)
    max_err = float(jnp.max(jnp.abs(flow - ref)))
    scale = float(jnp.max(jnp.abs(ref)))
    assert max_err <= 2e-2 * max(1.0, scale), (max_err, scale)

    print("KERNEL_OK")
</pallas_src>

<mosaic_0001>
module attributes {stable_mosaic.version = 11 : i64} {
  func.func @_simple_reg_unet_kernel(%arg0: i32, %arg1: memref<1x16x16x2xf32, #tpu.memory_space<vmem>>, %arg2: memref<18x16xbf16, #tpu.memory_space<vmem>>, %arg3: memref<144x32xbf16, #tpu.memory_space<vmem>>, %arg4: memref<288x64xbf16, #tpu.memory_space<vmem>>, %arg5: memref<576x32xbf16, #tpu.memory_space<vmem>>, %arg6: memref<288x16xbf16, #tpu.memory_space<vmem>>, %arg7: memref<144x2xbf16, #tpu.memory_space<vmem>>, %arg8: memref<6x64xf32, #tpu.memory_space<vmem>>, %arg9: memref<1x16x16x2xf32, #tpu.memory_space<vmem>>) attributes {dimension_semantics = [#tpu.dimension_semantics<parallel>], iteration_bounds = array<i64: 2>, scalar_prefetch = 0 : i64, scratch_operands = 0 : i64, tpu.core_type = #tpu.core_type<tc>, window_params = [{transform_indices = @transform_0, window_bounds = array<i64: 1, 16, 16, 2>}, {pipeline_mode = #tpu.pipeline_mode<synchronous>, transform_indices = @transform_1, window_bounds = array<i64: 18, 16>}, {pipeline_mode = #tpu.pipeline_mode<synchronous>, transform_indices = @transform_2, window_bounds = array<i64: 144, 32>}, {pipeline_mode = #tpu.pipeline_mode<synchronous>, transform_indices = @transform_3, window_bounds = array<i64: 288, 64>}, {pipeline_mode = #tpu.pipeline_mode<synchronous>, transform_indices = @transform_4, window_bounds = array<i64: 576, 32>}, {pipeline_mode = #tpu.pipeline_mode<synchronous>, transform_indices = @transform_5, window_bounds = array<i64: 288, 16>}, {pipeline_mode = #tpu.pipeline_mode<synchronous>, transform_indices = @transform_6, window_bounds = array<i64: 144, 2>}, {pipeline_mode = #tpu.pipeline_mode<synchronous>, transform_indices = @transform_7, window_bounds = array<i64: 6, 64>}, {transform_indices = @transform_8, window_bounds = array<i64: 1, 16, 16, 2>}]} {
    %c0 = arith.constant 0 : index
    %c0_0 = arith.constant 0 : index
    %0 = vector.load %arg8[%c0, %c0_0] : memref<6x64xf32, #tpu.memory_space<vmem>>, vector<6x64xf32>
    %c0_1 = arith.constant 0 : index
    %c0_2 = arith.constant 0 : index
    %c0_3 = arith.constant 0 : index
    %c0_4 = arith.constant 0 : index
    %1 = vector.load %arg1[%c0_1, %c0_2, %c0_3, %c0_4] : memref<1x16x16x2xf32, #tpu.memory_space<vmem>>, vector<1x16x16x2xf32>
    %2 = vector.extract_strided_slice %0 {offsets = [0, 0], sizes = [1, 64], strides = [1, 1]} : vector<6x64xf32> to vector<1x64xf32>
    %3 = arith.truncf %1 : vector<1x16x16x2xf32> to vector<1x16x16x2xbf16>
    %cst = arith.constant 0.000000e+00 : bf16
    %4 = vector.broadcast %cst : bf16 to vector<1x1x16x2xbf16>
    %5 = vector.extract_strided_slice %3 {offsets = [0, 0, 0, 0], sizes = [1, 15, 16, 2], strides = [1, 1, 1, 1]} : vector<1x16x16x2xbf16> to vector<1x15x16x2xbf16>
    %6 = tpu.concatenate %4, %5 in 1 : vector<1x1x16x2xbf16>, vector<1x15x16x2xbf16> -> vector<1x16x16x2xbf16>
    %7 = vector.extract_strided_slice %3 {offsets = [0, 1, 0, 0], sizes = [1, 15, 16, 2], strides = [1, 1, 1, 1]} : vector<1x16x16x2xbf16> to vector<1x15x16x2xbf16>
    %8 = tpu.concatenate %7, %4 in 1 : vector<1x15x16x2xbf16>, vector<1x1x16x2xbf16> -> vector<1x16x16x2xbf16>
    %9 = tpu.concatenate %6, %3, %8 in 3 : vector<1x16x16x2xbf16>, vector<1x16x16x2xbf16>, vector<1x16x16x2xbf16> -> vector<1x16x16x6xbf16>
    %cst_5 = arith.constant 0.000000e+00 : bf16
    %10 = vector.broadcast %cst_5 : bf16 to vector<1x16x1x6xbf16>
    %11 = vector.extract_strided_slice %9 {offsets = [0, 0, 0, 0], sizes = [1, 16, 15, 6], strides = [1, 1, 1, 1]} : vector<1x16x16x6xbf16> to vector<1x16x15x6xbf16>
    %12 = tpu.concatenate %10, %11 in 2 : vector<1x16x1x6xbf16>, vector<1x16x15x6xbf16> -> vector<1x16x16x6xbf16>
    %13 = vector.extract_strided_slice %9 {offsets = [0, 0, 1, 0], sizes = [1, 16, 15, 6], strides = [1, 1, 1, 1]} : vector<1x16x16x6xbf16> to vector<1x16x15x6xbf16>
    %14 = tpu.concatenate %13, %10 in 2 : vector<1x16x15x6xbf16>, vector<1x16x1x6xbf16> -> vector<1x16x16x6xbf16>
    %15 = tpu.concatenate %12, %9, %14 in 3 : vector<1x16x16x6xbf16>, vector<1x16x16x6xbf16>, vector<1x16x16x6xbf16> -> vector<1x16x16x18xbf16>
    %16 = vector.shape_cast %15 : vector<1x16x16x18xbf16> to vector<256x18xbf16>
    %c0_6 = arith.constant 0 : index
    %c0_7 = arith.constant 0 : index
    %17 = vector.load %arg2[%c0_6, %c0_7] : memref<18x16xbf16, #tpu.memory_space<vmem>>, vector<18x16xbf16>
    %cst_8 = arith.constant dense<0.000000e+00> : vector<256x16xf32>
    %18 = tpu.matmul %16, %17, %cst_8 {dimension_numbers = #tpu.dot_dimension_numbers<[1], [0], [0], [1], [0, 0, 1, 1], [], []>} : vector<256x18xbf16>, vector<18x16xbf16>, vector<256x16xf32> -> vector<256x16xf32>
    %19 = vector.extract_strided_slice %2 {offsets = [0, 0], sizes = [1, 16], strides = [1, 1]} : vector<1x64xf32> to vector<1x16xf32>
    %20 = vector.broadcast %19 : vector<1x16xf32> to vector<256x16xf32>
    %21 = arith.addf %18, %20 : vector<256x16xf32>
    %cst_9 = arith.constant 0.000000e+00 : f32
    %22 = vector.broadcast %cst_9 : f32 to vector<256x16xf32>
    %23 = arith.maximumf %21, %22 : vector<256x16xf32>
    %24 = vector.shape_cast %23 : vector<256x16xf32> to vector<1x16x16x16xf32>
    %25 = vector.shape_cast %24 : vector<1x16x16x16xf32> to vector<1x8x2x16x16xf32>
    %26 = vector.extract_strided_slice %25 {offsets = [0, 0, 0, 0, 0], sizes = [1, 8, 1, 16, 16], strides = [1, 1, 1, 1, 1]} : vector<1x8x2x16x16xf32> to vector<1x8x1x16x16xf32>
    %27 = vector.shape_cast %26 : vector<1x8x1x16x16xf32> to vector<1x8x16x16xf32>
    %28 = vector.extract_strided_slice %25 {offsets = [0, 0, 1, 0, 0], sizes = [1, 8, 1, 16, 16], strides = [1, 1, 1, 1, 1]} : vector<1x8x2x16x16xf32> to vector<1x8x1x16x16xf32>
    %29 = vector.shape_cast %28 : vector<1x8x1x16x16xf32> to vector<1x8x16x16xf32>
    %30 = arith.maximumf %27, %29 : vector<1x8x16x16xf32>
    %31 = vector.shape_cast %30 : vector<1x8x16x16xf32> to vector<1x8x8x2x16xf32>
    %cst_10 = arith.constant dense<0xFF800000> : vector<1x8x8x16xf32>
    %32 = vector.multi_reduction <maximumf>, %31, %cst_10 [3] : vector<1x8x8x2x16xf32> to vector<1x8x8x16xf32>
    %33 = vector.extract_strided_slice %0 {offsets = [1, 0], sizes = [1, 64], strides = [1, 1]} : vector<6x64xf32> to vector<1x64xf32>
    %34 = arith.truncf %32 : vector<1x8x8x16xf32> to vector<1x8x8x16xbf16>
    %cst_11 = arith.constant 0.000000e+00 : bf16
    %35 = vector.broadcast %cst_11 : bf16 to vector<1x1x8x16xbf16>
    %36 = vector.extract_strided_slice %34 {offsets = [0, 0, 0, 0], sizes = [1, 7, 8, 16], strides = [1, 1, 1, 1]} : vector<1x8x8x16xbf16> to vector<1x7x8x16xbf16>
    %37 = tpu.concatenate %35, %36 in 1 : vector<1x1x8x16xbf16>, vector<1x7x8x16xbf16> -> vector<1x8x8x16xbf16>
    %38 = vector.extract_strided_slice %34 {offsets = [0, 1, 0, 0], sizes = [1, 7, 8, 16], strides = [1, 1, 1, 1]} : vector<1x8x8x16xbf16> to vector<1x7x8x16xbf16>
    %39 = tpu.concatenate %38, %35 in 1 : vector<1x7x8x16xbf16>, vector<1x1x8x16xbf16> -> vector<1x8x8x16xbf16>
    %40 = tpu.concatenate %37, %34, %39 in 3 : vector<1x8x8x16xbf16>, vector<1x8x8x16xbf16>, vector<1x8x8x16xbf16> -> vector<1x8x8x48xbf16>
    %cst_12 = arith.constant 0.000000e+00 : bf16
    %41 = vector.broadcast %cst_12 : bf16 to vector<1x8x1x48xbf16>
    %42 = vector.extract_strided_slice %40 {offsets = [0, 0, 0, 0], sizes = [1, 8, 7, 48], strides = [1, 1, 1, 1]} : vector<1x8x8x48xbf16> to vector<1x8x7x48xbf16>
    %43 = tpu.concatenate %41, %42 in 2 : vector<1x8x1x48xbf16>, vector<1x8x7x48xbf16> -> vector<1x8x8x48xbf16>
    %44 = vector.extract_strided_slice %40 {offsets = [0, 0, 1, 0], sizes = [1, 8, 7, 48], strides = [1, 1, 1, 1]} : vector<1x8x8x48xbf16> to vector<1x8x7x48xbf16>
    %45 = tpu.concatenate %44, %41 in 2 : vector<1x8x7x48xbf16>, vector<1x8x1x48xbf16> -> vector<1x8x8x48xbf16>
    %46 = tpu.concatenate %43, %40, %45 in 3 : vector<1x8x8x48xbf16>, vector<1x8x8x48xbf16>, vector<1x8x8x48xbf16> -> vector<1x8x8x144xbf16>
    %47 = vector.shape_cast %46 : vector<1x8x8x144xbf16> to vector<64x144xbf16>
    %c0_13 = arith.constant 0 : index
    %c0_14 = arith.constant 0 : index
    %48 = vector.load %arg3[%c0_13, %c0_14] : memref<144x32xbf16, #tpu.memory_space<vmem>>, vector<144x32xbf16>
    %cst_15 = arith.constant dense<0.000000e+00> : vector<64x32xf32>
    %49 = tpu.matmul %47, %48, %cst_15 {dimension_numbers = #tpu.dot_dimension_numbers<[1], [0], [0], [1], [0, 0, 1, 1], [], []>} : vector<64x144xbf16>, vector<144x32xbf16>, vector<64x32xf32> -> vector<64x32xf32>
    %50 = vector.extract_strided_slice %33 {offsets = [0, 0], sizes = [1, 32], strides = [1, 1]} : vector<1x64xf32> to vector<1x32xf32>
    %51 = vector.broadcast %50 : vector<1x32xf32> to vector<64x32xf32>
    %52 = arith.addf %49, %51 : vector<64x32xf32>
    %cst_16 = arith.constant 0.000000e+00 : f32
    %53 = vector.broadcast %cst_16 : f32 to vector<64x32xf32>
    %54 = arith.maximumf %52, %53 : vector<64x32xf32>
    %55 = vector.shape_cast %54 : vector<64x32xf32> to vector<1x8x8x32xf32>
    %56 = vector.shape_cast %55 : vector<1x8x8x32xf32> to vector<1x4x2x8x32xf32>
    %57 = vector.extract_strided_slice %56 {offsets = [0, 0, 0, 0, 0], sizes = [1, 4, 1, 8, 32], strides = [1, 1, 1, 1, 1]} : vector<1x4x2x8x32xf32> to vector<1x4x1x8x32xf32>
    %58 = vector.shape_cast %57 : vector<1x4x1x8x32xf32> to vector<1x4x8x32xf32>
    %59 = vector.extract_strided_slice %56 {offsets = [0, 0, 1, 0, 0], sizes = [1, 4, 1, 8, 32], strides = [1, 1, 1, 1, 1]} : vector<1x4x2x8x32xf32> to vector<1x4x1x8x32xf32>
    %60 = vector.shape_cast %59 : vector<1x4x1x8x32xf32> to vector<1x4x8x32xf32>
    %61 = arith.maximumf %58, %60 : vector<1x4x8x32xf32>
    %62 = vector.shape_cast %61 : vector<1x4x8x32xf32> to vector<1x4x4x2x32xf32>
    %cst_17 = arith.constant dense<0xFF800000> : vector<1x4x4x32xf32>
    %63 = vector.multi_reduction <maximumf>, %62, %cst_17 [3] : vector<1x4x4x2x32xf32> to vector<1x4x4x32xf32>
    %64 = vector.extract_strided_slice %0 {offsets = [2, 0], sizes = [1, 64], strides = [1, 1]} : vector<6x64xf32> to vector<1x64xf32>
    %65 = arith.truncf %63 : vector<1x4x4x32xf32> to vector<1x4x4x32xbf16>
    %cst_18 = arith.constant 0.000000e+00 : bf16
    %66 = vector.broadcast %cst_18 : bf16 to vector<1x1x4x32xbf16>
    %67 = vector.extract_strided_slice %65 {offsets = [0, 0, 0, 0], sizes = [1, 3, 4, 32], strides = [1, 1, 1, 1]} : vector<1x4x4x32xbf16> to vector<1x3x4x32xbf16>
    %68 = tpu.concatenate %66, %67 in 1 : vector<1x1x4x32xbf16>, vector<1x3x4x32xbf16> -> vector<1x4x4x32xbf16>
    %69 = vector.extract_strided_slice %65 {offsets = [0, 1, 0, 0], sizes = [1, 3, 4, 32], strides = [1, 1, 1, 1]} : vector<1x4x4x32xbf16> to vector<1x3x4x32xbf16>
    %70 = tpu.concatenate %69, %66 in 1 : vector<1x3x4x32xbf16>, vector<1x1x4x32xbf16> -> vector<1x4x4x32xbf16>
    %71 = tpu.concatenate %68, %65, %70 in 3 : vector<1x4x4x32xbf16>, vector<1x4x4x32xbf16>, vector<1x4x4x32xbf16> -> vector<1x4x4x96xbf16>
    %cst_19 = arith.constant 0.000000e+00 : bf16
    %72 = vector.broadcast %cst_19 : bf16 to vector<1x4x1x96xbf16>
    %73 = vector.extract_strided_slice %71 {offsets = [0, 0, 0, 0], sizes = [1, 4, 3, 96], strides = [1, 1, 1, 1]} : vector<1x4x4x96xbf16> to vector<1x4x3x96xbf16>
    %74 = tpu.concatenate %72, %73 in 2 : vector<1x4x1x96xbf16>, vector<1x4x3x96xbf16> -> vector<1x4x4x96xbf16>
    %75 = vector.extract_strided_slice %71 {offsets = [0, 0, 1, 0], sizes = [1, 4, 3, 96], strides = [1, 1, 1, 1]} : vector<1x4x4x96xbf16> to vector<1x4x3x96xbf16>
    %76 = tpu.concatenate %75, %72 in 2 : vector<1x4x3x96xbf16>, vector<1x4x1x96xbf16> -> vector<1x4x4x96xbf16>
    %77 = tpu.concatenate %74, %71, %76 in 3 : vector<1x4x4x96xbf16>, vector<1x4x4x96xbf16>, vector<1x4x4x96xbf16> -> vector<1x4x4x288xbf16>
    %78 = vector.shape_cast %77 : vector<1x4x4x288xbf16> to vector<16x288xbf16>
    %c0_20 = arith.constant 0 : index
    %c0_21 = arith.constant 0 : index
    %79 = vector.load %arg4[%c0_20, %c0_21] : memref<288x64xbf16, #tpu.memory_space<vmem>>, vector<288x64xbf16>
    %cst_22 = arith.constant dense<0.000000e+00> : vector<16x64xf32>
    %80 = tpu.matmul %78, %79, %cst_22 {dimension_numbers = #tpu.dot_dimension_numbers<[1], [0], [0], [1], [0, 0, 1, 1], [], []>} : vector<16x288xbf16>, vector<288x64xbf16>, vector<16x64xf32> -> vector<16x64xf32>
    %81 = vector.broadcast %64 : vector<1x64xf32> to vector<16x64xf32>
    %82 = arith.addf %80, %81 : vector<16x64xf32>
    %cst_23 = arith.constant 0.000000e+00 : f32
    %83 = vector.broadcast %cst_23 : f32 to vector<16x64xf32>
    %84 = arith.maximumf %82, %83 : vector<16x64xf32>
    %85 = vector.shape_cast %84 : vector<16x64xf32> to vector<1x4x4x64xf32>
    %86 = vector.shape_cast %85 : vector<1x4x4x64xf32> to vector<1x4x1x4x64xf32>
    %87 = vector.shape_cast %86 : vector<1x4x1x4x64xf32> to vector<1x4x1x4x64xf32>
    %88 = vector.broadcast %87 : vector<1x4x1x4x64xf32> to vector<1x4x2x4x64xf32>
    %89 = vector.shape_cast %88 : vector<1x4x2x4x64xf32> to vector<1x8x4x64xf32>
    %90 = vector.shape_cast %89 : vector<1x8x4x64xf32> to vector<1x8x4x1x64xf32>
    %91 = vector.shape_cast %90 : vector<1x8x4x1x64xf32> to vector<1x8x4x1x64xf32>
    %92 = vector.broadcast %91 : vector<1x8x4x1x64xf32> to vector<1x8x4x2x64xf32>
    %93 = vector.shape_cast %92 : vector<1x8x4x2x64xf32> to vector<1x8x8x64xf32>
    %94 = vector.extract_strided_slice %0 {offsets = [3, 0], sizes = [1, 64], strides = [1, 1]} : vector<6x64xf32> to vector<1x64xf32>
    %95 = arith.truncf %93 : vector<1x8x8x64xf32> to vector<1x8x8x64xbf16>
    %cst_24 = arith.constant 0.000000e+00 : bf16
    %96 = vector.broadcast %cst_24 : bf16 to vector<1x1x8x64xbf16>
    %97 = vector.extract_strided_slice %95 {offsets = [0, 0, 0, 0], sizes = [1, 7, 8, 64], strides = [1, 1, 1, 1]} : vector<1x8x8x64xbf16> to vector<1x7x8x64xbf16>
    %98 = tpu.concatenate %96, %97 in 1 : vector<1x1x8x64xbf16>, vector<1x7x8x64xbf16> -> vector<1x8x8x64xbf16>
    %99 = vector.extract_strided_slice %95 {offsets = [0, 1, 0, 0], sizes = [1, 7, 8, 64], strides = [1, 1, 1, 1]} : vector<1x8x8x64xbf16> to vector<1x7x8x64xbf16>
    %100 = tpu.concatenate %99, %96 in 1 : vector<1x7x8x64xbf16>, vector<1x1x8x64xbf16> -> vector<1x8x8x64xbf16>
    %101 = tpu.concatenate %98, %95, %100 in 3 : vector<1x8x8x64xbf16>, vector<1x8x8x64xbf16>, vector<1x8x8x64xbf16> -> vector<1x8x8x192xbf16>
    %cst_25 = arith.constant 0.000000e+00 : bf16
    %102 = vector.broadcast %cst_25 : bf16 to vector<1x8x1x192xbf16>
    %103 = vector.extract_strided_slice %101 {offsets = [0, 0, 0, 0], sizes = [1, 8, 7, 192], strides = [1, 1, 1, 1]} : vector<1x8x8x192xbf16> to vector<1x8x7x192xbf16>
    %104 = tpu.concatenate %102, %103 in 2 : vector<1x8x1x192xbf16>, vector<1x8x7x192xbf16> -> vector<1x8x8x192xbf16>
    %105 = vector.extract_strided_slice %101 {offsets = [0, 0, 1, 0], sizes = [1, 8, 7, 192], strides = [1, 1, 1, 1]} : vector<1x8x8x192xbf16> to vector<1x8x7x192xbf16>
    %106 = tpu.concatenate %105, %102 in 2 : vector<1x8x7x192xbf16>, vector<1x8x1x192xbf16> -> vector<1x8x8x192xbf16>
    %107 = tpu.concatenate %104, %101, %106 in 3 : vector<1x8x8x192xbf16>, vector<1x8x8x192xbf16>, vector<1x8x8x192xbf16> -> vector<1x8x8x576xbf16>
    %108 = vector.shape_cast %107 : vector<1x8x8x576xbf16> to vector<64x576xbf16>
    %c0_26 = arith.constant 0 : index
    %c0_27 = arith.constant 0 : index
    %109 = vector.load %arg5[%c0_26, %c0_27] : memref<576x32xbf16, #tpu.memory_space<vmem>>, vector<576x32xbf16>
    %cst_28 = arith.constant dense<0.000000e+00> : vector<64x32xf32>
    %110 = tpu.matmul %108, %109, %cst_28 {dimension_numbers = #tpu.dot_dimension_numbers<[1], [0], [0], [1], [0, 0, 1, 1], [], []>} : vector<64x576xbf16>, vector<576x32xbf16>, vector<64x32xf32> -> vector<64x32xf32>
    %111 = vector.extract_strided_slice %94 {offsets = [0, 0], sizes = [1, 32], strides = [1, 1]} : vector<1x64xf32> to vector<1x32xf32>
    %112 = vector.broadcast %111 : vector<1x32xf32> to vector<64x32xf32>
    %113 = arith.addf %110, %112 : vector<64x32xf32>
    %cst_29 = arith.constant 0.000000e+00 : f32
    %114 = vector.broadcast %cst_29 : f32 to vector<64x32xf32>
    %115 = arith.maximumf %113, %114 : vector<64x32xf32>
    %116 = vector.shape_cast %115 : vector<64x32xf32> to vector<1x8x8x32xf32>
    %117 = vector.shape_cast %116 : vector<1x8x8x32xf32> to vector<1x8x1x8x32xf32>
    %118 = vector.shape_cast %117 : vector<1x8x1x8x32xf32> to vector<1x8x1x8x32xf32>
    %119 = vector.broadcast %118 : vector<1x8x1x8x32xf32> to vector<1x8x2x8x32xf32>
    %120 = vector.shape_cast %119 : vector<1x8x2x8x32xf32> to vector<1x16x8x32xf32>
    %121 = vector.shape_cast %120 : vector<1x16x8x32xf32> to vector<1x16x8x1x32xf32>
    %122 = vector.shape_cast %121 : vector<1x16x8x1x32xf32> to vector<1x16x8x1x32xf32>
    %123 = vector.broadcast %122 : vector<1x16x8x1x32xf32> to vector<1x16x8x2x32xf32>
    %124 = vector.shape_cast %123 : vector<1x16x8x2x32xf32> to vector<1x16x16x32xf32>
    %125 = vector.extract_strided_slice %0 {offsets = [4, 0], sizes = [1, 64], strides = [1, 1]} : vector<6x64xf32> to vector<1x64xf32>
    %126 = arith.truncf %124 : vector<1x16x16x32xf32> to vector<1x16x16x32xbf16>
    %cst_30 = arith.constant 0.000000e+00 : bf16
    %127 = vector.broadcast %cst_30 : bf16 to vector<1x1x16x32xbf16>
    %128 = vector.extract_strided_slice %126 {offsets = [0, 0, 0, 0], sizes = [1, 15, 16, 32], strides = [1, 1, 1, 1]} : vector<1x16x16x32xbf16> to vector<1x15x16x32xbf16>
    %129 = tpu.concatenate %127, %128 in 1 : vector<1x1x16x32xbf16>, vector<1x15x16x32xbf16> -> vector<1x16x16x32xbf16>
    %130 = vector.extract_strided_slice %126 {offsets = [0, 1, 0, 0], sizes = [1, 15, 16, 32], strides = [1, 1, 1, 1]} : vector<1x16x16x32xbf16> to vector<1x15x16x32xbf16>
    %131 = tpu.concatenate %130, %127 in 1 : vector<1x15x16x32xbf16>, vector<1x1x16x32xbf16> -> vector<1x16x16x32xbf16>
    %132 = tpu.concatenate %129, %126, %131 in 3 : vector<1x16x16x32xbf16>, vector<1x16x16x32xbf16>, vector<1x16x16x32xbf16> -> vector<1x16x16x96xbf16>
    %cst_31 = arith.constant 0.000000e+00 : bf16
    %133 = vector.broadcast %cst_31 : bf16 to vector<1x16x1x96xbf16>
    %134 = vector.extract_strided_slice %132 {offsets = [0, 0, 0, 0], sizes = [1, 16, 15, 96], strides = [1, 1, 1, 1]} : vector<1x16x16x96xbf16> to vector<1x16x15x96xbf16>
    %135 = tpu.concatenate %133, %134 in 2 : vector<1x16x1x96xbf16>, vector<1x16x15x96xbf16> -> vector<1x16x16x96xbf16>
    %136 = vector.extract_strided_slice %132 {offsets = [0, 0, 1, 0], sizes = [1, 16, 15, 96], strides = [1, 1, 1, 1]} : vector<1x16x16x96xbf16> to vector<1x16x15x96xbf16>
    %137 = tpu.concatenate %136, %133 in 2 : vector<1x16x15x96xbf16>, vector<1x16x1x96xbf16> -> vector<1x16x16x96xbf16>
    %138 = tpu.concatenate %135, %132, %137 in 3 : vector<1x16x16x96xbf16>, vector<1x16x16x96xbf16>, vector<1x16x16x96xbf16> -> vector<1x16x16x288xbf16>
    %139 = vector.shape_cast %138 : vector<1x16x16x288xbf16> to vector<256x288xbf16>
    %c0_32 = arith.constant 0 : index
    %c0_33 = arith.constant 0 : index
    %140 = vector.load %arg6[%c0_32, %c0_33] : memref<288x16xbf16, #tpu.memory_space<vmem>>, vector<288x16xbf16>
    %cst_34 = arith.constant dense<0.000000e+00> : vector<256x16xf32>
    %141 = tpu.matmul %139, %140, %cst_34 {dimension_numbers = #tpu.dot_dimension_numbers<[1], [0], [0], [1], [0, 0, 1, 1], [], []>} : vector<256x288xbf16>, vector<288x16xbf16>, vector<256x16xf32> -> vector<256x16xf32>
    %142 = vector.extract_strided_slice %125 {offsets = [0, 0], sizes = [1, 16], strides = [1, 1]} : vector<1x64xf32> to vector<1x16xf32>
    %143 = vector.broadcast %142 : vector<1x16xf32> to vector<256x16xf32>
    %144 = arith.addf %141, %143 : vector<256x16xf32>
    %cst_35 = arith.constant 0.000000e+00 : f32
    %145 = vector.broadcast %cst_35 : f32 to vector<256x16xf32>
    %146 = arith.maximumf %144, %145 : vector<256x16xf32>
    %147 = vector.shape_cast %146 : vector<256x16xf32> to vector<1x16x16x16xf32>
    %148 = vector.extract_strided_slice %0 {offsets = [5, 0], sizes = [1, 64], strides = [1, 1]} : vector<6x64xf32> to vector<1x64xf32>
    %149 = arith.truncf %147 : vector<1x16x16x16xf32> to vector<1x16x16x16xbf16>
    %cst_36 = arith.constant 0.000000e+00 : bf16
    %150 = vector.broadcast %cst_36 : bf16 to vector<1x1x16x16xbf16>
    %151 = vector.extract_strided_slice %149 {offsets = [0, 0, 0, 0], sizes = [1, 15, 16, 16], strides = [1, 1, 1, 1]} : vector<1x16x16x16xbf16> to vector<1x15x16x16xbf16>
    %152 = tpu.concatenate %150, %151 in 1 : vector<1x1x16x16xbf16>, vector<1x15x16x16xbf16> -> vector<1x16x16x16xbf16>
    %153 = vector.extract_strided_slice %149 {offsets = [0, 1, 0, 0], sizes = [1, 15, 16, 16], strides = [1, 1, 1, 1]} : vector<1x16x16x16xbf16> to vector<1x15x16x16xbf16>
    %154 = tpu.concatenate %153, %150 in 1 : vector<1x15x16x16xbf16>, vector<1x1x16x16xbf16> -> vector<1x16x16x16xbf16>
    %155 = tpu.concatenate %152, %149, %154 in 3 : vector<1x16x16x16xbf16>, vector<1x16x16x16xbf16>, vector<1x16x16x16xbf16> -> vector<1x16x16x48xbf16>
    %cst_37 = arith.constant 0.000000e+00 : bf16
    %156 = vector.broadcast %cst_37 : bf16 to vector<1x16x1x48xbf16>
    %157 = vector.extract_strided_slice %155 {offsets = [0, 0, 0, 0], sizes = [1, 16, 15, 48], strides = [1, 1, 1, 1]} : vector<1x16x16x48xbf16> to vector<1x16x15x48xbf16>
    %158 = tpu.concatenate %156, %157 in 2 : vector<1x16x1x48xbf16>, vector<1x16x15x48xbf16> -> vector<1x16x16x48xbf16>
    %159 = vector.extract_strided_slice %155 {offsets = [0, 0, 1, 0], sizes = [1, 16, 15, 48], strides = [1, 1, 1, 1]} : vector<1x16x16x48xbf16> to vector<1x16x15x48xbf16>
    %160 = tpu.concatenate %159, %156 in 2 : vector<1x16x15x48xbf16>, vector<1x16x1x48xbf16> -> vector<1x16x16x48xbf16>
    %161 = tpu.concatenate %158, %155, %160 in 3 : vector<1x16x16x48xbf16>, vector<1x16x16x48xbf16>, vector<1x16x16x48xbf16> -> vector<1x16x16x144xbf16>
    %162 = vector.shape_cast %161 : vector<1x16x16x144xbf16> to vector<256x144xbf16>
    %c0_38 = arith.constant 0 : index
    %c0_39 = arith.constant 0 : index
    %163 = vector.load %arg7[%c0_38, %c0_39] : memref<144x2xbf16, #tpu.memory_space<vmem>>, vector<144x2xbf16>
    %cst_40 = arith.constant dense<0.000000e+00> : vector<256x2xf32>
    %164 = tpu.matmul %162, %163, %cst_40 {dimension_numbers = #tpu.dot_dimension_numbers<[1], [0], [0], [1], [0, 0, 1, 1], [], []>} : vector<256x144xbf16>, vector<144x2xbf16>, vector<256x2xf32> -> vector<256x2xf32>
    %165 = vector.extract_strided_slice %148 {offsets = [0, 0], sizes = [1, 2], strides = [1, 1]} : vector<1x64xf32> to vector<1x2xf32>
    %166 = vector.broadcast %165 : vector<1x2xf32> to vector<256x2xf32>
    %167 = arith.addf %164, %166 : vector<256x2xf32>
    %168 = vector.shape_cast %167 : vector<256x2xf32> to vector<1x16x16x2xf32>
    %c0_41 = arith.constant 0 : index
    %c0_42 = arith.constant 0 : index
    %c0_43 = arith.constant 0 : index
    %c0_44 = arith.constant 0 : index
    %169 = vector.load %arg9[%c0_41, %c0_42, %c0_43, %c0_44] : memref<1x16x16x2xf32, #tpu.memory_space<vmem>>, vector<1x16x16x2xf32>
    tpu.vector_store %arg9[%c0_41, %c0_42, %c0_43, %c0_44], %168 {strides = array<i32>} : memref<1x16x16x2xf32, #tpu.memory_space<vmem>>, vector<1x16x16x2xf32>,
    return
  }
  func.func @transform_0(%arg0: i32) -> (i32, i32, i32, i32) {
    %c0_i32 = arith.constant 0 : i32
    %c0_i32_0 = arith.constant 0 : i32
    %c0_i32_1 = arith.constant 0 : i32
    %c0_i32_2 = arith.constant 0 : i32
    return %arg0, %c0_i32, %c0_i32_0, %c0_i32_1 : i32, i32, i32, i32
  }
  func.func @transform_1(%arg0: i32) -> (i32, i32) {
    %c0_i32 = arith.constant 0 : i32
    %c0_i32_0 = arith.constant 0 : i32
    %c0_i32_1 = arith.constant 0 : i32
    return %c0_i32, %c0_i32_0 : i32, i32
  }
  func.func @transform_2(%arg0: i32) -> (i32, i32) {
    %c0_i32 = arith.constant 0 : i32
    %c0_i32_0 = arith.constant 0 : i32
    %c0_i32_1 = arith.constant 0 : i32
    return %c0_i32, %c0_i32_0 : i32, i32
  }
  func.func @transform_3(%arg0: i32) -> (i32, i32) {
    %c0_i32 = arith.constant 0 : i32
    %c0_i32_0 = arith.constant 0 : i32
    %c0_i32_1 = arith.constant 0 : i32
    return %c0_i32, %c0_i32_0 : i32, i32
  }
  func.func @transform_4(%arg0: i32) -> (i32, i32) {
    %c0_i32 = arith.constant 0 : i32
    %c0_i32_0 = arith.constant 0 : i32
    %c0_i32_1 = arith.constant 0 : i32
    return %c0_i32, %c0_i32_0 : i32, i32
  }
  func.func @transform_5(%arg0: i32) -> (i32, i32) {
    %c0_i32 = arith.constant 0 : i32
    %c0_i32_0 = arith.constant 0 : i32
    %c0_i32_1 = arith.constant 0 : i32
    return %c0_i32, %c0_i32_0 : i32, i32
  }
  func.func @transform_6(%arg0: i32) -> (i32, i32) {
    %c0_i32 = arith.constant 0 : i32
    %c0_i32_0 = arith.constant 0 : i32
    %c0_i32_1 = arith.constant 0 : i32
    return %c0_i32, %c0_i32_0 : i32, i32
  }
  func.func @transform_7(%arg0: i32) -> (i32, i32) {
    %c0_i32 = arith.constant 0 : i32
    %c0_i32_0 = arith.constant 0 : i32
    %c0_i32_1 = arith.constant 0 : i32
    return %c0_i32, %c0_i32_0 : i32, i32
  }
  func.func @transform_8(%arg0: i32) -> (i32, i32, i32, i32) {
    %c0_i32 = arith.constant 0 : i32
    %c0_i32_0 = arith.constant 0 : i32
    %c0_i32_1 = arith.constant 0 : i32
    %c0_i32_2 = arith.constant 0 : i32
    return %arg0, %c0_i32, %c0_i32_0, %c0_i32_1 : i32, i32, i32, i32
  }
}

</mosaic_0001>

<bundles_post_ra>
// kernel: simple_reg_unet_forward.1
= control target key start
LH: loop header
LB: loop body
LE: loop exit
PB: predicated region body
PF: predicated region fallthrough
CT: control target
= control target key end

     0   :  { %s8291_s27 = smov 0   ;;  %s11199_s0 = inlined_call_operand.vmem [shape: f32[2,16,16,2], index: 0, kind: input, shape index: {}]   ;;  %s11200_s1 = inlined_call_operand.vmem [shape: bf16[18,16], index: 1, kind: input, shape index: {}]   ;;  %s11201_s2 = inlined_call_operand.vmem [shape: bf16[144,32], index: 2, kind: input, shape index: {}]   ;;  %s11202_s3 = inlined_call_operand.vmem [shape: bf16[288,64], index: 3, kind: input, shape index: {}]   ;;  %s11203_s4 = inlined_call_operand.vmem [shape: bf16[576,32], index: 4, kind: input, shape index: {}]   ;;  %s11204_s5 = inlined_call_operand.vmem [shape: bf16[288,16], index: 5, kind: input, shape index: {}]   ;;  %s11205_s6 = inlined_call_operand.vmem [shape: bf16[144,2], index: 6, kind: input, shape index: {}]   ;;  %s11206_s7 = inlined_call_operand.vmem [shape: f32[6,64], index: 7, kind: input, shape index: {}]   ;;  %s11207_s8 = inlined_call_operand.vmem [shape: f32[2,16,16,2], index: 8, kind: output, shape index: {}]  }
   0x1 LB: > { %s7554_s28 = sadd.s32 4294967295, %s8230_s27   ;;  %p7558_p0 = scmp.ge.s32.totalorder %s8230_s27, 1  ;;  %s8230_s27 = sphi %s8291_s27, %s18_s27  }
   0x2   : > { %p262_p1 = scmp.lt.s32.totalorder %s8230_s27, 3 }
   0x4   : > { %p263_p2 = pnand %p7558_p0, %p262_p1 }
   0x6   : > { %266 = sbr.rel (%p263_p2) target bundleno = 3225 (0xc99), region = 52 }
   0xb   : > { %p296_p3 = scmp.lt.s32.totalorder %s7554_s28, 1  ;;  %v11208_v0 = vmov 0   ;;  %s8233_s11 = smov 4   ;;  %v8128_v49 = vld [vmem:[%s11200_s1 + $0x8] ss:$0 sps:$4 sm:$0x11]  }
   0xc   : > { %2728 = vmatprep.subr.bf16.mxu1 %v11208_v0  ;;  %s8234_s12 = smov 2   ;;  %vm631_vm0 = vcmask 1040384   ;;  %v8129_v51 = vld [vmem:[%s11200_s1] sm:$0xff]   ;;  %vm437_vm1 = vcmask 15360   ;;  %vm486_vm2 = vcmask 31744   ;;  %s8235_s17 = smov 6  }
   0xd   : > { %s11266_s28 = smov (!%p296_p3, %s7554_s28), 1  ;;  %8105 = vmatprep.subr.msk.bf16.mxu0 %vm631_vm0, %v8128_v49  ;;  %v946_v50 = vsel %vm631_vm0, %v8128_v49, 0  ;;  %vm698_vm3 = vcmask 1047552   ;;  %vm699_vm4 = vsmask.f32 7424  ;;  %s8236_s18 = smov 12  }
   0xe   : > { %s7746_s29 = sshll.u32 %s11266_s28, 8  ;;  %8010 = vmatpush3.bf16.msra.mxu0 %v946_v50  ;;  %vm8448_vm5 = vmand %vm698_vm3, %vm699_vm4  ;;  %vm632_vm6 = vsmask.f32 256  ;;  %vm813_vm8 = vcmask 48128   ;;  %vm862_vm9 = vcmask 97280   ;;  %vm911_vm10 = vcmask 146432  }
   0xf   : > { %s8308_s10 = scalar_lea.vmem %s11199_s0, %s7746_s29  ;;  %8011 = vmatprep.subr.bf16.mxu0 %v8129_v51  ;;  %vm8590_vm7 = vmand %vm631_vm0, %vm632_vm6  ;;  %vm1509_vm11 = vcmask 123904   ;;  %vm2134_vm12 = vcmask 1041409   ;;  %vm2136_vm13 = vcmask 1042434   ;;  %vm2138_vm14 = vcmask 1043459   ;;  %s8238_s21 = smov 16  }
  0x10   : > { %v310_v1 = vld [vmem:[%s8308_s10 + $0x10] sm:$0xff]  ;;  %v311_v2 = vld [vmem:[%s8308_s10 + $0x18] sm:$0xff]  ;;  %v308_v3 = vld [vmem:[%s8308_s10] sm:$0xff]  ;;  %vm2140_vm15 = vcmask 1044484   ;;  %vm2142_vm0 = vcmask 1045509   ;;  %vm2146_vm3 = vcmask 1047559   ;;  %s11098_s24 = scalar_lea.vmem %s11207_s8, %s7746_s29 }
  0x11   : > { %v8313_v4 = vpack.c.bf16 %v311_v2, %v310_v1  ;;  %v309_v5 = vld [vmem:[%s8308_s10 + $0x8] sm:$0xff]  ;;  %v312_v6 = vld [vmem:[%s8308_s10 + $0x20] sm:$0xff]  ;;  %v314_v10 = vld [vmem:[%s8308_s10 + $0x30] sm:$0xff]  ;;  %v11224_v1 = vmov 0  ;;  %s8239_s22 = smov 32   ;;  %vm2374_vm4 = vcmask 130048  }
  0x12   : > { %v313_v7 = vld [vmem:[%s8308_s10 + $0x28] sm:$0xff]  ;;  %v8318_v8 = vpack.c.bf16 %v309_v5, %v308_v3  ;;  %v315_v11 = vld [vmem:[%s8308_s10 + $0x38] sm:$0xff]  ;;  %v316_v13 = vld [vmem:[%s8308_s10 + $0x40] sm:$0xff]  ;;  %8012 = vmatpush3.bf16.msra.mxu0 %v8129_v51  ;;  %v11225_v1 = vsel %vm8448_vm5, 4294967295, %v11224_v1  ;;  %vm2398_vm6 = vcmask 261120   ;;  %s8241_s19 = smov 96  }
  0x13   : > { %405 = vrot.lane.b32.xlu1 %v8313_v4, %s8233_s11  ;;  %v8322_v9 = vpack.c.bf16 %v313_v7, %v312_v6  ;;  %v8330_v12 = vpack.c.bf16 %v315_v11, %v314_v10  ;;  %v317_v14 = vld [vmem:[%s8308_s10 + $0x48] sm:$0xff]  ;;  %v318_v15 = vld [vmem:[%s8308_s10 + $0x50] sm:$0xff]  ;;  %v319_v16 = vld [vmem:[%s8308_s10 + $0x58] sm:$0xff]  ;;  %11226 = vst [vmem:[#allocation2_spill] sm:$0xff] %v11225_v1  ;;  %s8242_s9 = smov 64  }
  0x14   : > { %372 = vrot.lane.b32.xlu0 %v8318_v8, %s8234_s12  ;;  %v8340_v17 = vpack.c.bf16 %v317_v14, %v316_v13  ;;  %v320_v18 = vld [vmem:[%s8308_s10 + $0x60] sm:$0xff]  ;;  %v321_v19 = vld [vmem:[%s8308_s10 + $0x68] sm:$0xff]  ;;  %v8348_v20 = vpack.c.bf16 %v319_v16, %v318_v15  ;;  %v322_v21 = vld [vmem:[%s8308_s10 + $0x70] sm:$0xff] }
  0x15   : > { %v323_v22 = vld [vmem:[%s8308_s10 + $0x78] sm:$0xff]  ;;  %v8356_v23 = vpack.c.bf16 %v321_v19, %v320_v18  ;;  %v324_v24 = vld [vmem:[%s8308_s10 + $0x80] sm:$0xff]  ;;  %v325_v25 = vld [vmem:[%s8308_s10 + $0x88] sm:$0xff] }
  0x16   : > { %v8364_v26 = vpack.c.bf16 %v323_v22, %v322_v21  ;;  %v326_v27 = vld [vmem:[%s8308_s10 + $0x90] sm:$0xff]  ;;  %v327_v28 = vld [vmem:[%s8308_s10 + $0x98] sm:$0xff]  ;;  %v8372_v29 = vpack.c.bf16 %v325_v25, %v324_v24  ;;  %v328_v30 = vld [vmem:[%s8308_s10 + $0xa0] sm:$0xff] }
  0x17   : > { %407 = vrot.lane.b32.xlu1 %v8322_v9, %s8233_s11  ;;  %v329_v31 = vld [vmem:[%s8308_s10 + $0xa8] sm:$0xff]  ;;  %v8380_v32 = vpack.c.bf16 %v327_v28, %v326_v27  ;;  %v330_v33 = vld [vmem:[%s8308_s10 + $0xb0] sm:$0xff]  ;;  %v331_v34 = vld [vmem:[%s8308_s10 + $0xb8] sm:$0xff] }
  0x18   : > { %374 = vrot.lane.b32.xlu0 %v8313_v4, %s8234_s12  ;;  %v8388_v35 = vpack.c.bf16 %v329_v31, %v328_v30  ;;  %v332_v36 = vld [vmem:[%s8308_s10 + $0xc0] sm:$0xff]  ;;  %v333_v37 = vld [vmem:[%s8308_s10 + $0xc8] sm:$0xff]  ;;  %v8396_v38 = vpack.c.bf16 %v331_v34, %v330_v33  ;;  %v334_v39 = vld [vmem:[%s8308_s10 + $0xd0] sm:$0xff] }
  0x19   : > { %v335_v40 = vld [vmem:[%s8308_s10 + $0xd8] sm:$0xff]  ;;  %v8404_v41 = vpack.c.bf16 %v333_v37, %v332_v36  ;;  %v336_v42 = vld [vmem:[%s8308_s10 + $0xe0] sm:$0xff]  ;;  %v337_v43 = vld [vmem:[%s8308_s10 + $0xe8] sm:$0xff] }
  0x1a   : > { %v8412_v44 = vpack.c.bf16 %v335_v40, %v334_v39  ;;  %v338_v45 = vld [vmem:[%s8308_s10 + $0xf0] sm:$0xff]  ;;  %v339_v46 = vld [vmem:[%s8308_s10 + $0xf8] sm:$0xff]  ;;  %v8420_v47 = vpack.c.bf16 %v337_v43, %v336_v42 }
  0x1b   : > { %378 = vrot.lane.b32.xlu1 %v8330_v12, %s8234_s12  ;;  %v355_v48 = vpack.c.bf16 %v339_v46, %v338_v45 }
  0x1c   : > { %376 = vrot.lane.b32.xlu0 %v8322_v9, %s8234_s12 }
  0x1f   : > { %411 = vrot.lane.b32.xlu1 %v8340_v17, %s8233_s11 }
  0x20   : > { %409 = vrot.lane.b32.xlu0 %v8330_v12, %s8233_s11 }
  0x23   : > { %382 = vrot.lane.b32.xlu1 %v8348_v20, %s8234_s12 }
  0x24   : > { %380 = vrot.lane.b32.xlu0 %v8340_v17, %s8234_s12 }
  0x27   : > { %415 = vrot.lane.b32.xlu1 %v8356_v23, %s8233_s11 }
  0x28   : > { %413 = vrot.lane.b32.xlu0 %v8348_v20, %s8233_s11 }
  0x2b   : > { %386 = vrot.lane.b32.xlu1 %v8364_v26, %s8234_s12 }
  0x2c   : > { %384 = vrot.lane.b32.xlu0 %v8356_v23, %s8234_s12 }
  0x2f   : > { %419 = vrot.lane.b32.xlu1 %v8372_v29, %s8233_s11 }
  0x30   : > { %417 = vrot.lane.b32.xlu0 %v8364_v26, %s8233_s11 }
  0x33   : > { %390 = vrot.lane.b32.xlu1 %v8380_v32, %s8234_s12 }
  0x34   : > { %388 = vrot.lane.b32.xlu0 %v8372_v29, %s8234_s12 }
  0x37   : > { %423 = vrot.lane.b32.xlu1 %v8388_v35, %s8233_s11 }
  0x38   : > { %421 = vrot.lane.b32.xlu0 %v8380_v32, %s8233_s11 }
  0x3b   : > { %394 = vrot.lane.b32.xlu1 %v8396_v38, %s8234_s12 }
  0x3c   : > { %392 = vrot.lane.b32.xlu0 %v8388_v35, %s8234_s12 }
  0x3f   : > { %427 = vrot.lane.b32.xlu1 %v8404_v41, %s8233_s11 }
  0x40   : > { %425 = vrot.lane.b32.xlu0 %v8396_v38, %s8233_s11 }
  0x43   : > { %398 = vrot.lane.b32.xlu1 %v8412_v44, %s8234_s12 }
  0x44   : > { %396 = vrot.lane.b32.xlu0 %v8404_v41, %s8234_s12 }
  0x47   : > { %431 = vrot.lane.b32.xlu1 %v8420_v47, %s8233_s11 }
  0x48   : > { %429 = vrot.lane.b32.xlu0 %v8412_v44, %s8233_s11 }
  0x4b   : > { %402 = vrot.lane.b32.xlu1 %v355_v48, %s8234_s12 }
  0x4c   : > { %400 = vrot.lane.b32.xlu0 %v8420_v47, %s8234_s12 }
  0x4f   : > { %435 = vrot.lane.b32.xlu1 %v11208_v0, %s8233_s11 }
  0x50   : > { %433 = vrot.lane.b32.xlu0 %v355_v48, %s8233_s11 }
  0x85   : > { %v406_v52 = vpop.permute.xlu1 %405 }
  0x86   : > { %v373_v53 = vpop.permute.xlu0 %372 }
  0x87   : > { %v440_v54 = vsel %vm437_vm1, 0, %v373_v53 }
  0x88   : > { %v488_v55 = vsel %vm486_vm2, %v440_v54, %v406_v52 }
  0x89   : > { %733 = vrot.lane.b32.xlu0 %v488_v55, %s8235_s17  ;;  %v519_v56 = vshrl.u32 %v488_v55, 16  ;;  %v522_v57 = vshll.u32 %v488_v55, 16  ;;  %v408_v58 = vpop.permute.xlu1 %407 }
  0x8a   : > { %v375_v59 = vpop.permute.xlu0 %374 }
  0x8b   : > { %v521_v60 = vrot.slane %v519_v56, 7  ;;  %v443_v61 = vsel %vm437_vm1, %v8318_v8, %v375_v59  ;;  %v650_v62 = vrot.slane %v522_v57, 1 }
  0x8c   : > { %v490_v63 = vsel %vm486_vm2, %v443_v61, %v408_v58 }
  0x8d   : > { %735 = vrot.lane.b32.xlu1 %v490_v63, %s8235_s17  ;;  %v525_v2 = vshrl.u32 %v490_v63, 16  ;;  %v528_v3 = vshll.u32 %v490_v63, 16  ;;  %v379_v5 = vpop.permute.xlu1 %378  ;;  %v651_v6 = vor.u32 %v650_v62, %v519_v56  ;;  %v8453_v7 = vor.u32 %v522_v57, %v521_v60 }
  0x8e   : > { %v377_v10 = vpop.permute.xlu0 %376  ;;  %v449_v14 = vsel %vm437_vm1, %v8322_v9, %v379_v5 }
  0x8f   : > { %v527_v11 = vrot.slane %v525_v2, 7  ;;  %v701_v8 = vsel %vm8448_vm5, %v651_v6, 0  ;;  %v652_v13 = vrot.slane %v528_v3, 1  ;;  %v446_v19 = vsel %vm437_vm1, %v8313_v4, %v377_v10 }
  0x90   : > { %781 = vrot.lane.b32.xlu0 %v701_v8, %s8236_s18 }
  0x91   : > { %v412_v15 = vpop.permute.xlu1 %411  ;;  %v653_v16 = vor.u32 %v652_v13, %v525_v2  ;;  %v8460_v18 = vor.u32 %v528_v3, %v527_v11 }
  0x92   : > { %v410_v21 = vpop.permute.xlu0 %409  ;;  %v494_v22 = vsel %vm486_vm2, %v449_v14, %v412_v15 }
  0x93   : > { %v702_v24 = vsel %vm8448_vm5, %v653_v16, 0  ;;  %v492_v25 = vsel %vm486_vm2, %v446_v19, %v410_v21  ;;  %v537_v27 = vshrl.u32 %v494_v22, 16  ;;  %v540_v28 = vshll.u32 %v494_v22, 16 }
  0x94   : > { %783 = vrot.lane.b32.xlu1 %v702_v24, %s8236_s18  ;;  %737 = vrot.lane.b32.xlu0 %v492_v25, %s8235_s17  ;;  %v531_v9 = vshrl.u32 %v492_v25, 16  ;;  %v534_v30 = vshll.u32 %v492_v25, 16 }
  0x95   : > { %v383_v31 = vpop.permute.xlu1 %382  ;;  %v539_v33 = vrot.slane %v537_v27, 7  ;;  %v656_v34 = vrot.slane %v540_v28, 1 }
  0x96   : > { %v533_v4 = vrot.slane %v531_v9, 7  ;;  %v381_v36 = vpop.permute.xlu0 %380  ;;  %v654_v37 = vrot.slane %v534_v30, 1  ;;  %v455_v45 = vsel %vm437_vm1, %v8340_v17, %v383_v31 }
  0x97   : > { %v657_v39 = vor.u32 %v656_v34, %v537_v27  ;;  %v8470_v40 = vor.u32 %v540_v28, %v539_v33  ;;  %v452_v49 = vsel %vm437_vm1, %v8330_v12, %v381_v36 }
  0x98   : > { %739 = vrot.lane.b32.xlu1 %v494_v22, %s8235_s17  ;;  %v655_v42 = vor.u32 %v654_v37, %v531_v9  ;;  %v8473_v43 = vor.u32 %v534_v30, %v533_v4 }
  0x99   : > { %v416_v46 = vpop.permute.xlu1 %415  ;;  %v704_v48 = vsel %vm8448_vm5, %v657_v39, 0 }
  0x9a   : > { %v414_v50 = vpop.permute.xlu0 %413  ;;  %v703_v51 = vsel %vm8448_vm5, %v655_v42, 0  ;;  %v498_v52 = vsel %vm486_vm2, %v455_v45, %v416_v46 }
  0x9b   : > { %785 = vrot.lane.b32.xlu0 %v703_v51, %s8236_s18  ;;  %v496_v53 = vsel %vm486_vm2, %v452_v49, %v414_v50  ;;  %v549_v54 = vshrl.u32 %v498_v52, 16  ;;  %v552_v55 = vshll.u32 %v498_v52, 16 }
  0x9c   : > { %787 = vrot.lane.b32.xlu1 %v704_v48, %s8236_s18  ;;  %v543_v17 = vshrl.u32 %v496_v53, 16  ;;  %v546_v56 = vshll.u32 %v496_v53, 16 }
  0x9d   : > { %v387_v57 = vpop.permute.xlu1 %386  ;;  %v551_v58 = vrot.slane %v549_v54, 7  ;;  %v660_v59 = vrot.slane %v552_v55, 1 }
  0x9e   : > { %v385_v12 = vpop.permute.xlu0 %384  ;;  %v545_v60 = vrot.slane %v543_v17, 7  ;;  %v658_v61 = vrot.slane %v546_v56, 1  ;;  %v461_v5 = vsel %vm437_vm1, %v8356_v23, %v387_v57 }
  0x9f   : > { %741 = vrot.lane.b32.xlu0 %v496_v53, %s8235_s17  ;;  %v661_v62 = vor.u32 %v660_v59, %v549_v54  ;;  %v8488_v63 = vor.u32 %v552_v55, %v551_v58  ;;  %v458_v11 = vsel %vm437_vm1, %v8348_v20, %v385_v12 }
  0xa0   : > { %743 = vrot.lane.b32.xlu1 %v498_v52, %s8235_s17  ;;  %v659_v2 = vor.u32 %v658_v61, %v543_v17  ;;  %v8491_v3 = vor.u32 %v546_v56, %v545_v60 }
  0xa1   : > { %v420_v6 = vpop.permute.xlu1 %419  ;;  %v706_v10 = vsel %vm8448_vm5, %v661_v62, 0 }
  0xa2   : > { %v418_v8 = vpop.permute.xlu0 %417  ;;  %v705_v13 = vsel %vm8448_vm5, %v659_v2, 0  ;;  %v502_v14 = vsel %vm486_vm2, %v461_v5, %v420_v6 }
  0xa3   : > { %789 = vrot.lane.b32.xlu0 %v705_v13, %s8236_s18  ;;  %v500_v15 = vsel %vm486_vm2, %v458_v11, %v418_v8  ;;  %v561_v16 = vshrl.u32 %v502_v14, 16  ;;  %v564_v19 = vshll.u32 %v502_v14, 16 }
  0xa4   : > { %791 = vrot.lane.b32.xlu1 %v706_v10, %s8236_s18  ;;  %v555_v23 = vshrl.u32 %v500_v15, 16  ;;  %v558_v21 = vshll.u32 %v500_v15, 16 }
  0xa5   : > { %v391_v22 = vpop.permute.xlu1 %390  ;;  %v563_v24 = vrot.slane %v561_v16, 7  ;;  %v664_v25 = vrot.slane %v564_v19, 1 }
  0xa6   : > { %v389_v20 = vpop.permute.xlu0 %388  ;;  %v557_v27 = vrot.slane %v555_v23, 7  ;;  %v662_v28 = vrot.slane %v558_v21, 1  ;;  %v467_v34 = vsel %vm437_vm1, %v8372_v29, %v391_v22 }
  0xa7   : > { %745 = vrot.lane.b32.xlu0 %v500_v15, %s8235_s17  ;;  %v665_v9 = vor.u32 %v664_v25, %v561_v16  ;;  %v8506_v30 = vor.u32 %v564_v19, %v563_v24  ;;  %v464_v37 = vsel %vm437_vm1, %v8364_v26, %v389_v20 }
  0xa8   : > { %747 = vrot.lane.b32.xlu1 %v502_v14, %s8235_s17  ;;  %v663_v31 = vor.u32 %v662_v28, %v555_v23  ;;  %v8509_v33 = vor.u32 %v558_v21, %v557_v27 }
  0xa9   : > { %v424_v4 = vpop.permute.xlu1 %423  ;;  %v708_v36 = vsel %vm8448_vm5, %v665_v9, 0 }
  0xaa   : > { %v422_v39 = vpop.permute.xlu0 %421  ;;  %v707_v42 = vsel %vm8448_vm5, %v663_v31, 0  ;;  %v506_v45 = vsel %vm486_vm2, %v467_v34, %v424_v4 }
  0xab   : > { %793 = vrot.lane.b32.xlu0 %v707_v42, %s8236_s18  ;;  %v504_v46 = vsel %vm486_vm2, %v464_v37, %v422_v39  ;;  %v573_v48 = vshrl.u32 %v506_v45, 16  ;;  %v576_v49 = vshll.u32 %v506_v45, 16 }
  0xac   : > { %795 = vrot.lane.b32.xlu1 %v708_v36, %s8236_s18  ;;  %v567_v29 = vshrl.u32 %v504_v46, 16  ;;  %v570_v50 = vshll.u32 %v504_v46, 16 }
  0xad   : > { %v395_v51 = vpop.permute.xlu1 %394  ;;  %v575_v52 = vrot.slane %v573_v48, 7  ;;  %v668_v53 = vrot.slane %v576_v49, 1 }
  0xae   : > { %v393_v26 = vpop.permute.xlu0 %392  ;;  %v569_v54 = vrot.slane %v567_v29, 7  ;;  %v666_v55 = vrot.slane %v570_v50, 1  ;;  %v473_v59 = vsel %vm437_vm1, %v8388_v35, %v395_v51 }
  0xaf   : > { %749 = vrot.lane.b32.xlu0 %v504_v46, %s8235_s17  ;;  %v669_v17 = vor.u32 %v668_v53, %v573_v48  ;;  %v8524_v56 = vor.u32 %v576_v49, %v575_v52  ;;  %v470_v61 = vsel %vm437_vm1, %v8380_v32, %v393_v26 }
  0xb0   : > { %751 = vrot.lane.b32.xlu1 %v506_v45, %s8235_s17  ;;  %v667_v57 = vor.u32 %v666_v55, %v567_v29  ;;  %v8527_v58 = vor.u32 %v570_v50, %v569_v54 }
  0xb1   : > { %v428_v12 = vpop.permute.xlu1 %427  ;;  %v710_v60 = vsel %vm8448_vm5, %v669_v17, 0 }
  0xb2   : > { %v426_v62 = vpop.permute.xlu0 %425  ;;  %v709_v2 = vsel %vm8448_vm5, %v667_v57, 0  ;;  %v510_v5 = vsel %vm486_vm2, %v473_v59, %v428_v12 }
  0xb3   : > { %797 = vrot.lane.b32.xlu0 %v709_v2, %s8236_s18  ;;  %v508_v6 = vsel %vm486_vm2, %v470_v61, %v426_v62  ;;  %v585_v10 = vshrl.u32 %v510_v5, 16  ;;  %v588_v11 = vshll.u32 %v510_v5, 16 }
  0xb4   : > { %799 = vrot.lane.b32.xlu1 %v710_v60, %s8236_s18  ;;  %v579_v35 = vshrl.u32 %v508_v6, 16  ;;  %v582_v8 = vshll.u32 %v508_v6, 16 }
  0xb5   : > { %v399_v13 = vpop.permute.xlu1 %398  ;;  %v587_v14 = vrot.slane %v585_v10, 7  ;;  %v672_v15 = vrot.slane %v588_v11, 1 }
  0xb6   : > { %v397_v32 = vpop.permute.xlu0 %396  ;;  %v581_v16 = vrot.slane %v579_v35, 7  ;;  %v670_v19 = vrot.slane %v582_v8, 1  ;;  %v479_v25 = vsel %vm437_vm1, %v8404_v41, %v399_v13 }
  0xb7   : > { %753 = vrot.lane.b32.xlu0 %v508_v6, %s8235_s17  ;;  %v673_v23 = vor.u32 %v672_v15, %v585_v10  ;;  %v8542_v21 = vor.u32 %v588_v11, %v587_v14  ;;  %v476_v28 = vsel %vm437_vm1, %v8396_v38, %v397_v32  ;;  %v11227_v15 = vmov 0 }
  0xb8   : > { %755 = vrot.lane.b32.xlu1 %v510_v5, %s8235_s17  ;;  %v671_v22 = vor.u32 %v670_v19, %v579_v35  ;;  %v8545_v24 = vor.u32 %v582_v8, %v581_v16  ;;  %v11228_v15 = vsel %vm8590_vm7, 4294967295, %v11227_v15  ;;  %v634_v16 = vsel %vm8590_vm7, 0, %v8453_v7 }
  0xb9   : > { %v432_v20 = vpop.permute.xlu1 %431  ;;  %v712_v27 = vsel %vm8448_vm5, %v673_v23, 0  ;;  %11229 = vst [vmem:[#allocation3_spill] sm:$0xff] %v11228_v15 }
  0xba   : > { %v430_v9 = vpop.permute.xlu0 %429  ;;  %v711_v31 = vsel %vm8448_vm5, %v671_v22, 0  ;;  %v514_v34 = vsel %vm486_vm2, %v479_v25, %v432_v20  ;;  %v635_v20 = vsel %vm8590_vm7, 0, %v8460_v18 }
  0xbb   : > { %801 = vrot.lane.b32.xlu0 %v711_v31, %s8236_s18  ;;  %v512_v4 = vsel %vm486_vm2, %v476_v28, %v430_v9  ;;  %v597_v36 = vshrl.u32 %v514_v34, 16  ;;  %v600_v37 = vshll.u32 %v514_v34, 16 }
  0xbc   : > { %803 = vrot.lane.b32.xlu1 %v712_v27, %s8236_s18  ;;  %v591_v41 = vshrl.u32 %v512_v4, 16  ;;  %v594_v39 = vshll.u32 %v512_v4, 16 }
  0xbd   : > { %v403_v42 = vpop.permute.xlu1 %402  ;;  %v599_v45 = vrot.slane %v597_v36, 7  ;;  %v676_v46 = vrot.slane %v600_v37, 1 }
  0xbe   : > { %v401_v38 = vpop.permute.xlu0 %400  ;;  %v593_v48 = vrot.slane %v591_v41, 7  ;;  %v674_v49 = vrot.slane %v594_v39, 1  ;;  %v485_v53 = vsel %vm437_vm1, %v8420_v47, %v403_v42 }
  0xbf   : > { %757 = vrot.lane.b32.xlu0 %v512_v4, %s8235_s17  ;;  %v677_v29 = vor.u32 %v676_v46, %v597_v36  ;;  %v8560_v50 = vor.u32 %v600_v37, %v599_v45  ;;  %v482_v55 = vsel %vm437_vm1, %v8412_v44, %v401_v38  ;;  %v637_v36 = vsel %vm8590_vm7, 0, %v8470_v40 }
  0xc0   : > { %759 = vrot.lane.b32.xlu1 %v514_v34, %s8235_s17  ;;  %v675_v51 = vor.u32 %v674_v49, %v591_v41  ;;  %v8563_v52 = vor.u32 %v594_v39, %v593_v48  ;;  %v636_v34 = vsel %vm8590_vm7, 0, %v8473_v43  ;;  %v638_v46 = vsel %vm8590_vm7, 0, %v8491_v3 }
  0xc1   : > { %v436_v26 = vpop.permute.xlu1 %435  ;;  %v714_v54 = vsel %vm8448_vm5, %v677_v29, 0  ;;  %v639_v38 = vsel %vm8590_vm7, 0, %v8488_v63 }
  0xc2   : > { %v434_v17 = vpop.permute.xlu0 %433  ;;  %v713_v57 = vsel %vm8448_vm5, %v675_v51, 0  ;;  %v518_v59 = vsel %vm486_vm2, %v485_v53, %v436_v26 }
  0xc3   : > { %805 = vrot.lane.b32.xlu0 %v713_v57, %s8236_s18  ;;  %v516_v12 = vsel %vm486_vm2, %v482_v55, %v434_v17  ;;  %v609_v60 = vshrl.u32 %v518_v59, 16  ;;  %v612_v61 = vshll.u32 %v518_v59, 16  ;;  %v641_v55 = vsel %vm8590_vm7, 0, %v8506_v30 }
  0xc4   : > { %807 = vrot.lane.b32.xlu1 %v714_v54, %s8236_s18  ;;  %v603_v47 = vshrl.u32 %v516_v12, 16  ;;  %v606_v62 = vshll.u32 %v516_v12, 16  ;;  %v640_v54 = vsel %vm8590_vm7, 0, %v8509_v33  ;;  %vm2144_vm2 = vcmask 1046534  }
  0xc5   : > { %v611_v2 = vrot.slane %v609_v60, 7  ;;  %v680_v5 = vrot.slane %v612_v61, 1 }
  0xc6   : > { %v605_v6 = vrot.slane %v603_v47, 7  ;;  %v678_v44 = vrot.slane %v606_v62, 1 }
  0xc7   : > { %761 = vrot.lane.b32.xlu0 %v516_v12, %s8235_s17  ;;  %v681_v10 = vor.u32 %v680_v5, %v609_v60  ;;  %v8578_v11 = vor.u32 %v612_v61, %v611_v2 }
  0xc8   : > { %763 = vrot.lane.b32.xlu1 %v518_v59, %s8235_s17  ;;  %v679_v35 = vor.u32 %v678_v44, %v603_v47  ;;  %v8581_v8 = vor.u32 %v606_v62, %v605_v6  ;;  %v642_v47 = vsel %vm8590_vm7, 0, %v8527_v58  ;;  %v643_v62 = vsel %vm8590_vm7, 0, %v8524_v56 }
  0xc9   : > { %v716_v13 = vsel %vm8448_vm5, %v681_v10, 0 }
  0xca   : > { %v715_v14 = vsel %vm8448_vm5, %v679_v35, 0 }
  0xcb   : > { %809 = vrot.lane.b32.xlu0 %v715_v14, %s8236_s18  ;;  %v645_v14 = vsel %vm8590_vm7, 0, %v8542_v21 }
  0xcc   : > { %811 = vrot.lane.b32.xlu1 %v716_v13, %s8236_s18  ;;  %v644_v13 = vsel %vm8590_vm7, 0, %v8545_v24  ;;  %s8240_s18 = smov 48  }
  0xfb   : > { %v734_v32 = vpop.permute.xlu0 %733 }
  0xfc   : > { %v816_v19 = vsel %vm813_vm8, %v634_v16, %v734_v32 }
  0xff   : > { %v736_v23 = vpop.permute.xlu1 %735 }
 0x100   : > { %v819_v27 = vsel %vm813_vm8, %v635_v20, %v736_v23  ;;  %v646_v20 = vsel %vm8590_vm7, 0, %v8563_v52 }
 0x102   : > { %v782_v22 = vpop.permute.xlu0 %781 }
 0x103   : > { %v864_v25 = vsel %vm862_vm9, %v816_v19, %v782_v22 }
 0x104   : > { %8013 = vmatprep.mubr.msk.bf16.mxu0 %vm911_vm10, %v864_v25 }
 0x106   : > { %v784_v28 = vpop.permute.xlu1 %783  ;;  %v738_v7 = vpop.permute.xlu0 %737 }
 0x107   : > { %v866_v9 = vsel %vm862_vm9, %v819_v27, %v784_v28  ;;  %v822_v4 = vsel %vm813_vm8, %v636_v34, %v738_v7  ;;  %v647_v27 = vsel %vm8590_vm7, 0, %v8560_v50 }
 0x108   : > { %8014 = vmatmul.mubr.msk.bf16.vlgmr.msra.gmra.mxu0 %vm911_vm10, %v866_v9 }
 0x10a   : > { %v740_v31 = vpop.permute.xlu1 %739 }
 0x10b   : > { %v825_v37 = vsel %vm813_vm8, %v637_v36, %v740_v31  ;;  %v648_v36 = vsel %vm8590_vm7, 0, %v8581_v8 }
 0x10d   : > { %v786_v18 = vpop.permute.xlu0 %785 }
 0x10e   : > { %v868_v41 = vsel %vm862_vm9, %v822_v4, %v786_v18  ;;  %v788_v39 = vpop.permute.xlu1 %787  ;;  %v649_v18 = vsel %vm8590_vm7, 0, %v8578_v11  ;;  %v307_v11 = vld [vmem:[%s11206_s7] sm:$0x3f] }
 0x10f   : > { %v870_v42 = vsel %vm862_vm9, %v825_v37, %v788_v39  ;;  %8017 = vmatprep.mubr.msk.bf16.mxu0 %vm911_vm10, %v868_v41 }
 0x110   : > { %8018 = vmatmul.mubr.msk.bf16.gmra.mxu0 %vm911_vm10, %v870_v42 }
 0x111   : > { %v742_v45 = vpop.permute.xlu0 %741 }
 0x112   : > { %v744_v43 = vpop.permute.xlu1 %743  ;;  %v828_v40 = vsel %vm813_vm8, %v638_v46, %v742_v45 }
 0x113   : > { %v831_v49 = vsel %vm813_vm8, %v639_v38, %v744_v43  ;;  %v898_v43 = vlaneseq  ;;  %v8237_v38 = vmov 1983009808  }
 0x115   : > { %v790_v48 = vpop.permute.xlu0 %789  ;;  %v8690_v8 = vshrl.u32 %v898_v43, 7 }
 0x116   : > { %v872_v29 = vsel %vm862_vm9, %v828_v40, %v790_v48  ;;  %v792_v51 = vpop.permute.xlu1 %791  ;;  %v1175_v48 = vunpack.c.l.s4 %v8237_v38 }
 0x117   : > { %v874_v53 = vsel %vm862_vm9, %v831_v49, %v792_v51  ;;  %8021 = vmatprep.mubr.msk.bf16.mxu0 %vm911_vm10, %v872_v29  ;;  %11230 = vst [vmem:[#allocation4_spill] sm:$0xff] %v8690_v8  ;;  %v8693_v46 = vsub.s32 0, %v8690_v8 }
 0x118   : > { %8022 = vmatmul.mubr.msk.bf16.gmra.mxu0 %vm911_vm10, %v874_v53  ;;  %v1176_v51 = vunpack.c.0.s8 %v1175_v48 }
 0x119   : > { %v746_v26 = vpop.permute.xlu0 %745  ;;  %11231 = vst [vmem:[#allocation5_spill] sm:$0xff] %v8693_v46  ;;  %v8699_v40 = vrot.slane %v307_v11, %v8693_v46 }
 0x11a   : > { %v748_v3 = vpop.permute.xlu1 %747  ;;  %v834_v63 = vsel %vm813_vm8, %v640_v54, %v746_v26 }
 0x11b   : > { %v837_v57 = vsel %vm813_vm8, %v641_v55, %v748_v3  ;;  %v8704_v55 = vsub.s32 %v1176_v51, %v8690_v8 }
 0x11d   : > { %v794_v17 = vpop.permute.xlu0 %793 }
 0x11e   : > { %v876_v59 = vsel %vm862_vm9, %v834_v63, %v794_v17  ;;  %v796_v12 = vpop.permute.xlu1 %795 }
 0x11f   : > { %v878_v60 = vsel %vm862_vm9, %v837_v57, %v796_v12  ;;  %8025 = vmatprep.mubr.msk.bf16.mxu0 %vm911_vm10, %v876_v59 }
 0x120   : > { %8026 = vmatmul.mubr.msk.bf16.gmra.mxu0 %vm911_vm10, %v878_v60 }
 0x121   : > { %v750_v61 = vpop.permute.xlu0 %749 }
 0x122   : > { %v752_v33 = vpop.permute.xlu1 %751  ;;  %v840_v30 = vsel %vm813_vm8, %v642_v47, %v750_v61 }
 0x123   : > { %v843_v5 = vsel %vm813_vm8, %v643_v62, %v752_v33 }
 0x125   : > { %v798_v2 = vpop.permute.xlu0 %797 }
 0x126   : > { %v880_v6 = vsel %vm862_vm9, %v840_v30, %v798_v2  ;;  %v800_v44 = vpop.permute.xlu1 %799 }
 0x127   : > { %v882_v10 = vsel %vm862_vm9, %v843_v5, %v800_v44  ;;  %8029 = vmatprep.mubr.msk.bf16.mxu0 %vm911_vm10, %v880_v6 }
 0x128   : > { %8030 = vmatmul.mubr.msk.bf16.gmra.mxu0 %vm911_vm10, %v882_v10 }
 0x129   : > { %v754_v35 = vpop.permute.xlu0 %753 }
 0x12a   : > { %v756_v58 = vpop.permute.xlu1 %755  ;;  %v846_v56 = vsel %vm813_vm8, %v644_v13, %v754_v35 }
 0x12b   : > { %v849_v16 = vsel %vm813_vm8, %v645_v14, %v756_v58 }
 0x12d   : > { %v802_v32 = vpop.permute.xlu0 %801 }
 0x12e   : > { %v884_v19 = vsel %vm862_vm9, %v846_v56, %v802_v32  ;;  %v804_v23 = vpop.permute.xlu1 %803 }
 0x12f   : > { %v886_v22 = vsel %vm862_vm9, %v849_v16, %v804_v23  ;;  %8033 = vmatprep.mubr.msk.bf16.mxu0 %vm911_vm10, %v884_v19 }
 0x130   : > { %8034 = vmatmul.mubr.msk.bf16.gmra.mxu0 %vm911_vm10, %v886_v22 }
 0x131   : > { %v758_v25 = vpop.permute.xlu0 %757 }
 0x132   : > { %v760_v24 = vpop.permute.xlu1 %759  ;;  %v852_v21 = vsel %vm813_vm8, %v646_v20, %v758_v25 }
 0x133   : > { %v855_v9 = vsel %vm813_vm8, %v647_v27, %v760_v24 }
 0x135   : > { %v806_v28 = vpop.permute.xlu0 %805 }
 0x136   : > { %v888_v7 = vsel %vm862_vm9, %v852_v21, %v806_v28  ;;  %v808_v31 = vpop.permute.xlu1 %807 }
 0x137   : > { %v890_v34 = vsel %vm862_vm9, %v855_v9, %v808_v31  ;;  %8037 = vmatprep.mubr.msk.bf16.mxu0 %vm911_vm10, %v888_v7 }
 0x138   : > { %8038 = vmatmul.mubr.msk.bf16.gmra.mxu0 %vm911_vm10, %v890_v34 }
 0x139   : > { %v762_v4 = vpop.permute.xlu0 %761 }
 0x13a   : > { %v764_v52 = vpop.permute.xlu1 %763  ;;  %v858_v50 = vsel %vm813_vm8, %v648_v36, %v762_v4 }
 0x13b   : > { %v861_v41 = vsel %vm813_vm8, %v649_v18, %v764_v52  ;;  %vm2503_vm8 = vcmask 1043456  }
 0x13d   : > { %v810_v37 = vpop.permute.xlu0 %809 }
 0x13e   : > { %v892_v39 = vsel %vm862_vm9, %v858_v50, %v810_v37  ;;  %v812_v42 = vpop.permute.xlu1 %811 }
 0x13f   : > { %v894_v45 = vsel %vm862_vm9, %v861_v41, %v812_v42  ;;  %8041 = vmatprep.mubr.msk.bf16.mxu0 %vm911_vm10, %v892_v39  ;;  %vm2504_vm9 = vsmask.f32 3328 }
 0x140   : > { %8042 = vmatmul.mubr.msk.bf16.gmra.mxu0 %vm911_vm10, %v894_v45  ;;  %vm9357_vm10 = vmand %vm2503_vm8, %vm2504_vm9 }
 0x1c8   : > { %v8015_v49 = vpop.f32.mrf.mxu0 }
 0x1c9   : > { %v991_v29 = vadd.f32 %v8015_v49, %v8699_v40 }
 0x1ca   : > { %v982_v53 = vpop.f32.mrf.mxu0 }
 0x1cb   : > { %v983_v26 = vadd.f32 %v982_v53, %v8699_v40  ;;  %v1111_v54 = vmax.f32 %v991_v29, 0.0 }
 0x1cc   : > { %v8016_v3 = vpop.f32.mrf.mxu0 }
 0x1cd   : > { %v1109_v63 = vmax.f32 %v983_v26, 0.0  ;;  %v994_v17 = vadd.f32 %v8016_v3, %v8699_v40 }
 0x1ce   : > { %v985_v57 = vpop.f32.mrf.mxu0 }
 0x1cf   : > { %v1141_v59 = vmax.f32 %v1109_v63, %v1111_v54  ;;  %v986_v12 = vadd.f32 %v985_v57, %v8699_v40  ;;  %v1112_v60 = vmax.f32 %v994_v17, 0.0 }
 0x1d0   : > { %v8019_v61 = vpop.f32.mrf.mxu0 }
 0x1d1   : > { %v1173_v33 = vcombine.high %v1141_v59, %v1141_v59  ;;  %v1180_v47 = vrot.slane %v1141_v59, %v8704_v55  ;;  %v1110_v30 = vmax.f32 %v986_v12, 0.0  ;;  %v8710_v62 = vadd.f32 %v8019_v61, %v8699_v40 }
 0x1d2   : > { %v998_v2 = vpop.f32.mrf.mxu0 }
 0x1d3   : > { %v1187_v5 = vrot.slane %v1173_v33, %v8704_v55  ;;  %v1188_v6 = vcombine.high %v1180_v47, %v1180_v47  ;;  %v1510_v44 = vsel %vm1509_vm11, %v1180_v47, -inf  ;;  %v1142_v10 = vmax.f32 %v1110_v30, %v1112_v60 }
 0x1d4   : > { %v1511_v35 = vrot.slane %v1510_v44, 4  ;;  %v1115_v58 = vmax.f32 %v8710_v62, 0.0  ;;  %v999_v13 = vadd.f32 %v998_v2, %v8699_v40  ;;  %v8020_v56 = vpop.f32.mrf.mxu0 }
 0x1d5   : > { %v1189_v14 = vcombine.high %v1187_v5, %v1187_v5  ;;  %v1517_v32 = vsel %vm1509_vm11, %v1188_v6, -inf  ;;  %v1524_v16 = vsel %vm1509_vm11, %v1187_v5, -inf  ;;  %v1190_v19 = vcombine.high %v1142_v10, %v1142_v10 }
 0x1d6   : > { %v1512_v23 = vmax.f32 %v1510_v44, %v1511_v35  ;;  %v1518_v22 = vrot.slane %v1517_v32, 4  ;;  %v1525_v25 = vrot.slane %v1524_v16, 4  ;;  %v1197_v24 = vrot.slane %v1142_v10, %v8704_v55  ;;  %v1001_v51 = vpop.f32.mrf.mxu0 }
 0x1d7   : > { %v1531_v20 = vsel %vm1509_vm11, %v1189_v14, -inf  ;;  %v1204_v21 = vrot.slane %v1190_v19, %v8704_v55  ;;  %v1113_v27 = vmax.f32 %v999_v13, 0.0  ;;  %v8722_v28 = vadd.f32 %v8020_v56, %v8699_v40 }
 0x1d8   : > { %v1513_v9 = vrot.slane %v1512_v23, 2  ;;  %v1519_v7 = vmax.f32 %v1517_v32, %v1518_v22  ;;  %v1526_v31 = vmax.f32 %v1524_v16, %v1525_v25  ;;  %v1532_v34 = vrot.slane %v1531_v20, 4  ;;  %v8023_v5 = vpop.f32.mrf.mxu0 }
 0x1d9   : > { %v1205_v4 = vcombine.high %v1197_v24, %v1197_v24  ;;  %v1206_v52 = vcombine.high %v1204_v21, %v1204_v21  ;;  %v1538_v36 = vsel %vm1509_vm11, %v1197_v24, -inf  ;;  %v1552_v50 = vsel %vm1509_vm11, %v1204_v21, -inf }
 0x1da   : > { %v1514_v18 = vmax.f32 %v1512_v23, %v1513_v9  ;;  %v1520_v37 = vrot.slane %v1519_v7, 2  ;;  %v1527_v41 = vrot.slane %v1526_v31, 2  ;;  %v1533_v39 = vmax.f32 %v1531_v20, %v1532_v34  ;;  %v1014_v9 = vpop.f32.mrf.mxu0 }
 0x1db   : > { %v1539_v42 = vrot.slane %v1538_v36, 4  ;;  %v1545_v45 = vsel %vm1509_vm11, %v1205_v4, -inf  ;;  %v1553_v43 = vrot.slane %v1552_v50, 4  ;;  %v1559_v11 = vsel %vm1509_vm11, %v1206_v52, -inf }
 0x1dc   : > { %v1515_v38 = vrot.slane %v1514_v18, 1  ;;  %v1521_v48 = vmax.f32 %v1519_v7, %v1520_v37  ;;  %v1528_v49 = vmax.f32 %v1526_v31, %v1527_v41  ;;  %v1534_v29 = vrot.slane %v1533_v39, 2 }
 0x1dd   : > { %v1540_v53 = vmax.f32 %v1538_v36, %v1539_v42  ;;  %v1546_v26 = vrot.slane %v1545_v45, 4  ;;  %v1554_v3 = vmax.f32 %v1552_v50, %v1553_v43  ;;  %v1560_v54 = vrot.slane %v1559_v11, 4  ;;  %v8024_v43 = vpop.f32.mrf.mxu0 }
 0x1de   : > { %v1516_v63 = vmax.f32 %v1514_v18, %v1515_v38  ;;  %v1522_v17 = vrot.slane %v1521_v48, 1  ;;  %v1529_v57 = vrot.slane %v1528_v49, 1  ;;  %v1535_v59 = vmax.f32 %v1533_v39, %v1534_v29 }
 0x1df   : > { %v1541_v12 = vrot.slane %v1540_v53, 2  ;;  %v1547_v60 = vmax.f32 %v1545_v45, %v1546_v26  ;;  %v1555_v61 = vrot.slane %v1554_v3, 2  ;;  %v8728_v33 = vmax.f32 %v1559_v11, %v1560_v54 }
 0x1e0   : > { %v1523_v47 = vmax.f32 %v1521_v48, %v1522_v17  ;;  %v1530_v30 = vmax.f32 %v1528_v49, %v1529_v57  ;;  %v1536_v62 = vrot.slane %v1535_v59, 1  ;;  %v1958_v2 = vpack.c.bf16 %v1516_v63, %v1516_v63 }
 0x1e1   : > { %v1542_v6 = vmax.f32 %v1540_v53, %v1541_v12  ;;  %v1548_v44 = vrot.slane %v1547_v60, 2  ;;  %v8730_v10 = vmax.f32 %v1554_v3, %v1555_v61  ;;  %v1143_v35 = vmax.f32 %v1113_v27, %v1115_v58 }
 0x1e2   : > { %v1537_v13 = vmax.f32 %v1535_v59, %v1536_v62  ;;  %v1959_v56 = vpack.c.bf16 %v1523_v47, %v1523_v47  ;;  %v1960_v14 = vpack.c.bf16 %v1530_v30, %v1530_v30  ;;  %v2078_v32 = vunpack.c.l.b16 %v1958_v2  ;;  %v1017_v2 = vpop.f32.mrf.mxu0 }
 0x1e3   : > { %v1543_v16 = vrot.slane %v1542_v6, 1  ;;  %v8732_v19 = vmax.f32 %v1547_v60, %v1548_v44  ;;  %v1207_v23 = vcombine.high %v1143_v35, %v1143_v35  ;;  %v1214_v22 = vrot.slane %v1143_v35, %v8704_v55 }
 0x1e4   : > { %v1961_v25 = vpack.c.bf16 %v1537_v13, %v1537_v13  ;;  %v2079_v24 = vunpack.c.l.b16 %v1959_v56  ;;  %v8735_v20 = vunpack.c.l.b16 %v1960_v14  ;;  %v1116_v21 = vmax.f32 %v8722_v28, 0.0 }
 0x1e5   : > { %v1544_v7 = vmax.f32 %v1542_v6, %v1543_v16  ;;  %v1550_v58 = vrot.slane %v8732_v19, 1  ;;  %v1221_v27 = vrot.slane %v1207_v23, %v8704_v55  ;;  %v1222_v31 = vcombine.high %v1214_v22, %v1214_v22 }
 0x1e6   : > { %v8740_v34 = vunpack.c.l.b16 %v1961_v25  ;;  %v8743_v4 = vsel %vm2134_vm12, %v2079_v24, %v2078_v32  ;;  %v1566_v52 = vsel %vm1509_vm11, %v1214_v22, -inf  ;;  %v1002_v36 = vadd.f32 %v1001_v51, %v8699_v40 }
 0x1e7   : > { %v1962_v50 = vpack.c.bf16 %v1544_v7, %v1544_v7  ;;  %v1223_v18 = vcombine.high %v1221_v27, %v1221_v27  ;;  %v1567_v37 = vrot.slane %v1566_v52, 4  ;;  %v1573_v28 = vsel %vm1509_vm11, %v1222_v31, -inf }
 0x1e8   : > { %v1574_v41 = vrot.slane %v1573_v28, 4  ;;  %v1580_v39 = vsel %vm1509_vm11, %v1221_v27, -inf  ;;  %v1114_v42 = vmax.f32 %v1002_v36, 0.0  ;;  %v1023_v45 = vadd.f32 %v8023_v5, %v8699_v40  ;;  %v8027_v27 = vpop.f32.mrf.mxu0 }
 0x1e9   : > { %v8750_v11 = vunpack.c.l.b16 %v1962_v50  ;;  %v1568_v38 = vmax.f32 %v1566_v52, %v1567_v37  ;;  %v1581_v48 = vrot.slane %v1580_v39, 4  ;;  %v1587_v49 = vsel %vm1509_vm11, %v1223_v18, -inf }
 0x1ea   : > { %v1575_v29 = vmax.f32 %v1573_v28, %v1574_v41  ;;  %v1588_v51 = vrot.slane %v1587_v49, 4  ;;  %v1144_v53 = vmax.f32 %v1114_v42, %v1116_v21  ;;  %v1119_v26 = vmax.f32 %v1023_v45, 0.0 }
 0x1eb   : > { %v1569_v3 = vrot.slane %v1568_v38, 2  ;;  %v1582_v54 = vmax.f32 %v1580_v39, %v1581_v48  ;;  %v1015_v63 = vadd.f32 %v1014_v9, %v8699_v40  ;;  %v8755_v17 = vadd.f32 %v8024_v43, %v8699_v40 }
 0x1ec   : > { %v1576_v57 = vrot.slane %v1575_v29, 2  ;;  %v1589_v59 = vmax.f32 %v1587_v49, %v1588_v51  ;;  %v1224_v12 = vcombine.high %v1144_v53, %v1144_v53  ;;  %v1231_v60 = vrot.slane %v1144_v53, %v8704_v55  ;;  %v1030_v51 = vpop.f32.mrf.mxu0 }
 0x1ed   : > { %v1570_v61 = vmax.f32 %v1568_v38, %v1569_v3  ;;  %v1583_v47 = vrot.slane %v1582_v54, 2  ;;  %v1117_v30 = vmax.f32 %v1015_v63, 0.0  ;;  %v1120_v62 = vmax.f32 %v8755_v17, 0.0 }
 0x1ee   : > { %v1577_v5 = vmax.f32 %v1575_v29, %v1576_v57  ;;  %v1590_v6 = vrot.slane %v1589_v59, 2  ;;  %v1238_v44 = vrot.slane %v1224_v12, %v8704_v55  ;;  %v1239_v35 = vcombine.high %v1231_v60, %v1231_v60 }
 0x1ef   : > { %v1571_v13 = vrot.slane %v1570_v61, 1  ;;  %v1584_v56 = vmax.f32 %v1582_v54, %v1583_v47  ;;  %v1594_v14 = vsel %vm1509_vm11, %v1231_v60, -inf  ;;  %v1145_v32 = vmax.f32 %v1117_v30, %v1119_v26 }
 0x1f0   : > { %v1578_v16 = vrot.slane %v1577_v5, 1  ;;  %v1591_v23 = vmax.f32 %v1589_v59, %v1590_v6  ;;  %v1240_v22 = vcombine.high %v1238_v44, %v1238_v44  ;;  %v1595_v25 = vrot.slane %v1594_v14, 4 }
 0x1f1   : > { %v1572_v24 = vmax.f32 %v1570_v61, %v1571_v13  ;;  %v1585_v21 = vrot.slane %v1584_v56, 1  ;;  %v1601_v9 = vsel %vm1509_vm11, %v1239_v35, -inf  ;;  %v1608_v7 = vsel %vm1509_vm11, %v1238_v44, -inf  ;;  %v8028_v13 = vpop.f32.mrf.mxu0 }
 0x1f2   : > { %v1579_v31 = vmax.f32 %v1577_v5, %v1578_v16  ;;  %v1592_v52 = vrot.slane %v1591_v23, 1  ;;  %v1596_v36 = vmax.f32 %v1594_v14, %v1595_v25  ;;  %v1602_v50 = vrot.slane %v1601_v9, 4 }
 0x1f3   : > { %v1586_v18 = vmax.f32 %v1584_v56, %v1585_v21  ;;  %v1966_v37 = vpack.c.bf16 %v1572_v24, %v1572_v24  ;;  %v1609_v28 = vrot.slane %v1608_v7, 4  ;;  %v1615_v41 = vsel %vm1509_vm11, %v1240_v22, -inf }
 0x1f4   : > { %v1593_v39 = vmax.f32 %v1591_v23, %v1592_v52  ;;  %v1967_v42 = vpack.c.bf16 %v1579_v31, %v1579_v31  ;;  %v1597_v45 = vrot.slane %v1596_v36, 2  ;;  %v1603_v43 = vmax.f32 %v1601_v9, %v1602_v50 }
 0x1f5   : > { %v1968_v38 = vpack.c.bf16 %v1586_v18, %v1586_v18  ;;  %v2086_v48 = vunpack.c.l.b16 %v1966_v37  ;;  %v1610_v49 = vmax.f32 %v1608_v7, %v1609_v28  ;;  %v1616_v29 = vrot.slane %v1615_v41, 4  ;;  %v1033_v37 = vpop.f32.mrf.mxu0 }
 0x1f6   : > { %v1969_v53 = vpack.c.bf16 %v1593_v39, %v1593_v39  ;;  %v2087_v26 = vunpack.c.l.b16 %v1967_v42  ;;  %v1598_v3 = vmax.f32 %v1596_v36, %v1597_v45  ;;  %v1604_v54 = vrot.slane %v1603_v43, 2 }
 0x1f7   : > { %v8764_v63 = vunpack.c.l.b16 %v1968_v38  ;;  %v1611_v57 = vrot.slane %v1610_v49, 2  ;;  %v8766_v59 = vmax.f32 %v1615_v41, %v1616_v29  ;;  %v1241_v12 = vcombine.high %v1145_v32, %v1145_v32 }
 0x1f8   : > { %v8768_v60 = vunpack.c.l.b16 %v1969_v53  ;;  %v8771_v61 = vsel %vm2134_vm12, %v2087_v26, %v2086_v48  ;;  %v2238_v47 = vrot.slane %v2087_v26, 7  ;;  %v1599_v30 = vrot.slane %v1598_v3, 1 }
 0x1f9   : > { %v8774_v6 = vmax.f32 %v1603_v43, %v1604_v54  ;;  %v8776_v44 = vmax.f32 %v1610_v49, %v1611_v57  ;;  %v1248_v35 = vrot.slane %v1145_v32, %v8704_v55  ;;  %v1255_v16 = vrot.slane %v1241_v12, %v8704_v55 }
 0x1fa   : > { %v8780_v56 = vsel %vm2134_vm12, %v2238_v47, %v2086_v48  ;;  %v1600_v14 = vmax.f32 %v1598_v3, %v1599_v30  ;;  %v1018_v23 = vadd.f32 %v1017_v2, %v8699_v40  ;;  %v1039_v21 = vadd.f32 %v8027_v27, %v8699_v40 }
 0x1fb   : > { %v1256_v25 = vcombine.high %v1248_v35, %v1248_v35  ;;  %v1622_v24 = vsel %vm1509_vm11, %v1248_v35, -inf  ;;  %v1257_v7 = vcombine.high %v1255_v16, %v1255_v16  ;;  %v1636_v32 = vsel %vm1509_vm11, %v1255_v16, -inf }
 0x1fc   : > { %v1970_v9 = vpack.c.bf16 %v1600_v14, %v1600_v14  ;;  %v1623_v31 = vrot.slane %v1622_v24, 4  ;;  %v1637_v36 = vrot.slane %v1636_v32, 4  ;;  %v1118_v50 = vmax.f32 %v1018_v23, 0.0 }
 0x1fd   : > { %v1629_v52 = vsel %vm1509_vm11, %v1256_v25, -inf  ;;  %v1123_v18 = vmax.f32 %v1039_v21, 0.0  ;;  %v1643_v39 = vsel %vm1509_vm11, %v1257_v7, -inf  ;;  %v1031_v43 = vadd.f32 %v1030_v51, %v8699_v40 }
 0x1fe   : > { %v8789_v28 = vunpack.c.l.b16 %v1970_v9  ;;  %v1624_v2 = vmax.f32 %v1622_v24, %v1623_v31  ;;  %v1630_v41 = vrot.slane %v1629_v52, 4  ;;  %v1638_v42 = vmax.f32 %v1636_v32, %v1637_v36 }
 0x1ff   : > { %v1644_v45 = vrot.slane %v1643_v39, 4  ;;  %v1146_v27 = vmax.f32 %v1118_v50, %v1120_v62  ;;  %v8796_v49 = vadd.f32 %v8028_v13, %v8699_v40  ;;  %v8799_v29 = vadd.f32 %v1033_v37, %v8699_v40 }
 0x200   : > { %v1625_v38 = vrot.slane %v1624_v2, 2  ;;  %v1631_v48 = vmax.f32 %v1629_v52, %v1630_v41  ;;  %v1639_v53 = vrot.slane %v1638_v42, 2  ;;  %v1121_v47 = vmax.f32 %v1031_v43, 0.0 }
 0x201   : > { %v1645_v26 = vmax.f32 %v1643_v39, %v1644_v45  ;;  %v1258_v3 = vcombine.high %v1146_v27, %v1146_v27  ;;  %v1265_v54 = vrot.slane %v1146_v27, %v8704_v55  ;;  %v1124_v17 = vmax.f32 %v8796_v49, 0.0 }
 0x202   : > { %v1626_v57 = vmax.f32 %v1624_v2, %v1625_v38  ;;  %v1632_v12 = vrot.slane %v1631_v48, 2  ;;  %v1640_v62 = vmax.f32 %v1638_v42, %v1639_v53  ;;  %v1147_v23 = vmax.f32 %v1121_v47, %v1123_v18 }
 0x203   : > { %v1646_v51 = vrot.slane %v1645_v26, 2  ;;  %v1272_v30 = vrot.slane %v1258_v3, %v8704_v55  ;;  %v1273_v35 = vcombine.high %v1265_v54, %v1265_v54  ;;  %v1650_v16 = vsel %vm1509_vm11, %v1265_v54, -inf  ;;  %v8031_v54 = vpop.f32.mrf.mxu0 }
 0x204   : > { %v1627_v13 = vrot.slane %v1626_v57, 1  ;;  %v1633_v14 = vmax.f32 %v1631_v48, %v1632_v12  ;;  %v1641_v25 = vrot.slane %v1640_v62, 1  ;;  %v1651_v9 = vrot.slane %v1650_v16, 4 }
 0x205   : > { %v1647_v24 = vmax.f32 %v1645_v26, %v1646_v51  ;;  %v1274_v21 = vcombine.high %v1272_v30, %v1272_v30  ;;  %v1657_v32 = vsel %vm1509_vm11, %v1273_v35, -inf  ;;  %v1664_v52 = vsel %vm1509_vm11, %v1272_v30, -inf }
 0x206   : > { %v1628_v7 = vmax.f32 %v1626_v57, %v1627_v13  ;;  %v1634_v31 = vrot.slane %v1633_v14, 1  ;;  %v1642_v36 = vmax.f32 %v1640_v62, %v1641_v25  ;;  %v1652_v37 = vmax.f32 %v1650_v16, %v1651_v9 }
 0x207   : > { %v1648_v50 = vrot.slane %v1647_v24, 1  ;;  %v1658_v2 = vrot.slane %v1657_v32, 4  ;;  %v1665_v42 = vrot.slane %v1664_v52, 4  ;;  %v1671_v45 = vsel %vm1509_vm11, %v1274_v21, -inf }
 0x208   : > { %v1635_v41 = vmax.f32 %v1633_v14, %v1634_v31  ;;  %v1974_v39 = vpack.c.bf16 %v1628_v7, %v1628_v7  ;;  %v1976_v27 = vpack.c.bf16 %v1642_v36, %v1642_v36  ;;  %v1653_v43 = vrot.slane %v1652_v37, 2 }
 0x209   : > { %v1649_v18 = vmax.f32 %v1647_v24, %v1648_v50  ;;  %v1659_v38 = vmax.f32 %v1657_v32, %v1658_v2  ;;  %v1666_v26 = vmax.f32 %v1664_v52, %v1665_v42  ;;  %v1672_v3 = vrot.slane %v1671_v45, 4  ;;  %v1046_v32 = vpop.f32.mrf.mxu0 }
 0x20a   : > { %v1975_v48 = vpack.c.bf16 %v1635_v41, %v1635_v41  ;;  %v2094_v53 = vunpack.c.l.b16 %v1974_v39  ;;  %v8808_v12 = vunpack.c.l.b16 %v1976_v27  ;;  %v1654_v47 = vmax.f32 %v1652_v37, %v1653_v43 }
 0x20b   : > { %v1977_v57 = vpack.c.bf16 %v1649_v18, %v1649_v18  ;;  %v1660_v62 = vrot.slane %v1659_v38, 2  ;;  %v1667_v30 = vrot.slane %v1666_v26, 2  ;;  %v8810_v35 = vmax.f32 %v1671_v45, %v1672_v3 }
 0x20c   : > { %v2095_v51 = vunpack.c.l.b16 %v1975_v48  ;;  %v1275_v13 = vcombine.high %v1147_v23, %v1147_v23  ;;  %v1655_v25 = vrot.slane %v1654_v47, 1  ;;  %v1282_v31 = vrot.slane %v1147_v23, %v8704_v55 }
 0x20d   : > { %v8812_v14 = vunpack.c.l.b16 %v1977_v57  ;;  %v8815_v24 = vmax.f32 %v1659_v38, %v1660_v62  ;;  %v8820_v7 = vmax.f32 %v1666_v26, %v1667_v30  ;;  %v1122_v37 = vmax.f32 %v8799_v29, 0.0 }
 0x20e   : > { %v8818_v21 = vsel %vm2134_vm12, %v2095_v51, %v2094_v53  ;;  %v2252_v9 = vrot.slane %v2095_v51, 7  ;;  %v1656_v52 = vmax.f32 %v1654_v47, %v1655_v25  ;;  %v1289_v50 = vrot.slane %v1275_v13, %v8704_v55 }
 0x20f   : > { %v1290_v41 = vcombine.high %v1282_v31, %v1282_v31  ;;  %v1678_v39 = vsel %vm1509_vm11, %v1282_v31, -inf  ;;  %v8831_v42 = vadd.f32 %v8031_v54, %v8699_v40  ;;  %v1148_v29 = vmax.f32 %v1122_v37, %v1124_v17 }
 0x210   : > { %v8827_v2 = vsel %vm2134_vm12, %v2252_v9, %v2094_v53  ;;  %v1978_v45 = vpack.c.bf16 %v1656_v52, %v1656_v52  ;;  %v1291_v18 = vcombine.high %v1289_v50, %v1289_v50  ;;  %v1679_v23 = vrot.slane %v1678_v39, 4  ;;  %v8032_v53 = vpop.f32.mrf.mxu0 }
 0x211   : > { %v1692_v27 = vsel %vm1509_vm11, %v1289_v50, -inf  ;;  %v1685_v43 = vsel %vm1509_vm11, %v1290_v41, -inf  ;;  %v1127_v48 = vmax.f32 %v8831_v42, 0.0  ;;  %v1292_v51 = vcombine.high %v1148_v29, %v1148_v29 }
 0x212   : > { %v1693_v38 = vrot.slane %v1692_v27, 4  ;;  %v8838_v26 = vunpack.c.l.b16 %v1978_v45  ;;  %v1680_v3 = vmax.f32 %v1678_v39, %v1679_v23  ;;  %v1686_v57 = vrot.slane %v1685_v43, 4 }
 0x213   : > { %v1699_v54 = vsel %vm1509_vm11, %v1291_v18, -inf  ;;  %v1299_v30 = vrot.slane %v1148_v29, %v8704_v55  ;;  %v1047_v9 = vadd.f32 %v1046_v32, %v8699_v40  ;;  %v8844_v49 = vadd.f32 %v8032_v53, %v8699_v40 }
 0x214   : > { %v1694_v47 = vmax.f32 %v1692_v27, %v1693_v38  ;;  %v1700_v62 = vrot.slane %v1699_v54, 4  ;;  %v1681_v13 = vrot.slane %v1680_v3, 2  ;;  %v1687_v25 = vmax.f32 %v1685_v43, %v1686_v57 }
 0x215   : > { %v1306_v52 = vrot.slane %v1292_v51, %v8704_v55  ;;  %v1307_v50 = vcombine.high %v1299_v30, %v1299_v30  ;;  %v1706_v39 = vsel %vm1509_vm11, %v1299_v30, -inf  ;;  %v1125_v42 = vmax.f32 %v1047_v9, 0.0 }
 0x216   : > { %v1695_v17 = vrot.slane %v1694_v47, 2  ;;  %v1701_v31 = vmax.f32 %v1699_v54, %v1700_v62  ;;  %v1682_v37 = vmax.f32 %v1680_v3, %v1681_v13  ;;  %v1688_v41 = vrot.slane %v1687_v25, 2 }
 0x217   : > { %v1308_v23 = vcombine.high %v1306_v52, %v1306_v52  ;;  %v1707_v27 = vrot.slane %v1706_v39, 4  ;;  %v1713_v32 = vsel %vm1509_vm11, %v1307_v50, -inf  ;;  %v1720_v29 = vsel %vm1509_vm11, %v1306_v52, -inf }
 0x218   : > { %v1696_v45 = vmax.f32 %v1694_v47, %v1695_v17  ;;  %v1702_v18 = vrot.slane %v1701_v31, 2  ;;  %v1683_v43 = vrot.slane %v1682_v37, 1  ;;  %v1689_v38 = vmax.f32 %v1687_v25, %v1688_v41 }
 0x219   : > { %v1708_v54 = vmax.f32 %v1706_v39, %v1707_v27  ;;  %v1714_v62 = vrot.slane %v1713_v32, 4  ;;  %v1721_v13 = vrot.slane %v1720_v29, 4  ;;  %v1727_v30 = vsel %vm1509_vm11, %v1308_v23, -inf }
 0x21a   : > { %v1697_v53 = vrot.slane %v1696_v45, 1  ;;  %v1703_v57 = vmax.f32 %v1701_v31, %v1702_v18  ;;  %v1684_v51 = vmax.f32 %v1682_v37, %v1683_v43  ;;  %v1690_v3 = vrot.slane %v1689_v38, 1 }
 0x21b   : > { %v1709_v17 = vrot.slane %v1708_v54, 2  ;;  %v1715_v0 = vmax.f32 %v1713_v32, %v1714_v62  ;;  %v1722_v25 = vmax.f32 %v1720_v29, %v1721_v13  ;;  %v1728_v41 = vrot.slane %v1727_v30, 4 }
 0x21c   : > { %v1698_v9 = vmax.f32 %v1696_v45, %v1697_v53  ;;  %v1704_v47 = vrot.slane %v1703_v57, 1  ;;  %v1691_v16 = vmax.f32 %v1689_v38, %v1690_v3  ;;  %v1982_v36 = vpack.c.bf16 %v1684_v51, %v1684_v51 }
 0x21d   : > { %v1710_v52 = vmax.f32 %v1708_v54, %v1709_v17  ;;  %v1716_v22 = vrot.slane %v1715_v0, 2  ;;  %v1723_v18 = vrot.slane %v1722_v25, 2  ;;  %v8851_v37 = vmax.f32 %v1727_v30, %v1728_v41 }
 0x21e   : > { %v1705_v50 = vmax.f32 %v1703_v57, %v1704_v47  ;;  %v1984_v5 = vpack.c.bf16 %v1698_v9, %v1698_v9  ;;  %v1983_v31 = vpack.c.bf16 %v1691_v16, %v1691_v16  ;;  %v2102_v39 = vunpack.c.l.b16 %v1982_v36  ;;  %v1049_v57 = vpop.f32.mrf.mxu0 }
 0x21f   : > { %v1711_v45 = vrot.slane %v1710_v52, 1  ;;  %v8855_v23 = vmax.f32 %v1715_v0, %v1716_v22  ;;  %v8857_v38 = vmax.f32 %v1722_v25, %v1723_v18  ;;  %v1149_v29 = vmax.f32 %v1125_v42, %v1127_v48 }
 0x220   : > { %v1985_v27 = vpack.c.bf16 %v1705_v50, %v1705_v50  ;;  %v8853_v43 = vunpack.c.l.b16 %v1984_v5  ;;  %v2103_v32 = vunpack.c.l.b16 %v1983_v31  ;;  %v1128_v53 = vmax.f32 %v8844_v49, 0.0 }
 0x221   : > { %v1712_v36 = vmax.f32 %v1710_v52, %v1711_v45  ;;  %v1309_v0 = vcombine.high %v1149_v29, %v1149_v29  ;;  %v1316_v22 = vrot.slane %v1149_v29, %v8704_v55  ;;  %v1050_v48 = vadd.f32 %v1049_v57, %v8699_v40 }
 0x222   : > { %v8860_v54 = vunpack.c.l.b16 %v1985_v27  ;;  %v8865_v5 = vsel %vm2134_vm12, %v2103_v32, %v2102_v39  ;;  %v2266_v51 = vrot.slane %v2103_v32, 7  ;;  %v1551_v49 = vmax.f32 %v8732_v19, %v1550_v58 }
 0x223   : > { %v1986_v3 = vpack.c.bf16 %v1712_v36, %v1712_v36  ;;  %v1557_v42 = vrot.slane %v8730_v10, 1  ;;  %v1323_v30 = vrot.slane %v1309_v0, %v8704_v55  ;;  %v1324_v9 = vcombine.high %v1316_v22, %v1316_v22 }
 0x224   : > { %v8874_v13 = vsel %vm2134_vm12, %v2266_v51, %v2102_v39  ;;  %v1734_v47 = vsel %vm1509_vm11, %v1316_v22, -inf  ;;  %v1126_v41 = vmax.f32 %v1050_v48, 0.0  ;;  %v1562_v31 = vrot.slane %v8728_v33, 2 }
 0x225   : > { %v8878_v17 = vunpack.c.l.b16 %v1986_v3  ;;  %v1735_v25 = vrot.slane %v1734_v47, 4  ;;  %v8881_v50 = vmax.f32 %v8730_v10, %v1557_v42  ;;  %v1325_v52 = vcombine.high %v1323_v30, %v1323_v30 }
 0x226   : > { %v1741_v19 = vsel %vm1509_vm11, %v1324_v9, -inf  ;;  %v1748_v58 = vsel %vm1509_vm11, %v1323_v30, -inf  ;;  %v1150_v45 = vmax.f32 %v1126_v41, %v1128_v53  ;;  %v1563_v29 = vmax.f32 %v8728_v33, %v1562_v31  ;;  %v8893_v41 = vpop.f32.mrf.mxu0 }
 0x227   : > { %v1736_v39 = vmax.f32 %v1734_v47, %v1735_v25  ;;  %v1742_v18 = vrot.slane %v1741_v19, 4  ;;  %v1749_v27 = vrot.slane %v1748_v58, 4  ;;  %v1755_v32 = vsel %vm1509_vm11, %v1325_v52, -inf }
 0x228   : > { %v1963_v57 = vpack.c.bf16 %v1551_v49, %v1551_v49  ;;  %v1756_v22 = vrot.slane %v1755_v32, 4  ;;  %v1326_v3 = vcombine.high %v1150_v45, %v1150_v45  ;;  %v1333_v48 = vrot.slane %v1150_v45, %v8704_v55  ;;  %v1062_v62 = vpop.f32.mrf.mxu0 }
 0x229   : > { %v1737_v36 = vrot.slane %v1736_v39, 2  ;;  %v1743_v51 = vmax.f32 %v1741_v19, %v1742_v18  ;;  %v1750_v0 = vmax.f32 %v1748_v58, %v1749_v27  ;;  %v1564_v42 = vrot.slane %v1563_v29, 1 }
 0x22a   : > { %v8891_v30 = vunpack.c.l.b16 %v1963_v57  ;;  %v1757_v25 = vmax.f32 %v1755_v32, %v1756_v22  ;;  %v1340_v33 = vrot.slane %v1326_v3, %v8704_v55  ;;  %v1341_v49 = vcombine.high %v1333_v48, %v1333_v48 }
 0x22b   : > { %v1738_v9 = vmax.f32 %v1736_v39, %v1737_v36  ;;  %v1744_v53 = vrot.slane %v1743_v51, 2  ;;  %v1751_v47 = vrot.slane %v1750_v0, 2  ;;  %v1762_v52 = vsel %vm1509_vm11, %v1333_v48, -inf }
 0x22c   : > { %v1565_v19 = vmax.f32 %v1563_v29, %v1564_v42  ;;  %v1758_v27 = vrot.slane %v1757_v25, 2  ;;  %v1342_v45 = vcombine.high %v1340_v33, %v1340_v33  ;;  %v1763_v57 = vrot.slane %v1762_v52, 4 }
 0x22d   : > { %v1739_v58 = vrot.slane %v1738_v9, 1  ;;  %v1745_v31 = vmax.f32 %v1743_v51, %v1744_v53  ;;  %v1752_v18 = vmax.f32 %v1750_v0, %v1751_v47  ;;  %v1769_v39 = vsel %vm1509_vm11, %v1341_v49, -inf }
 0x22e   : > { %v1776_v36 = vsel %vm1509_vm11, %v1340_v33, -inf  ;;  %v1759_v3 = vmax.f32 %v1757_v25, %v1758_v27  ;;  %v1764_v48 = vmax.f32 %v1762_v52, %v1763_v57  ;;  %v1770_v29 = vrot.slane %v1769_v39, 4  ;;  %v8036_v52 = vpop.f32.mrf.mxu0 }
 0x22f   : > { %v1740_v32 = vmax.f32 %v1738_v9, %v1739_v58  ;;  %v1746_v22 = vrot.slane %v1745_v31, 1  ;;  %v1753_v16 = vrot.slane %v1752_v18, 1  ;;  %v1777_v42 = vrot.slane %v1776_v36, 4 }
 0x230   : > { %v1783_v51 = vsel %vm1509_vm11, %v1342_v45, -inf  ;;  %v1760_v47 = vrot.slane %v1759_v3, 1  ;;  %v1765_v49 = vrot.slane %v1764_v48, 2  ;;  %v1771_v33 = vmax.f32 %v1769_v39, %v1770_v29 }
 0x231   : > { %v1747_v0 = vmax.f32 %v1745_v31, %v1746_v22  ;;  %v1754_v53 = vmax.f32 %v1752_v18, %v1753_v16  ;;  %v1990_v10 = vpack.c.bf16 %v1740_v32, %v1740_v32  ;;  %v1778_v1 = vmax.f32 %v1776_v36, %v1777_v42 }
 0x232   : > { %v1784_v9 = vrot.slane %v1783_v51, 4  ;;  %v1761_v58 = vmax.f32 %v1759_v3, %v1760_v47  ;;  %v1766_v57 = vmax.f32 %v1764_v48, %v1765_v49  ;;  %v1772_v8 = vrot.slane %v1771_v33, 2 }
 0x233   : > { %v1991_v25 = vpack.c.bf16 %v1747_v0, %v1747_v0  ;;  %v1992_v27 = vpack.c.bf16 %v1754_v53, %v1754_v53  ;;  %v2110_v46 = vunpack.c.l.b16 %v1990_v10  ;;  %v1779_v15 = vrot.slane %v1778_v1, 2  ;;  %v1065_v0 = vpop.f32.mrf.mxu0 }
 0x234   : > { %v8900_v45 = vmax.f32 %v1783_v51, %v1784_v9  ;;  %v1993_v31 = vpack.c.bf16 %v1761_v58, %v1761_v58  ;;  %v1965_v32 = vpack.c.bf16 %v1565_v19, %v1565_v19  ;;  %v1767_v22 = vrot.slane %v1766_v57, 1 }
 0x235   : > { %v2111_v16 = vunpack.c.l.b16 %v1991_v25  ;;  %v8902_v18 = vunpack.c.l.b16 %v1992_v27  ;;  %v8904_v39 = vmax.f32 %v1771_v33, %v1772_v8  ;;  %v8906_v36 = vmax.f32 %v1778_v1, %v1779_v15 }
 0x236   : > { %v11233_v3 = vpack.c.bf16 %v8881_v50, %v8881_v50  ;;  %v8911_v29 = vunpack.c.l.b16 %v1993_v31  ;;  %v1768_v53 = vmax.f32 %v1766_v57, %v1767_v22  ;;  %v2085_v8 = vunpack.c.l.b16 %v1965_v32 }
 0x237   : > { %11232 = vst [vmem:[#allocation6_spill] sm:$0xff] %v8902_v18  ;;  %v8914_v48 = vsel %vm2134_vm12, %v2111_v16, %v2110_v46  ;;  %v2280_v42 = vrot.slane %v2111_v16, 7  ;;  %v2137_v1 = vsel %vm2136_vm13, %v8735_v20, %v8743_v4  ;;  %v1071_v47 = vadd.f32 %v8893_v41, %v8699_v40 }
 0x238   : > { %v2084_v10 = vunpack.c.l.b16 %v11233_v3  ;;  %11234 = vst [vmem:[#allocation7_spill] sm:$0xff] %v8911_v29  ;;  %v2139_v50 = vsel %vm2138_vm14, %v8740_v34, %v2137_v1  ;;  %v1063_v49 = vadd.f32 %v1062_v62, %v8699_v40  ;;  %v1994_v33 = vpack.c.bf16 %v1768_v53, %v1768_v53 }
 0x239   : > { %v8922_v15 = vsel %vm2134_vm12, %v2280_v42, %v2110_v46  ;;  %v2141_v9 = vsel %vm2140_vm15, %v8750_v11, %v2139_v50  ;;  %v1074_v58 = vadd.f32 %v8036_v52, %v8699_v40  ;;  %v1066_v25 = vadd.f32 %v1065_v0, %v8699_v40 }
 0x23a   : > { %11235 = vst [vmem:[#allocation8_spill] sm:$0xff] %v8922_v15  ;;  %v2143_v46 = vsel %vm2142_vm0, %v8891_v30, %v2141_v9  ;;  %v1131_v20 = vmax.f32 %v1071_v47, 0.0  ;;  %v1129_v4 = vmax.f32 %v1063_v49, 0.0  ;;  %v11236_v34 = vrot.slane %v8774_v6, 1 }
 0x23b   : > { %v8938_v41 = vunpack.c.l.b16 %v1994_v33  ;;  %v2145_v62 = vsel %vm2144_vm2, %v2084_v10, %v2143_v46  ;;  %v1132_v57 = vmax.f32 %v1074_v58, 0.0  ;;  %v1130_v31 = vmax.f32 %v1066_v25, 0.0 }
 0x23c   : > { %v1607_v27 = vmax.f32 %v8774_v6, %v11236_v34  ;;  %v2147_v11 = vsel %vm2146_vm3, %v2085_v8, %v2145_v62  ;;  %v1151_v52 = vmax.f32 %v1129_v4, %v1131_v20  ;;  %v1613_v16 = vrot.slane %v8776_v44, 1 }
 0x23d   : > { %11237 = vst [vmem:[#allocation9_spill] sm:$0xff] %v8938_v41  ;;  %v1618_v32 = vrot.slane %v8766_v59, 2  ;;  %v8944_v30 = vpack.c.b16 %v2147_v11, %v2147_v11  ;;  %v1152_v22 = vmax.f32 %v1130_v31, %v1132_v57  ;;  %v2149_v6 = vsel %vm2136_vm13, %v8764_v63, %v8771_v61 }
 0x23e   : > { %v1971_v3 = vpack.c.bf16 %v1607_v27, %v1607_v27  ;;  %v1343_v42 = vcombine.high %v1151_v52, %v1151_v52  ;;  %v1350_v10 = vrot.slane %v1151_v52, %v8704_v55  ;;  %v8951_v0 = vmax.f32 %v8776_v44, %v1613_v16 }
 0x23f   : > { %11238 = vst [vmem:[#allocation10_spill] sm:$0xff] %v8944_v30  ;;  %v1619_v53 = vmax.f32 %v8766_v59, %v1618_v32  ;;  %2221 = vrot.lane.b32.xlu0 %v8944_v30, %s8238_s21  ;;  %v1360_v8 = vcombine.high %v1152_v22, %v1152_v22  ;;  %v1367_v1 = vrot.slane %v1152_v22, %v8704_v55 }
 0x240   : > { %v8957_v50 = vunpack.c.l.b16 %v1971_v3  ;;  %v8961_v61 = vsel %vm2138_vm14, %v8768_v60, %v2149_v6  ;;  %v1357_v47 = vrot.slane %v1343_v42, %v8704_v55  ;;  %v1358_v49 = vcombine.high %v1350_v10, %v1350_v10 }
 0x241   : > { %v1790_v44 = vsel %vm1509_vm11, %v1350_v10, -inf  ;;  %v1620_v33 = vrot.slane %v1619_v53, 1  ;;  %v1374_v9 = vrot.slane %v1360_v8, %v8704_v55  ;;  %v1375_v58 = vcombine.high %v1367_v1, %v1367_v1 }
 0x242   : > { %v1791_v59 = vrot.slane %v1790_v44, 4  ;;  %v1818_v25 = vsel %vm1509_vm11, %v1367_v1, -inf  ;;  %v1359_v46 = vcombine.high %v1357_v47, %v1357_v47  ;;  %v1797_v20 = vsel %vm1509_vm11, %v1358_v49, -inf }
 0x243   : > { %v1804_v4 = vsel %vm1509_vm11, %v1357_v47, -inf  ;;  %v1819_v34 = vrot.slane %v1818_v25, 4  ;;  %v1798_v62 = vrot.slane %v1797_v20, 4  ;;  %v1376_v31 = vcombine.high %v1374_v9, %v1374_v9 }
 0x244   : > { %v1792_v27 = vmax.f32 %v1790_v44, %v1791_v59  ;;  %v1805_v57 = vrot.slane %v1804_v4, 4  ;;  %v1811_v11 = vsel %vm1509_vm11, %v1359_v46, -inf  ;;  %v1825_v16 = vsel %vm1509_vm11, %v1375_v58, -inf  ;;  %v8039_v58 = vpop.f32.mrf.mxu0 }
 0x245   : > { %v1820_v52 = vmax.f32 %v1818_v25, %v1819_v34  ;;  %v1832_v32 = vsel %vm1509_vm11, %v1374_v9, -inf  ;;  %v1799_v3 = vmax.f32 %v1797_v20, %v1798_v62  ;;  %v1812_v42 = vrot.slane %v1811_v11, 4 }
 0x246   : > { %v1793_v22 = vrot.slane %v1792_v27, 2  ;;  %v1806_v6 = vmax.f32 %v1804_v4, %v1805_v57  ;;  %v1826_v8 = vrot.slane %v1825_v16, 4  ;;  %v1833_v1 = vrot.slane %v1832_v32, 4 }
 0x247   : > { %v1821_v10 = vrot.slane %v1820_v52, 2  ;;  %v1839_v47 = vsel %vm1509_vm11, %v1376_v31, -inf  ;;  %v1800_v44 = vrot.slane %v1799_v3, 2  ;;  %v1813_v51 = vmax.f32 %v1811_v11, %v1812_v42 }
 0x248   : > { %v1794_v49 = vmax.f32 %v1792_v27, %v1793_v22  ;;  %v1807_v59 = vrot.slane %v1806_v6, 2  ;;  %v1827_v46 = vmax.f32 %v1825_v16, %v1826_v8  ;;  %v1834_v25 = vmax.f32 %v1832_v32, %v1833_v1  ;;  %v1078_v32 = vpop.f32.mrf.mxu0 }
 0x249   : > { %v1822_v19 = vmax.f32 %v1820_v52, %v1821_v10  ;;  %v1840_v34 = vrot.slane %v1839_v47, 4  ;;  %v1801_v9 = vmax.f32 %v1799_v3, %v1800_v44  ;;  %v1814_v20 = vrot.slane %v1813_v51, 2 }
 0x24a   : > { %v1795_v30 = vrot.slane %v1794_v49, 1  ;;  %v1808_v41 = vmax.f32 %v1806_v6, %v1807_v59  ;;  %v1828_v62 = vrot.slane %v1827_v46, 2  ;;  %v1835_v57 = vrot.slane %v1834_v25, 2 }
 0x24b   : > { %v1823_v4 = vrot.slane %v1822_v19, 1  ;;  %v8973_v29 = vmax.f32 %v1839_v47, %v1840_v34  ;;  %v1802_v31 = vrot.slane %v1801_v9, 1  ;;  %v1815_v22 = vmax.f32 %v1813_v51, %v1814_v20 }
 0x24c   : > { %v1796_v15 = vmax.f32 %v1794_v49, %v1795_v30  ;;  %v1809_v27 = vrot.slane %v1808_v41, 1  ;;  %v1829_v11 = vmax.f32 %v1827_v46, %v1828_v62  ;;  %v8975_v52 = vmax.f32 %v1834_v25, %v1835_v57  ;;  %v8040_v25 = vpop.f32.mrf.mxu0 }
 0x24d   : > { %v1824_v18 = vmax.f32 %v1822_v19, %v1823_v4  ;;  %v1621_v16 = vmax.f32 %v1619_v53, %v1620_v33  ;;  %v1803_v42 = vmax.f32 %v1801_v9, %v1802_v31  ;;  %v1816_v3 = vrot.slane %v1815_v22, 1 }
 0x24e   : > { %v1810_v10 = vmax.f32 %v1808_v41, %v1809_v27  ;;  %v1998_v6 = vpack.c.bf16 %v1796_v15, %v1796_v15  ;;  %v1830_v8 = vrot.slane %v1829_v11, 1  ;;  %v1972_v47 = vpack.c.bf16 %v8951_v0, %v8951_v0 }
 0x24f   : > { %v2002_v1 = vpack.c.bf16 %v1824_v18, %v1824_v18  ;;  %v1973_v44 = vpack.c.bf16 %v1621_v16, %v1621_v16  ;;  %v1817_v30 = vmax.f32 %v1815_v22, %v1816_v3  ;;  %v1999_v49 = vpack.c.bf16 %v1803_v42, %v1803_v42  ;;  %v1081_v42 = vpop.f32.mrf.mxu0 }
 0x250   : > { %v2000_v59 = vpack.c.bf16 %v1810_v10, %v1810_v10  ;;  %v2118_v51 = vunpack.c.l.b16 %v1998_v6  ;;  %v8979_v19 = vmax.f32 %v1829_v11, %v1830_v8  ;;  %v2092_v53 = vunpack.c.l.b16 %v1972_v47 }
 0x251   : > { %v8981_v46 = vunpack.c.l.b16 %v2002_v1  ;;  %v2093_v33 = vunpack.c.l.b16 %v1973_v44  ;;  %v2001_v41 = vpack.c.bf16 %v1817_v30, %v1817_v30  ;;  %v2119_v34 = vunpack.c.l.b16 %v1999_v49 }
 0x252   : > { %v8983_v15 = vunpack.c.l.b16 %v2000_v59  ;;  %v2151_v18 = vsel %vm2140_vm15, %v8789_v28, %v8961_v61  ;;  %v1087_v20 = vadd.f32 %v8039_v58, %v8699_v40  ;;  %v11239_v4 = vrot.slane %v8764_v63, 6 }
 0x253   : > { %v2152_v9 = vsel %vm2142_vm0, %v8957_v50, %v2151_v18  ;;  %v8996_v57 = vunpack.c.l.b16 %v2001_v41  ;;  %v8999_v31 = vsel %vm2134_vm12, %v2119_v34, %v2118_v51  ;;  %v2294_v27 = vrot.slane %v2119_v34, 7 }
 0x254   : > { %v2241_v62 = vsel %vm2136_vm13, %v11239_v4, %v8780_v56  ;;  %v2153_v22 = vsel %vm2144_vm2, %v2092_v53, %v2152_v9  ;;  %v1135_v11 = vmax.f32 %v1087_v20, 0.0  ;;  %v2242_v16 = vrot.slane %v8768_v60, 5  ;;  %v8043_v20 = vpop.f32.mrf.mxu0 }
 0x255   : > { %v2244_v58 = vrot.slane %v8789_v28, 4  ;;  %v9006_v63 = vsel %vm2134_vm12, %v2294_v27, %v2118_v51  ;;  %v2154_v56 = vsel %vm2146_vm3, %v2093_v33, %v2153_v22  ;;  %v2246_v10 = vrot.slane %v8957_v50, 3 }
 0x256   : > { %v2248_v3 = vrot.slane %v2092_v53, 2  ;;  %v9010_v6 = vpack.c.b16 %v2154_v56, %v2154_v56  ;;  %v2243_v8 = vsel %vm2138_vm14, %v2242_v16, %v2241_v62  ;;  %v2250_v1 = vrot.slane %v2093_v33, 1 }
 0x257   : > { %v1079_v47 = vadd.f32 %v1078_v32, %v8699_v40  ;;  %v2245_v60 = vsel %vm2140_vm15, %v2244_v58, %v2243_v8  ;;  %v1090_v28 = vadd.f32 %v8040_v25, %v8699_v40  ;;  %v1082_v44 = vadd.f32 %v1081_v42, %v8699_v40 }
 0x258   : > { %11240 = vst [vmem:[#allocation11_spill] sm:$0xff] %v9010_v6  ;;  %v11241_v30 = vrot.slane %v8815_v24, 1  ;;  %2223 = vrot.lane.b32.xlu1 %v9010_v6, %s8238_s21  ;;  %v2247_v50 = vsel %vm2142_vm0, %v2246_v10, %v2245_v60  ;;  %v1669_v51 = vrot.slane %v8820_v7, 1  ;;  %v1674_v32 = vrot.slane %v8810_v35, 2 }
 0x259   : > { %v1133_v59 = vmax.f32 %v1079_v47, 0.0  ;;  %v2249_v53 = vsel %vm2144_vm2, %v2248_v3, %v2247_v50  ;;  %v1136_v33 = vmax.f32 %v1090_v28, 0.0  ;;  %v1134_v25 = vmax.f32 %v1082_v44, 0.0 }
 0x25a   : > { %v1663_v49 = vmax.f32 %v8815_v24, %v11241_v30  ;;  %v2251_v34 = vsel %vm2146_vm3, %v2250_v1, %v2249_v53  ;;  %v9028_v24 = vmax.f32 %v8820_v7, %v1669_v51  ;;  %v1675_v9 = vmax.f32 %v8810_v35, %v1674_v32 }
 0x25b   : > { %v1153_v18 = vmax.f32 %v1133_v59, %v1135_v11  ;;  %v2350_v4 = vpack.c.b16 %v2251_v34, %v2251_v34  ;;  %v1154_v62 = vmax.f32 %v1134_v25, %v1136_v33  ;;  %v2156_v22 = vsel %vm2136_vm13, %v8808_v12, %v8818_v21 }
 0x25c   : > { %v1979_v41 = vpack.c.bf16 %v1663_v49, %v1663_v49  ;;  %v1676_v42 = vrot.slane %v1675_v9, 1  ;;  %v9043_v56 = vsel %vm2138_vm14, %v8812_v14, %v2156_v22  ;;  %v9046_v10 = vadd.f32 %v8043_v20, %v8699_v40 }
 0x25d   : > { %v1377_v16 = vcombine.high %v1153_v18, %v1153_v18  ;;  %v1384_v58 = vrot.slane %v1153_v18, %v8704_v55  ;;  %2358 = vrot.lane.b32.xlu0 %v2350_v4, %s8239_s22  ;;  %v1394_v35 = vcombine.high %v1154_v62, %v1154_v62  ;;  %v1401_v7 = vrot.slane %v1154_v62, %v8704_v55 }
 0x25e   : > { %v9031_v27 = vunpack.c.l.b16 %v1979_v41  ;;  %v1677_v1 = vmax.f32 %v1675_v9, %v1676_v42 }
 0x25f   : > { %v1391_v21 = vrot.slane %v1377_v16, %v8704_v55  ;;  %v1392_v3 = vcombine.high %v1384_v58, %v1384_v58  ;;  %v1846_v8 = vsel %vm1509_vm11, %v1384_v58, -inf  ;;  %v1408_v60 = vrot.slane %v1394_v35, %v8704_v55 }
 0x260   : > { %v1847_v47 = vrot.slane %v1846_v8, 4  ;;  %v1409_v28 = vcombine.high %v1401_v7, %v1401_v7  ;;  %v1874_v44 = vsel %vm1509_vm11, %v1401_v7, -inf }
 0x261   : > { %v1393_v30 = vcombine.high %v1391_v21, %v1391_v21  ;;  %v1853_v49 = vsel %vm1509_vm11, %v1392_v3, -inf  ;;  %v1860_v50 = vsel %vm1509_vm11, %v1391_v21, -inf  ;;  %v1875_v59 = vrot.slane %v1874_v44, 4 }
 0x262   : > { %v1848_v51 = vmax.f32 %v1846_v8, %v1847_v47  ;;  %v1854_v32 = vrot.slane %v1853_v49, 4  ;;  %v1861_v53 = vrot.slane %v1860_v50, 4  ;;  %v1410_v33 = vcombine.high %v1408_v60, %v1408_v60 }
 0x263   : > { %v1867_v25 = vsel %vm1509_vm11, %v1393_v30, -inf  ;;  %v1876_v41 = vmax.f32 %v1874_v44, %v1875_v59  ;;  %v1881_v34 = vsel %vm1509_vm11, %v1409_v28, -inf  ;;  %v1888_v18 = vsel %vm1509_vm11, %v1408_v60, -inf }
 0x264   : > { %v1849_v9 = vrot.slane %v1848_v51, 2  ;;  %v1855_v20 = vmax.f32 %v1853_v49, %v1854_v32  ;;  %v1862_v4 = vmax.f32 %v1860_v50, %v1861_v53  ;;  %v1868_v62 = vrot.slane %v1867_v25, 4 }
 0x265   : > { %v1877_v22 = vrot.slane %v1876_v41, 2  ;;  %v1882_v16 = vrot.slane %v1881_v34, 4  ;;  %v1889_v58 = vrot.slane %v1888_v18, 4  ;;  %v1895_v42 = vsel %vm1509_vm11, %v1410_v33, -inf }
 0x266   : > { %v1850_v35 = vmax.f32 %v1848_v51, %v1849_v9  ;;  %v1856_v7 = vrot.slane %v1855_v20, 2  ;;  %v1863_v21 = vrot.slane %v1862_v4, 2  ;;  %v1869_v3 = vmax.f32 %v1867_v25, %v1868_v62  ;;  %v1094_v9 = vpop.f32.mrf.mxu0 }
 0x267   : > { %v1878_v8 = vmax.f32 %v1876_v41, %v1877_v22  ;;  %v1883_v47 = vmax.f32 %v1881_v34, %v1882_v16  ;;  %v1890_v44 = vmax.f32 %v1888_v18, %v1889_v58  ;;  %v1896_v30 = vrot.slane %v1895_v42, 4 }
 0x268   : > { %v1851_v28 = vrot.slane %v1850_v35, 1  ;;  %v1857_v59 = vmax.f32 %v1855_v20, %v1856_v7  ;;  %v1864_v60 = vmax.f32 %v1862_v4, %v1863_v21  ;;  %v1870_v0 = vrot.slane %v1869_v3, 2 }
 0x269   : > { %v1879_v49 = vrot.slane %v1878_v8, 1  ;;  %v1884_v50 = vrot.slane %v1883_v47, 2  ;;  %v1891_v32 = vrot.slane %v1890_v44, 2  ;;  %v9058_v53 = vmax.f32 %v1895_v42, %v1896_v30 }
 0x26a   : > { %v1852_v61 = vmax.f32 %v1850_v35, %v1851_v28  ;;  %v1858_v11 = vrot.slane %v1857_v59, 1  ;;  %v1865_v33 = vrot.slane %v1864_v60, 1  ;;  %v1871_v51 = vmax.f32 %v1869_v3, %v1870_v0 }
 0x26b   : > { %v1880_v6 = vmax.f32 %v1878_v8, %v1879_v49  ;;  %v1885_v25 = vmax.f32 %v1883_v47, %v1884_v50  ;;  %v9060_v41 = vmax.f32 %v1890_v44, %v1891_v32  ;;  %v1981_v34 = vpack.c.bf16 %v1677_v1, %v1677_v1  ;;  %v8044_v8 = vpop.f32.mrf.mxu0 }
 0x26c   : > { %v1859_v18 = vmax.f32 %v1857_v59, %v1858_v11  ;;  %v1866_v62 = vmax.f32 %v1864_v60, %v1865_v33  ;;  %v1872_v20 = vrot.slane %v1871_v51, 1  ;;  %v2006_v4 = vpack.c.bf16 %v1852_v61, %v1852_v61 }
 0x26d   : > { %v1886_v22 = vrot.slane %v1885_v25, 1  ;;  %v2010_v16 = vpack.c.bf16 %v1880_v6, %v1880_v6  ;;  %v11242_v58 = vpack.c.bf16 %v9028_v24, %v9028_v24  ;;  %v2101_v35 = vunpack.c.l.b16 %v1981_v34 }
 0x26e   : > { %v1873_v7 = vmax.f32 %v1871_v51, %v1872_v20  ;;  %v2007_v21 = vpack.c.bf16 %v1859_v18, %v1859_v18  ;;  %v2008_v0 = vpack.c.bf16 %v1866_v62, %v1866_v62  ;;  %v2126_v3 = vunpack.c.l.b16 %v2006_v4  ;;  %v1097_v51 = vpop.f32.mrf.mxu0 }
 0x26f   : > { %v2100_v42 = vunpack.c.l.b16 %v11242_v58  ;;  %v9065_v47 = vmax.f32 %v1885_v25, %v1886_v22  ;;  %v9067_v44 = vunpack.c.l.b16 %v2010_v16  ;;  %v2158_v61 = vsel %vm2140_vm15, %v8838_v26, %v9043_v56 }
 0x270   : > { %v1139_v6 = vmax.f32 %v9046_v10, 0.0  ;;  %v2009_v11 = vpack.c.bf16 %v1873_v7, %v1873_v7  ;;  %v2127_v1 = vunpack.c.l.b16 %v2007_v21  ;;  %v9073_v24 = vunpack.c.l.b16 %v2008_v0 }
 0x271   : > { %v2159_v30 = vsel %vm2142_vm0, %v9031_v27, %v2158_v61  ;;  %v2314_v28 = vrot.slane %v9067_v44, 4  ;;  %v11243_v60 = vrot.slane %v8808_v12, 6  ;;  %v2256_v56 = vrot.slane %v8812_v14, 5 }
 0x272   : > { %v2160_v59 = vsel %vm2144_vm2, %v2100_v42, %v2159_v30  ;;  %v9084_v50 = vunpack.c.l.b16 %v2009_v11  ;;  %v9087_v10 = vsel %vm2134_vm12, %v2127_v1, %v2126_v3  ;;  %v2308_v32 = vrot.slane %v2127_v1, 7 }
 0x273   : > { %v2255_v49 = vsel %vm2136_vm13, %v11243_v60, %v8827_v2  ;;  %v2310_v33 = vrot.slane %v9073_v24, 6  ;;  %v2161_v25 = vsel %vm2146_vm3, %v2101_v35, %v2160_v59  ;;  %v2258_v18 = vrot.slane %v8838_v26, 4 }
 0x274   : > { %v2257_v34 = vsel %vm2138_vm14, %v2256_v56, %v2255_v49  ;;  %v2260_v12 = vrot.slane %v9031_v27, 3  ;;  %v9095_v2 = vsel %vm2134_vm12, %v2308_v32, %v2126_v3  ;;  %v9097_v14 = vpack.c.b16 %v2161_v25, %v2161_v25 }
 0x275   : > { %v2262_v62 = vrot.slane %v2100_v42, 2  ;;  %v2264_v20 = vrot.slane %v2101_v35, 1  ;;  %v2259_v4 = vsel %vm2140_vm15, %v2258_v18, %v2257_v34  ;;  %v1095_v22 = vadd.f32 %v1094_v9, %v8699_v40 }
 0x276   : > { %v1106_v16 = vadd.f32 %v8044_v8, %v8699_v40  ;;  %v1098_v58 = vadd.f32 %v1097_v51, %v8699_v40  ;;  %2225 = vrot.lane.b32.xlu0 %v9097_v14, %s8238_s21  ;;  %v2261_v26 = vsel %vm2142_vm0, %v2260_v12, %v2259_v4  ;;  %v11244_v27 = vrot.slane %v8855_v23, 1 }
 0x277   : > { %v1725_v42 = vrot.slane %v8857_v38, 1  ;;  %v1730_v35 = vrot.slane %v8851_v37, 2  ;;  %v2263_v21 = vsel %vm2144_vm2, %v2262_v62, %v2261_v26  ;;  %v1137_v9 = vmax.f32 %v1095_v22, 0.0 }
 0x278   : > { %v1719_v7 = vmax.f32 %v8855_v23, %v11244_v27  ;;  %v1140_v0 = vmax.f32 %v1106_v16, 0.0  ;;  %v1138_v3 = vmax.f32 %v1098_v58, 0.0  ;;  %v2265_v40 = vsel %vm2146_vm3, %v2264_v20, %v2263_v21 }
 0x279   : > { %v1726_v8 = vmax.f32 %v8857_v38, %v1725_v42  ;;  %v1731_v61 = vmax.f32 %v8851_v37, %v1730_v35  ;;  %v2351_v1 = vpack.c.b16 %v2265_v40, %v2265_v40  ;;  %v1155_v30 = vmax.f32 %v1137_v9, %v1139_v6 }
 0x27a   : > { %v1987_v11 = vpack.c.bf16 %v1719_v7, %v1719_v7  ;;  %v1156_v59 = vmax.f32 %v1138_v3, %v1140_v0  ;;  %v2163_v23 = vsel %vm2136_vm13, %v8853_v43, %v8865_v5  ;;  %v11245_v18 = vrot.slane %v8853_v43, 6 }
 0x27b   : > { %v1732_v60 = vrot.slane %v1731_v61, 1  ;;  %v1988_v49 = vpack.c.bf16 %v1726_v8, %v1726_v8  ;;  %v2164_v32 = vsel %vm2138_vm14, %v8860_v54, %v2163_v23  ;;  %2360 = vrot.lane.b32.xlu1 %v2351_v1, %s8239_s22  ;;  %v1411_v38 = vcombine.high %v1155_v30, %v1155_v30 }
 0x27c   : > { %v9118_v56 = vunpack.c.l.b16 %v1987_v11  ;;  %v1418_v37 = vrot.slane %v1155_v30, %v8704_v55  ;;  %v1428_v51 = vcombine.high %v1156_v59, %v1156_v59  ;;  %v1435_v6 = vrot.slane %v1156_v59, %v8704_v55 }
 0x27d   : > { %v1733_v25 = vmax.f32 %v1731_v61, %v1732_v60  ;;  %v9125_v34 = vunpack.c.l.b16 %v1988_v49  ;;  %v2165_v5 = vsel %vm2140_vm15, %v8878_v17, %v2164_v32  ;;  %v9133_v12 = vsel %vm2136_vm13, %v11245_v18, %v8874_v13 }
 0x27e   : > { %v1425_v62 = vrot.slane %v1411_v38, %v8704_v55  ;;  %v1426_v20 = vcombine.high %v1418_v37, %v1418_v37  ;;  %v1902_v4 = vsel %vm1509_vm11, %v1418_v37, -inf  ;;  %v1442_v22 = vrot.slane %v1428_v51, %v8704_v55 }
 0x27f   : > { %v1903_v16 = vrot.slane %v1902_v4, 4  ;;  %v1443_v58 = vcombine.high %v1435_v6, %v1435_v6  ;;  %v1930_v26 = vsel %vm1509_vm11, %v1435_v6, -inf  ;;  %v1989_v27 = vpack.c.bf16 %v1733_v25, %v1733_v25 }
 0x280   : > { %v1427_v7 = vcombine.high %v1425_v62, %v1425_v62  ;;  %v1909_v42 = vsel %vm1509_vm11, %v1426_v20, -inf  ;;  %v1916_v43 = vsel %vm1509_vm11, %v1425_v62, -inf  ;;  %v1444_v35 = vcombine.high %v1442_v22, %v1442_v22 }
 0x281   : > { %v1904_v13 = vmax.f32 %v1902_v4, %v1903_v16  ;;  %v1910_v21 = vrot.slane %v1909_v42, 4  ;;  %v1917_v9 = vrot.slane %v1916_v43, 4  ;;  %v1931_v0 = vrot.slane %v1930_v26, 4 }
 0x282   : > { %v1923_v3 = vsel %vm1509_vm11, %v1427_v7, -inf  ;;  %v1937_v40 = vsel %vm1509_vm11, %v1443_v58, -inf  ;;  %v1944_v8 = vsel %vm1509_vm11, %v1442_v22, -inf  ;;  %v1951_v61 = vsel %vm1509_vm11, %v1444_v35, -inf }
 0x283   : > { %v1905_v11 = vrot.slane %v1904_v13, 2  ;;  %v1911_v1 = vmax.f32 %v1909_v42, %v1910_v21  ;;  %v1918_v30 = vmax.f32 %v1916_v43, %v1917_v9  ;;  %v1924_v59 = vrot.slane %v1923_v3, 4 }
 0x284   : > { %v1932_v23 = vmax.f32 %v1930_v26, %v1931_v0  ;;  %v1938_v60 = vrot.slane %v1937_v40, 4  ;;  %v1945_v49 = vrot.slane %v1944_v8, 4  ;;  %v1952_v32 = vrot.slane %v1951_v61, 4 }
 0x285   : > { %v1906_v38 = vmax.f32 %v1904_v13, %v1905_v11  ;;  %v1912_v37 = vrot.slane %v1911_v1, 2  ;;  %v1919_v51 = vrot.slane %v1918_v30, 2  ;;  %v1925_v6 = vmax.f32 %v1923_v3, %v1924_v59 }
 0x286   : > { %v1933_v25 = vrot.slane %v1932_v23, 2  ;;  %v1939_v18 = vmax.f32 %v1937_v40, %v1938_v60  ;;  %v1946_v62 = vmax.f32 %v1944_v8, %v1945_v49  ;;  %v9145_v20 = vmax.f32 %v1951_v61, %v1952_v32 }
 0x287   : > { %v1907_v4 = vrot.slane %v1906_v38, 1  ;;  %v1913_v22 = vmax.f32 %v1911_v1, %v1912_v37  ;;  %v1920_v16 = vmax.f32 %v1918_v30, %v1919_v51  ;;  %v1926_v58 = vrot.slane %v1925_v6, 2 }
 0x288   : > { %v1934_v7 = vmax.f32 %v1932_v23, %v1933_v25  ;;  %v1940_v42 = vrot.slane %v1939_v18, 2  ;;  %v1947_v43 = vrot.slane %v1946_v62, 2  ;;  %v2109_v26 = vunpack.c.l.b16 %v1989_v27 }
 0x289   : > { %v1908_v35 = vmax.f32 %v1906_v38, %v1907_v4  ;;  %v1914_v21 = vrot.slane %v1913_v22, 1  ;;  %v1921_v9 = vrot.slane %v1920_v16, 1  ;;  %v1927_v13 = vmax.f32 %v1925_v6, %v1926_v58 }
 0x28a   : > { %v1935_v0 = vrot.slane %v1934_v7, 1  ;;  %v1941_v11 = vmax.f32 %v1939_v18, %v1940_v42  ;;  %v9147_v3 = vmax.f32 %v1946_v62, %v1947_v43  ;;  %v2166_v40 = vsel %vm2142_vm0, %v9118_v56, %v2165_v5 }
 0x28b   : > { %v1915_v8 = vmax.f32 %v1913_v22, %v1914_v21  ;;  %v1922_v61 = vmax.f32 %v1920_v16, %v1921_v9  ;;  %v1928_v1 = vrot.slane %v1927_v13, 1  ;;  %v2014_v30 = vpack.c.bf16 %v1908_v35, %v1908_v35 }
 0x28c   : > { %v1936_v59 = vmax.f32 %v1934_v7, %v1935_v0  ;;  %v1942_v23 = vrot.slane %v1941_v11, 1  ;;  %v2167_v27 = vsel %vm2144_vm2, %v9125_v34, %v2166_v40  ;;  %v2270_v60 = vrot.slane %v8860_v54, 5 }
 0x28d   : > { %v1929_v49 = vmax.f32 %v1927_v13, %v1928_v1  ;;  %v2015_v32 = vpack.c.bf16 %v1915_v8, %v1915_v8  ;;  %v2016_v38 = vpack.c.bf16 %v1922_v61, %v1922_v61  ;;  %v2205_v37 = vunpack.c.l.b16 %v2014_v30  ;;  %v11247_v1 = vld [vmem:[#allocation6_spill] sm:$0xff]  ;;  %v11248_v30 = vld [vmem:[#allocation8_spill] sm:$0xff] }
 0x28e   : > { %v9154_v51 = vmax.f32 %v1941_v11, %v1942_v23  ;;  %v2018_v6 = vpack.c.bf16 %v1936_v59, %v1936_v59  ;;  %v2168_v5 = vsel %vm2146_vm3, %v2109_v26, %v2167_v27  ;;  %v2271_v25 = vsel %vm2138_vm14, %v2270_v60, %v9133_v12 }
 0x28f   : > { %v2017_v18 = vpack.c.bf16 %v1929_v49, %v1929_v49  ;;  %v2206_v62 = vunpack.c.l.b16 %v2015_v32  ;;  %v9159_v4 = vunpack.c.l.b16 %v2016_v38  ;;  %v9161_v22 = vpack.c.b16 %v2168_v5, %v2168_v5  ;;  %v11250_v49 = vld [vmem:[#allocation7_spill] sm:$0xff] }
 0x290   : > { %v9163_v16 = vunpack.c.l.b16 %v2018_v6  ;;  %v2272_v54 = vrot.slane %v8878_v17, 4  ;;  %v2274_v58 = vrot.slane %v9118_v56, 3  ;;  %v2276_v7 = vrot.slane %v9125_v34, 2  ;;  %v11251_v6 = vld [vmem:[#allocation9_spill] sm:$0xff] }
 0x291   : > { %v9168_v42 = vunpack.c.l.b16 %v2017_v18  ;;  %v9171_v43 = vsel %vm2134_vm12, %v2206_v62, %v2205_v37  ;;  %v2322_v12 = vrot.slane %v2206_v62, 7  ;;  %v2324_v35 = vrot.slane %v9159_v4, 6  ;;  %2227 = vrot.lane.b32.xlu1 %v9161_v22, %s8238_s21 }
 0x292   : > { %v2328_v21 = vrot.slane %v9163_v16, 4  ;;  %v2273_v9 = vsel %vm2140_vm15, %v2272_v54, %v2271_v25  ;;  %v2278_v17 = vrot.slane %v2109_v26, 1  ;;  %v11246_v56 = vrot.slane %v8904_v39, 1 }
 0x293   : > { %v9182_v13 = vsel %vm2134_vm12, %v2322_v12, %v2205_v37  ;;  %v2275_v0 = vsel %vm2142_vm0, %v2274_v58, %v2273_v9  ;;  %v1781_v11 = vrot.slane %v8906_v36, 1  ;;  %v1786_v40 = vrot.slane %v8900_v45, 2 }
 0x294   : > { %v1775_v34 = vmax.f32 %v8904_v39, %v11246_v56  ;;  %v2277_v8 = vsel %vm2144_vm2, %v2276_v7, %v2275_v0  ;;  %v2170_v26 = vsel %vm2136_vm13, %v11247_v1, %v8914_v48  ;;  %v11249_v59 = vrot.slane %v11247_v1, 6 }
 0x295   : > { %v2279_v23 = vsel %vm2146_vm3, %v2278_v17, %v2277_v8  ;;  %v1782_v27 = vmax.f32 %v8906_v36, %v1781_v11  ;;  %v1787_v60 = vmax.f32 %v8900_v45, %v1786_v40  ;;  %v2171_v32 = vsel %vm2138_vm14, %v11250_v49, %v2170_v26 }
 0x296   : > { %v1995_v61 = vpack.c.bf16 %v1775_v34, %v1775_v34  ;;  %v2283_v39 = vsel %vm2136_vm13, %v11249_v59, %v11248_v30  ;;  %v2352_v38 = vpack.c.b16 %v2279_v23, %v2279_v23  ;;  %v2172_v5 = vsel %vm2140_vm15, %v11251_v6, %v2171_v32 }
 0x297   : > { %v2284_v48 = vrot.slane %v11250_v49, 5  ;;  %v1788_v25 = vrot.slane %v1787_v60, 1  ;;  %v1996_v18 = vpack.c.bf16 %v1782_v27, %v1782_v27  ;;  %v2286_v62 = vrot.slane %v11251_v6, 4 }
 0x298   : > { %v2115_v37 = vunpack.c.l.b16 %v1995_v61  ;;  %v1837_v54 = vrot.slane %v8975_v52, 1  ;;  %2362 = vrot.lane.b32.xlu0 %v2352_v38, %s8239_s22  ;;  %v1842_v7 = vrot.slane %v8973_v29, 2  ;;  %v2003_v11 = vpack.c.bf16 %v8979_v19, %v8979_v19 }
 0x299   : > { %v2285_v36 = vsel %vm2138_vm14, %v2284_v48, %v2283_v39  ;;  %v1789_v12 = vmax.f32 %v1787_v60, %v1788_v25  ;;  %v2116_v9 = vunpack.c.l.b16 %v1996_v18  ;;  %v2177_v40 = vsel %vm2136_vm13, %v8983_v15, %v8999_v31 }
 0x29a   : > { %v2173_v45 = vsel %vm2142_vm0, %v2115_v37, %v2172_v5  ;;  %v2288_v58 = vrot.slane %v2115_v37, 3  ;;  %v2287_v17 = vsel %vm2140_vm15, %v2286_v62, %v2285_v36  ;;  %v1838_v56 = vmax.f32 %v8975_v52, %v1837_v54 }
 0x29b   : > { %v1843_v0 = vmax.f32 %v8973_v29, %v1842_v7  ;;  %v1997_v8 = vpack.c.bf16 %v1789_v12, %v1789_v12  ;;  %v2174_v61 = vsel %vm2144_vm2, %v2116_v9, %v2173_v45  ;;  %v2290_v1 = vrot.slane %v2116_v9, 2 }
 0x29c   : > { %v2289_v34 = vsel %vm2142_vm0, %v2288_v58, %v2287_v17  ;;  %v2004_v26 = vpack.c.bf16 %v1838_v56, %v1838_v56  ;;  %v2123_v59 = vunpack.c.l.b16 %v2003_v11  ;;  %v2178_v52 = vsel %vm2138_vm14, %v8996_v57, %v2177_v40 }
 0x29d   : > { %v1844_v30 = vrot.slane %v1843_v0, 1  ;;  %v11252_v29 = vrot.slane %v8983_v15, 6  ;;  %v2117_v19 = vunpack.c.l.b16 %v1997_v8  ;;  %v2291_v23 = vsel %vm2144_vm2, %v2290_v1, %v2289_v34 }
 0x29e   : > { %v2124_v27 = vunpack.c.l.b16 %v2004_v26  ;;  %v2179_v31 = vsel %vm2140_vm15, %v8981_v46, %v2178_v52  ;;  %v2298_v32 = vrot.slane %v8996_v57, 5  ;;  %v2302_v38 = vrot.slane %v2123_v59, 3 }
 0x29f   : > { %v2297_v39 = vsel %vm2136_vm13, %v11252_v29, %v9006_v63  ;;  %v1845_v60 = vmax.f32 %v1843_v0, %v1844_v30  ;;  %v2180_v49 = vsel %vm2142_vm0, %v2123_v59, %v2179_v31  ;;  %v2175_v37 = vsel %vm2146_vm3, %v2117_v19, %v2174_v61 }
 0x2a0   : > { %v2292_v6 = vrot.slane %v2117_v19, 1  ;;  %v2181_v15 = vsel %vm2144_vm2, %v2124_v27, %v2180_v49  ;;  %v2304_v5 = vrot.slane %v2124_v27, 2  ;;  %v9232_v63 = vpack.c.b16 %v2175_v37, %v2175_v37 }
 0x2a1   : > { %v2005_v48 = vpack.c.bf16 %v1845_v60, %v1845_v60  ;;  %v2299_v25 = vsel %vm2138_vm14, %v2298_v32, %v2297_v39  ;;  %v1893_v18 = vrot.slane %v9060_v41, 1  ;;  %v11253_v54 = vrot.slane %v8981_v46, 4 }
 0x2a2   : > { %v2293_v62 = vsel %vm2146_vm3, %v2292_v6, %v2291_v23  ;;  %v1898_v45 = vrot.slane %v9058_v53, 2  ;;  %v2011_v36 = vpack.c.bf16 %v9065_v47, %v9065_v47  ;;  %2229 = vrot.lane.b32.xlu0 %v9232_v63, %s8238_s21  ;;  %v2184_v34 = vsel %vm2136_vm13, %v9073_v24, %v9087_v10 }
 0x2a3   : > { %v2301_v57 = vsel %vm2140_vm15, %v11253_v54, %v2299_v25  ;;  %v2353_v58 = vpack.c.b16 %v2293_v62, %v2293_v62  ;;  %v2125_v7 = vunpack.c.l.b16 %v2005_v48  ;;  %v1894_v9 = vmax.f32 %v9060_v41, %v1893_v18 }
 0x2a4   : > { %v2303_v12 = vsel %vm2142_vm0, %v2302_v38, %v2301_v57  ;;  %v1899_v46 = vmax.f32 %v9058_v53, %v1898_v45  ;;  %v2131_v56 = vunpack.c.l.b16 %v2011_v36  ;;  %v2185_v40 = vsel %vm2138_vm14, %v9084_v50, %v2184_v34 }
 0x2a5   : > { %v2305_v17 = vsel %vm2144_vm2, %v2304_v5, %v2303_v12  ;;  %2364 = vrot.lane.b32.xlu1 %v2353_v58, %s8239_s22  ;;  %v2182_v47 = vsel %vm2146_vm3, %v2125_v7, %v2181_v15  ;;  %v2306_v0 = vrot.slane %v2125_v7, 1  ;;  %v2012_v11 = vpack.c.bf16 %v1894_v9, %v1894_v9 }
 0x2a6   : > { %v9256_v8 = vpack.c.b16 %v2182_v47, %v2182_v47  ;;  %v1900_v41 = vrot.slane %v1899_v46, 1  ;;  %v2186_v53 = vsel %vm2140_vm15, %v9067_v44, %v2185_v40  ;;  %v2311_v10 = vsel %vm2136_vm13, %v2310_v33, %v9095_v2 }
 0x2a7   : > { %v2307_v61 = vsel %vm2146_vm3, %v2306_v0, %v2305_v17  ;;  %v2132_v1 = vunpack.c.l.b16 %v2012_v11  ;;  %v2187_v26 = vsel %vm2142_vm0, %v2131_v56, %v2186_v53  ;;  %v2312_v30 = vrot.slane %v9084_v50, 5 }
 0x2a8   : > { %v2354_v59 = vpack.c.b16 %v2307_v61, %v2307_v61  ;;  %v1901_v52 = vmax.f32 %v1899_v46, %v1900_v41  ;;  %v2316_v29 = vrot.slane %v2131_v56, 3  ;;  %v1949_v39 = vrot.slane %v9147_v3, 1 }
 0x2a9   : > { %2231 = vrot.lane.b32.xlu1 %v9256_v8, %s8238_s21  ;;  %v2188_v19 = vsel %vm2144_vm2, %v2132_v1, %v2187_v26  ;;  %v2313_v24 = vsel %vm2138_vm14, %v2312_v30, %v2311_v10  ;;  %v2318_v33 = vrot.slane %v2132_v1, 2  ;;  %v1954_v2 = vrot.slane %v9145_v20, 2 }
 0x2aa   : > { %2366 = vrot.lane.b32.xlu0 %v2354_v59, %s8239_s22  ;;  %v2013_v23 = vpack.c.bf16 %v1901_v52, %v1901_v52  ;;  %v2315_v50 = vsel %vm2140_vm15, %v2314_v28, %v2313_v24  ;;  %v1950_v27 = vmax.f32 %v9147_v3, %v1949_v39  ;;  %v2019_v31 = vpack.c.bf16 %v9154_v51, %v9154_v51  ;;  %v8130_v59 = vld [vmem:[%s11201_s2 + $0x38] sm:$0xff]  }
 0x2ab   : > { %v2317_v60 = vsel %vm2142_vm0, %v2316_v29, %v2315_v50  ;;  %v1955_v49 = vmax.f32 %v9145_v20, %v1954_v2  ;;  %v2214_v32 = vsel %vm2136_vm13, %v9159_v4, %v9171_v43  ;;  %v2325_v44 = vsel %vm2136_vm13, %v2324_v35, %v9182_v13  ;;  %2729 = vmatpush1.bf16.msra.mxu1 %v8130_v59  ;;  %v8133_v2 = vld [vmem:[%s11201_s2 + $0x20] sm:$0xff]   ;;  %v8135_v50 = vld [vmem:[%s11201_s2 + $0x10] sm:$0xff]  }
 0x2ac   : > { %v2133_v38 = vunpack.c.l.b16 %v2013_v23  ;;  %v2319_v28 = vsel %vm2144_vm2, %v2318_v33, %v2317_v60  ;;  %v2020_v3 = vpack.c.bf16 %v1950_v27, %v1950_v27  ;;  %v2210_v37 = vunpack.c.l.b16 %v2019_v31  ;;  %v8132_v33 = vld [vmem:[%s11201_s2 + $0x28] sm:$0xff]   ;;  %v8134_v23 = vld [vmem:[%s11201_s2 + $0x18] sm:$0xff]  }
 0x2ad   : > { %v1956_v6 = vrot.slane %v1955_v49, 1  ;;  %v2215_v51 = vsel %vm2138_vm14, %v9168_v42, %v2214_v32  ;;  %v2326_v20 = vrot.slane %v9168_v42, 5  ;;  %v11254_v15 = vmov 0   ;;  %v8136_v31 = vld [vmem:[%s11201_s2 + $0x8] sm:$0xff]  }
 0x2ae   : > { %v2237_v5 = vunpack.c.l.b16 %v11254_v15  ;;  %v2189_v43 = vsel %vm2146_vm3, %v2133_v38, %v2188_v19  ;;  %v2320_v48 = vrot.slane %v2133_v38, 1  ;;  %v2211_v25 = vunpack.c.l.b16 %v2020_v3  ;;  %v8131_v19 = vld [vmem:[%s11201_s2 + $0x30] sm:$0xff]   ;;  %2730 = vmatprep.subr.bf16.mxu1 %v11254_v15 }
 0x2af   : > { %v2216_v4 = vsel %vm2140_vm15, %v9163_v16, %v2215_v51  ;;  %v9297_v35 = vpack.c.b16 %v2189_v43, %v2189_v43  ;;  %v1957_v13 = vmax.f32 %v1955_v49, %v1956_v6  ;;  %v2327_v62 = vsel %vm2138_vm14, %v2326_v20, %v2325_v44  ;;  %2731 = vmatpush1.bf16.msra.mxu1 %v8131_v19 }
 0x2b0   : > { %v2217_v18 = vsel %vm2142_vm0, %v2210_v37, %v2216_v4  ;;  %v2321_v54 = vsel %vm2146_vm3, %v2320_v48, %v2319_v28  ;;  %v2329_v57 = vsel %vm2140_vm15, %v2328_v21, %v2327_v62  ;;  %v2330_v45 = vrot.slane %v2210_v37, 3  ;;  %2732 = vmatprep.subr.bf16.mxu1 %v11254_v15  ;;  %v8138_v48 = vld [vmem:[%s11201_s2 + $0x40] sm:$0xff]  }
 0x2b1   : > { %v2218_v42 = vsel %vm2144_vm2, %v2211_v25, %v2217_v18  ;;  %2233 = vrot.lane.b32.xlu0 %v9297_v35, %s8238_s21  ;;  %v2355_v36 = vpack.c.b16 %v2321_v54, %v2321_v54  ;;  %v2021_v58 = vpack.c.bf16 %v1957_v13, %v1957_v13  ;;  %v2332_v7 = vrot.slane %v2211_v25, 2  ;;  %v2222_v27 = vpop.permute.xlu0 %2221  ;;  %v11257_v25 = vld [vmem:[#allocation10_spill] sm:$0xff] }
 0x2b2   : > { %v2336_v12 = vrot.slane %v2237_v5, 7  ;;  %v2331_v9 = vsel %vm2142_vm0, %v2330_v45, %v2329_v57  ;;  %v2338_v17 = vrot.slane %v2237_v5, 6  ;;  %v2340_v46 = vrot.slane %v2237_v5, 5 }
 0x2b3   : > { %v2342_v56 = vrot.slane %v2237_v5, 4  ;;  %2368 = vrot.lane.b32.xlu1 %v2355_v36, %s8239_s22  ;;  %v2212_v34 = vunpack.c.l.b16 %v2021_v58  ;;  %v2344_v47 = vrot.slane %v2237_v5, 3  ;;  %v2333_v21 = vsel %vm2144_vm2, %v2332_v7, %v2331_v9  ;;  %2733 = vmatpush1.bf16.msra.mxu1 %v8132_v33 }
 0x2b4   : > { %v2337_v16 = vsel %vm2134_vm12, %v2336_v12, %v2237_v5  ;;  %v2346_v11 = vrot.slane %v2237_v5, 2  ;;  %v2348_v10 = vrot.slane %v2237_v5, 1  ;;  %2734 = vmatprep.subr.bf16.mxu1 %v11254_v15  ;;  %v2376_v60 = vsel %vm2374_vm4, 0, %v2222_v27  ;;  %v8137_v5 = vld [vmem:[%s11201_s2] sm:$0xff]   ;;  %v11258_v12 = vld [vmem:[#allocation11_spill] sm:$0xff] }
 0x2b5   : > { %v2339_v0 = vsel %vm2136_vm13, %v2338_v17, %v2337_v16  ;;  %v2219_v40 = vsel %vm2146_vm3, %v2212_v34, %v2218_v42  ;;  %v2334_v41 = vrot.slane %v2212_v34, 1  ;;  %vm2562_vm11 = vcmask 392192  }
 0x2b6   : > { %v9315_v53 = vsel %vm2138_vm14, %v2340_v46, %v2339_v0  ;;  %v2220_v61 = vpack.c.b16 %v2219_v40, %v2219_v40 }
 0x2b7   : > { %v2343_v1 = vsel %vm2140_vm15, %v2342_v56, %v9315_v53  ;;  %v2335_v26 = vsel %vm2146_vm3, %v2334_v41, %v2333_v21  ;;  %2735 = vmatpush1.bf16.msra.mxu1 %v8133_v2  ;;  %vm2587_vm15 = vcmask 785408  }
 0x2b8   : > { %v2345_v30 = vsel %vm2142_vm0, %v2344_v47, %v2343_v1  ;;  %2235 = vrot.lane.b32.xlu1 %v2220_v61, %s8238_s21  ;;  %v2356_v52 = vpack.c.b16 %v2335_v26, %v2335_v26  ;;  %2736 = vmatprep.subr.bf16.mxu1 %v11254_v15  ;;  %vm2893_vm0 = vcmask 254976  }
 0x2b9   : > { %v2347_v29 = vsel %vm2144_vm2, %v2346_v11, %v2345_v30 }
 0x2ba   : > { %v2349_v39 = vsel %vm2146_vm3, %v2348_v10, %v2347_v29  ;;  %2370 = vrot.lane.b32.xlu0 %v2356_v52, %s8239_s22  ;;  %vm8244_vm3 = vmmov 0  }
 0x2bb   : > { %v2357_v24 = vpack.c.b16 %v2349_v39, %v2349_v39  ;;  %2737 = vmatpush1.bf16.msra.mxu1 %v8134_v23 }
 0x2bc   : > { %2738 = vmatprep.subr.bf16.mxu1 %v11254_v15 }
 0x2bd   : > { %2372 = vrot.lane.b32.xlu1 %v2357_v24, %s8239_s22 }
 0x2bf   : > { %2739 = vmatpush1.bf16.msra.mxu1 %v8135_v50 }
 0x2c0   : > { %2740 = vmatprep.subr.bf16.mxu1 %v11254_v15 }
 0x2c3   : > { %2741 = vmatpush1.bf16.msra.mxu1 %v8136_v31 }
 0x2c4   : > { %2742 = vmatprep.subr.bf16.mxu1 %v11254_v15 }
 0x2c7   : > { %2743 = vmatpush1.bf16.msra.mxu1 %v8137_v5 }
 0x2c8   : > { %2758 = vmatprep.subr.bf16.mxu1 %v11254_v15 }
 0x2ca   : > { %v2224_v43 = vpop.permute.xlu1 %2223 }
 0x2cb   : > { %2759 = vmatpush2.bf16.msra.mxu1 %v8138_v48  ;;  %v2379_v4 = vsel %vm2374_vm4, %v11257_v25, %v2224_v43 }
 0x2cf   : > { %v2359_v49 = vpop.permute.xlu0 %2358 }
 0x2d0   : > { %v2400_v32 = vsel %vm2398_vm6, %v2376_v60, %v2359_v49 }
 0x2d1   : > { %2522 = vrot.lane.b32.xlu0 %v2400_v32, %s8240_s18  ;;  %v2415_v44 = vshrl.u32 %v2400_v32, 16  ;;  %v2418_v38 = vshll.u32 %v2400_v32, 16 }
 0x2d3   : > { %v2417_v28 = vrot.slane %v2415_v44, 7  ;;  %v2479_v3 = vrot.slane %v2418_v38, 1 }
 0x2d5   : > { %v2480_v6 = vor.u32 %v2479_v3, %v2415_v44  ;;  %v9361_v51 = vor.u32 %v2418_v38, %v2417_v28 }
 0x2d7   : > { %v2506_v20 = vsel %vm9357_vm10, %v2480_v6, 0 }
 0x2d8   : > { %2546 = vrot.lane.b32.xlu0 %v2506_v20, %s8241_s19 }
 0x2e8   : > { %v2226_v7 = vpop.permute.xlu0 %2225 }
 0x2e9   : > { %v2382_v9 = vsel %vm2374_vm4, %v11258_v12, %v2226_v7 }
 0x2ed   : > { %v2361_v13 = vpop.permute.xlu1 %2360 }
 0x2ee   : > { %v2402_v18 = vsel %vm2398_vm6, %v2379_v4, %v2361_v13 }
 0x2ef   : > { %v2421_v62 = vshrl.u32 %v2402_v18, 16  ;;  %v2424_v54 = vshll.u32 %v2402_v18, 16  ;;  %2524 = vrot.lane.b32.xlu1 %v2402_v18, %s8240_s18 }
 0x2f1   : > { %v2423_v42 = vrot.slane %v2421_v62, 7  ;;  %v2481_v57 = vrot.slane %v2424_v54, 1 }
 0x2f3   : > { %v2482_v45 = vor.u32 %v2481_v57, %v2421_v62  ;;  %v9377_v36 = vor.u32 %v2424_v54, %v2423_v42 }
 0x2f5   : > { %v2507_v58 = vsel %vm9357_vm10, %v2482_v45, 0 }
 0x2f6   : > { %2548 = vrot.lane.b32.xlu1 %v2507_v58, %s8241_s19 }
 0x303   : > { %v2228_v11 = vpop.permute.xlu1 %2227 }
 0x304   : > { %v2385_v41 = vsel %vm2374_vm4, %v9097_v14, %v2228_v11 }
 0x30a   : > { %v2363_v17 = vpop.permute.xlu0 %2362 }
 0x30b   : > { %v2404_v46 = vsel %vm2398_vm6, %v2382_v9, %v2363_v17 }
 0x30c   : > { %2526 = vrot.lane.b32.xlu0 %v2404_v46, %s8240_s18  ;;  %v2427_v56 = vshrl.u32 %v2404_v46, 16  ;;  %v2430_v34 = vshll.u32 %v2404_v46, 16 }
 0x30e   : > { %v2429_v16 = vrot.slane %v2427_v56, 7  ;;  %v2483_v47 = vrot.slane %v2430_v34, 1 }
 0x310   : > { %v2484_v21 = vor.u32 %v2483_v47, %v2427_v56  ;;  %v9386_v0 = vor.u32 %v2430_v34, %v2429_v16 }
 0x312   : > { %v2508_v40 = vsel %vm9357_vm10, %v2484_v21, 0 }
 0x313   : > { %2550 = vrot.lane.b32.xlu0 %v2508_v40, %s8241_s19 }
 0x314   : > { %v2230_v61 = vpop.permute.xlu0 %2229 }
 0x315   : > { %v2388_v29 = vsel %vm2374_vm4, %v9161_v22, %v2230_v61  ;;  %v2472_v61 = vsel %vm8590_vm7, 0, %v9377_v36  ;;  %v2473_v36 = vsel %vm8590_vm7, 0, %v9386_v0 }
 0x317   : > { %v2365_v10 = vpop.permute.xlu1 %2364 }
 0x318   : > { %v2406_v1 = vsel %vm2398_vm6, %v2385_v41, %v2365_v10  ;;  %v2471_v10 = vsel %vm8590_vm7, 0, %v9361_v51 }
 0x319   : > { %v2433_v26 = vshrl.u32 %v2406_v1, 16  ;;  %v2436_v30 = vshll.u32 %v2406_v1, 16  ;;  %2528 = vrot.lane.b32.xlu1 %v2406_v1, %s8240_s18 }
 0x31b   : > { %v2435_v59 = vrot.slane %v2433_v26, 7  ;;  %v2485_v52 = vrot.slane %v2436_v30, 1  ;;  %v2232_v31 = vpop.permute.xlu1 %2231 }
 0x31c   : > { %v2367_v39 = vpop.permute.xlu0 %2366  ;;  %v2391_v32 = vsel %vm2374_vm4, %v9232_v63, %v2232_v31 }
 0x31d   : > { %v2486_v19 = vor.u32 %v2485_v52, %v2433_v26  ;;  %v2408_v24 = vsel %vm2398_vm6, %v2388_v29, %v2367_v39  ;;  %v9398_v33 = vor.u32 %v2436_v30, %v2435_v59 }
 0x31e   : > { %2530 = vrot.lane.b32.xlu0 %v2408_v24, %s8240_s18  ;;  %v2439_v14 = vshrl.u32 %v2408_v24, 16  ;;  %v2442_v2 = vshll.u32 %v2408_v24, 16 }
 0x31f   : > { %v2509_v23 = vsel %vm9357_vm10, %v2486_v19, 0 }
 0x320   : > { %2552 = vrot.lane.b32.xlu1 %v2509_v23, %s8241_s19  ;;  %v2441_v50 = vrot.slane %v2439_v14, 7  ;;  %v2487_v27 = vrot.slane %v2442_v2, 1 }
 0x322   : > { %v2488_v60 = vor.u32 %v2487_v27, %v2439_v14  ;;  %v9404_v22 = vor.u32 %v2442_v2, %v2441_v50  ;;  %v2474_v14 = vsel %vm8590_vm7, 0, %v9398_v33 }
 0x323   : > { %v2234_v6 = vpop.permute.xlu0 %2233 }
 0x324   : > { %v2510_v49 = vsel %vm9357_vm10, %v2488_v60, 0  ;;  %v2394_v4 = vsel %vm2374_vm4, %v9256_v8, %v2234_v6  ;;  %v2475_v33 = vsel %vm8590_vm7, 0, %v9404_v22 }
 0x325   : > { %v2369_v44 = vpop.permute.xlu1 %2368  ;;  %2554 = vrot.lane.b32.xlu0 %v2510_v49, %s8241_s19 }
 0x326   : > { %v2410_v38 = vsel %vm2398_vm6, %v2391_v32, %v2369_v44 }
 0x327   : > { %v2445_v28 = vshrl.u32 %v2410_v38, 16  ;;  %v2448_v3 = vshll.u32 %v2410_v38, 16  ;;  %2532 = vrot.lane.b32.xlu1 %v2410_v38, %s8240_s18 }
 0x329   : > { %v2447_v20 = vrot.slane %v2445_v28, 7  ;;  %v2489_v5 = vrot.slane %v2448_v3, 1 }
 0x32a   : > { %v2236_v43 = vpop.permute.xlu1 %2235 }
 0x32b   : > { %v2490_v48 = vor.u32 %v2489_v5, %v2445_v28  ;;  %v9413_v25 = vor.u32 %v2448_v3, %v2447_v20  ;;  %v2397_v62 = vsel %vm2374_vm4, %v9297_v35, %v2236_v43 }
 0x32c   : > { %v2371_v63 = vpop.permute.xlu0 %2370 }
 0x32d   : > { %v2511_v13 = vsel %vm9357_vm10, %v2490_v48, 0  ;;  %v2412_v18 = vsel %vm2398_vm6, %v2394_v4, %v2371_v63  ;;  %v2476_v38 = vsel %vm8590_vm7, 0, %v9413_v25 }
 0x32e   : > { %2556 = vrot.lane.b32.xlu1 %v2511_v13, %s8241_s19  ;;  %2534 = vrot.lane.b32.xlu0 %v2412_v18, %s8240_s18  ;;  %v2451_v42 = vshrl.u32 %v2412_v18, 16  ;;  %v2454_v57 = vshll.u32 %v2412_v18, 16 }
 0x32f   : > { %v2373_v54 = vpop.permute.xlu1 %2372 }
 0x330   : > { %v2414_v45 = vsel %vm2398_vm6, %v2397_v62, %v2373_v54  ;;  %v2453_v58 = vrot.slane %v2451_v42, 7  ;;  %v2491_v12 = vrot.slane %v2454_v57, 1 }
 0x331   : > { %v2457_v8 = vshrl.u32 %v2414_v45, 16  ;;  %v2460_v7 = vshll.u32 %v2414_v45, 16 }
 0x332   : > { %2536 = vrot.lane.b32.xlu1 %v2414_v45, %s8240_s18  ;;  %v2492_v17 = vor.u32 %v2491_v12, %v2451_v42  ;;  %v2456_v56 = vor.u32 %v2454_v57, %v2453_v58  ;;  %v9478_v12 = vld [vmem:[%s11206_s7] sm:$0x3f] }
 0x333   : > { %v2459_v9 = vrot.slane %v2457_v8, 7  ;;  %v2493_v46 = vrot.slane %v2460_v7, 1 }
 0x334   : > { %v2512_v35 = vsel %vm9357_vm10, %v2492_v17, 0  ;;  %v2477_v25 = vsel %vm8590_vm7, 0, %v2456_v56 }
 0x335   : > { %v2494_v34 = vor.u32 %v2493_v46, %v2457_v8  ;;  %v2462_v16 = vor.u32 %v2460_v7, %v2459_v9  ;;  %2558 = vrot.lane.b32.xlu0 %v2512_v35, %s8241_s19  ;;  %v11260_v8 = vld [vmem:[#allocation4_spill] sm:$0xff] }
 0x336   : > { %v2648_v7 = vsub.s32 1, %v11260_v8 }
 0x337   : > { %v2513_v47 = vsel %vm9357_vm10, %v2494_v34, 0  ;;  %v2478_v13 = vsel %vm8590_vm7, 0, %v2462_v16 }
 0x338   : > { %2560 = vrot.lane.b32.xlu1 %v2513_v47, %s8241_s19  ;;  %v9481_v9 = vrot.slane %v9478_v12, %v2648_v7 }
 0x343   : > { %v2523_v21 = vpop.permute.xlu0 %2522 }
 0x344   : > { %v2565_v1 = vsel %vm2562_vm11, %v2471_v10, %v2523_v21 }
 0x34a   : > { %v2547_v40 = vpop.permute.xlu0 %2546 }
 0x34b   : > { %v2589_v59 = vsel %vm2587_vm15, %v2565_v1, %v2547_v40 }
 0x361   : > { %v2525_v11 = vpop.permute.xlu1 %2524 }
 0x362   : > { %v2568_v26 = vsel %vm2562_vm11, %v2472_v61, %v2525_v11 }
 0x368   : > { %v2549_v30 = vpop.permute.xlu1 %2548 }
 0x369   : > { %v2591_v52 = vsel %vm2587_vm15, %v2568_v26, %v2549_v30  ;;  %v7582_v29 = vcombine.low %v2547_v40, %v2549_v30 }
 0x36a   : > { %v7581_v39 = vcombine.low %v2589_v59, %v2591_v52 }
 0x36b   : > { %7598 = vmatprep.mubr.msk.bf16.mxu1 %vm2374_vm4, %v7582_v29 }
 0x36c   : > { %2761 = vmatmul.mubr.bf16.vlgmr.msra.gmra.mxu1 %v7581_v39 }
 0x37e   : > { %v2527_v19 = vpop.permute.xlu0 %2526 }
 0x37f   : > { %v2571_v2 = vsel %vm2562_vm11, %v2473_v36, %v2527_v19 }
 0x385   : > { %v2551_v24 = vpop.permute.xlu0 %2550 }
 0x386   : > { %v2593_v27 = vsel %vm2587_vm15, %v2571_v2, %v2551_v24 }
 0x38b   : > { %v2529_v51 = vpop.permute.xlu1 %2528 }
 0x38c   : > { %v2574_v23 = vsel %vm2562_vm11, %v2474_v14, %v2529_v51 }
 0x390   : > { %v2531_v32 = vpop.permute.xlu0 %2530 }
 0x391   : > { %v2577_v28 = vsel %vm2562_vm11, %v2475_v33, %v2531_v32 }
 0x392   : > { %v2553_v50 = vpop.permute.xlu1 %2552 }
 0x393   : > { %v2595_v31 = vsel %vm2587_vm15, %v2574_v23, %v2553_v50  ;;  %v7584_v60 = vcombine.low %v2551_v24, %v2553_v50 }
 0x394   : > { %v7583_v49 = vcombine.low %v2593_v27, %v2595_v31 }
 0x395   : > { %7599 = vmatprep.mubr.msk.bf16.mxu1 %vm2374_vm4, %v7584_v60 }
 0x396   : > { %2769 = vmatmul.mubr.bf16.gmra.mxu1 %v7583_v49 }
 0x397   : > { %v2555_v44 = vpop.permute.xlu0 %2554 }
 0x398   : > { %v2597_v20 = vsel %vm2587_vm15, %v2577_v28, %v2555_v44 }
 0x399   : > { %v2533_v0 = vpop.permute.xlu1 %2532 }
 0x39a   : > { %v2580_v3 = vsel %vm2562_vm11, %v2476_v38, %v2533_v0 }
 0x3a0   : > { %v2557_v6 = vpop.permute.xlu1 %2556  ;;  %v2535_v4 = vpop.permute.xlu0 %2534 }
 0x3a1   : > { %v2599_v5 = vsel %vm2587_vm15, %v2580_v3, %v2557_v6  ;;  %v7586_v43 = vcombine.low %v2555_v44, %v2557_v6  ;;  %v2583_v18 = vsel %vm2562_vm11, %v2477_v25, %v2535_v4 }
 0x3a2   : > { %v7585_v48 = vcombine.low %v2597_v20, %v2599_v5 }
 0x3a3   : > { %7600 = vmatprep.mubr.msk.bf16.mxu1 %vm2374_vm4, %v7586_v43 }
 0x3a4   : > { %2777 = vmatmul.mubr.bf16.gmra.mxu1 %v7585_v48  ;;  %v2537_v22 = vpop.permute.xlu1 %2536 }
 0x3a5   : > { %v2586_v62 = vsel %vm2562_vm11, %v2478_v13, %v2537_v22 }
 0x3a7   : > { %v2559_v63 = vpop.permute.xlu0 %2558 }
 0x3a8   : > { %v2601_v42 = vsel %vm2587_vm15, %v2583_v18, %v2559_v63 }
 0x3aa   : > { %v2561_v54 = vpop.permute.xlu1 %2560 }
 0x3ab   : > { %v2603_v57 = vsel %vm2587_vm15, %v2586_v62, %v2561_v54  ;;  %v7588_v45 = vcombine.low %v2559_v63, %v2561_v54 }
 0x3ac   : > { %v7587_v58 = vcombine.low %v2601_v42, %v2603_v57 }
 0x3ad   : > { %7601 = vmatprep.mubr.msk.bf16.mxu1 %vm2374_vm4, %v7588_v45 }
 0x3ae   : > { %2785 = vmatmul.mubr.bf16.gmra.mxu1 %v7587_v58 }
 0x42c   : > { %v2762_v17 = vpop.f32.mrf.mxu1 }
 0x42d   : > { %v2763_v56 = vadd.f32 %v2762_v17, %v9481_v9 }
 0x42e   : > { %v2764_v46 = vpop.f32.mrf.mxu1 }
 0x42f   : > { %v2793_v47 = vmax.f32 %v2763_v56, 0.0 }
 0x430   : > { %v2765_v35 = vpop.f32.mrf.mxu1 }
 0x431   : > { %v2766_v34 = vadd.f32 %v2765_v35, %v9481_v9 }
 0x432   : > { %v2767_v16 = vpop.f32.mrf.mxu1 }
 0x433   : > { %v2794_v21 = vmax.f32 %v2766_v34, 0.0 }
 0x435   : > { %v2801_v11 = vmax.f32 %v2793_v47, %v2794_v21 }
 0x437   : > { %v2809_v40 = vcombine.high %v2801_v11, %v2801_v11  ;;  %v2816_v10 = vrot.slane %v2801_v11, %v8704_v55 }
 0x439   : > { %v2823_v61 = vrot.slane %v2809_v40, %v8704_v55  ;;  %v2824_v1 = vcombine.high %v2816_v10, %v2816_v10  ;;  %v2894_v26 = vsel %vm2893_vm0, %v2816_v10, -inf }
 0x43a   : > { %v2895_v30 = vrot.slane %v2894_v26, 4 }
 0x43b   : > { %v2825_v59 = vcombine.high %v2823_v61, %v2823_v61  ;;  %v2901_v52 = vsel %vm2893_vm0, %v2824_v1, -inf  ;;  %v2908_v29 = vsel %vm2893_vm0, %v2823_v61, -inf }
 0x43c   : > { %v2896_v39 = vmax.f32 %v2894_v26, %v2895_v30  ;;  %v2902_v19 = vrot.slane %v2901_v52, 4  ;;  %v2909_v51 = vrot.slane %v2908_v29, 4 }
 0x43d   : > { %v2915_v24 = vsel %vm2893_vm0, %v2825_v59, -inf }
 0x43e   : > { %v2897_v36 = vrot.slane %v2896_v39, 2  ;;  %v2903_v14 = vmax.f32 %v2901_v52, %v2902_v19  ;;  %v2910_v2 = vmax.f32 %v2908_v29, %v2909_v51  ;;  %v2916_v23 = vrot.slane %v2915_v24, 4 }
 0x440   : > { %v2898_v50 = vmax.f32 %v2896_v39, %v2897_v36  ;;  %v2904_v27 = vrot.slane %v2903_v14, 2  ;;  %v2911_v31 = vrot.slane %v2910_v2, 2  ;;  %v2917_v60 = vmax.f32 %v2915_v24, %v2916_v23 }
 0x442   : > { %v2899_v49 = vrot.slane %v2898_v50, 1  ;;  %v2905_v32 = vmax.f32 %v2903_v14, %v2904_v27  ;;  %v2912_v0 = vmax.f32 %v2910_v2, %v2911_v31  ;;  %v2918_v44 = vrot.slane %v2917_v60, 2 }
 0x444   : > { %v2900_v33 = vmax.f32 %v2898_v50, %v2899_v49  ;;  %v2906_v38 = vrot.slane %v2905_v32, 1  ;;  %v2913_v28 = vrot.slane %v2912_v0, 1  ;;  %v2919_v3 = vmax.f32 %v2917_v60, %v2918_v44 }
 0x446   : > { %v2907_v6 = vmax.f32 %v2905_v32, %v2906_v38  ;;  %v3006_v20 = vpack.c.bf16 %v2900_v33, %v2900_v33  ;;  %v2914_v5 = vmax.f32 %v2912_v0, %v2913_v28  ;;  %v2920_v43 = vrot.slane %v2919_v3, 1 }
 0x448   : > { %v2921_v48 = vmax.f32 %v2919_v3, %v2920_v43  ;;  %v3007_v4 = vpack.c.bf16 %v2907_v6, %v2907_v6  ;;  %v3008_v22 = vpack.c.bf16 %v2914_v5, %v2914_v5  ;;  %v3034_v63 = vunpack.c.l.b16 %v3006_v20 }
 0x44a   : > { %v3009_v25 = vpack.c.bf16 %v2921_v48, %v2921_v48  ;;  %v3035_v13 = vunpack.c.l.b16 %v3007_v4  ;;  %v3036_v18 = vunpack.c.l.b16 %v3008_v22 }
 0x44c   : > { %v3037_v62 = vunpack.c.l.b16 %v3009_v25  ;;  %v3046_v54 = vsel %vm2134_vm12, %v3035_v13, %v3034_v63 }
 0x44d   : > { %v3047_v42 = vsel %vm2136_vm13, %v3036_v18, %v3046_v54 }
 0x44e   : > { %v3048_v57 = vsel %vm2138_vm14, %v3037_v62, %v3047_v42 }
 0x44f   : > { %v9494_v45 = vpack.c.b16 %v3048_v57, %v3048_v57 }
 0x451   : > { %3070 = vrot.lane.b32.xlu0 %v9494_v45, %s8239_s22 }
 0x456   : > { %v2770_v58 = vpop.f32.mrf.mxu1 }
 0x457   : > { %v2771_v17 = vadd.f32 %v2770_v58, %v9481_v9 }
 0x458   : > { %v2772_v7 = vpop.f32.mrf.mxu1 }
 0x459   : > { %v2795_v34 = vmax.f32 %v2771_v17, 0.0 }
 0x45a   : > { %v2773_v46 = vpop.f32.mrf.mxu1 }
 0x45b   : > { %v2774_v56 = vadd.f32 %v2773_v46, %v9481_v9 }
 0x45c   : > { %v2775_v35 = vpop.f32.mrf.mxu1 }
 0x45d   : > { %v2796_v16 = vmax.f32 %v2774_v56, 0.0 }
 0x45f   : > { %v2802_v47 = vmax.f32 %v2795_v34, %v2796_v16 }
 0x461   : > { %v2826_v21 = vcombine.high %v2802_v47, %v2802_v47  ;;  %v2833_v11 = vrot.slane %v2802_v47, %v8704_v55 }
 0x463   : > { %v2840_v40 = vrot.slane %v2826_v21, %v8704_v55  ;;  %v2841_v10 = vcombine.high %v2833_v11, %v2833_v11  ;;  %v2922_v61 = vsel %vm2893_vm0, %v2833_v11, -inf }
 0x464   : > { %v2923_v1 = vrot.slane %v2922_v61, 4  ;;  %v2778_v26 = vpop.f32.mrf.mxu1 }
 0x465   : > { %v2842_v30 = vcombine.high %v2840_v40, %v2840_v40  ;;  %v2929_v59 = vsel %vm2893_vm0, %v2841_v10, -inf  ;;  %v2936_v52 = vsel %vm2893_vm0, %v2840_v40, -inf  ;;  %v2779_v36 = vadd.f32 %v2778_v26, %v9481_v9 }
 0x466   : > { %v2924_v29 = vmax.f32 %v2922_v61, %v2923_v1  ;;  %v2930_v39 = vrot.slane %v2929_v59, 4  ;;  %v2937_v19 = vrot.slane %v2936_v52, 4  ;;  %v2780_v51 = vpop.f32.mrf.mxu1 }
 0x467   : > { %v2943_v24 = vsel %vm2893_vm0, %v2842_v30, -inf  ;;  %v2797_v33 = vmax.f32 %v2779_v36, 0.0 }
 0x468   : > { %v2925_v14 = vrot.slane %v2924_v29, 2  ;;  %v2931_v2 = vmax.f32 %v2929_v59, %v2930_v39  ;;  %v2938_v23 = vmax.f32 %v2936_v52, %v2937_v19  ;;  %v2944_v50 = vrot.slane %v2943_v24, 4  ;;  %v2781_v27 = vpop.f32.mrf.mxu1 }
 0x469   : > { %v2782_v31 = vadd.f32 %v2781_v27, %v9481_v9 }
 0x46a   : > { %v2926_v60 = vmax.f32 %v2924_v29, %v2925_v14  ;;  %v2932_v49 = vrot.slane %v2931_v2, 2  ;;  %v2939_v32 = vrot.slane %v2938_v23, 2  ;;  %v2945_v0 = vmax.f32 %v2943_v24, %v2944_v50  ;;  %v2783_v44 = vpop.f32.mrf.mxu1 }
 0x46b   : > { %v2798_v38 = vmax.f32 %v2782_v31, 0.0 }
 0x46c   : > { %v2927_v28 = vrot.slane %v2926_v60, 1  ;;  %v2933_v3 = vmax.f32 %v2931_v2, %v2932_v49  ;;  %v2940_v6 = vmax.f32 %v2938_v23, %v2939_v32  ;;  %v2946_v20 = vrot.slane %v2945_v0, 2 }
 0x46d   : > { %v2803_v5 = vmax.f32 %v2797_v33, %v2798_v38 }
 0x46e   : > { %v2786_v43 = vpop.f32.mrf.mxu1  ;;  %v2928_v48 = vmax.f32 %v2926_v60, %v2927_v28  ;;  %v2934_v4 = vrot.slane %v2933_v3, 1  ;;  %v2941_v63 = vrot.slane %v2940_v6, 1  ;;  %v2947_v62 = vmax.f32 %v2945_v0, %v2946_v20 }
 0x46f   : > { %v2787_v22 = vadd.f32 %v2786_v43, %v9481_v9  ;;  %v2843_v25 = vcombine.high %v2803_v5, %v2803_v5  ;;  %v2850_v13 = vrot.slane %v2803_v5, %v8704_v55 }
 0x470   : > { %v2788_v18 = vpop.f32.mrf.mxu1  ;;  %v2935_v54 = vmax.f32 %v2933_v3, %v2934_v4  ;;  %v3010_v42 = vpack.c.bf16 %v2928_v48, %v2928_v48  ;;  %v2942_v58 = vmax.f32 %v2940_v6, %v2941_v63  ;;  %v2948_v35 = vrot.slane %v2947_v62, 1 }
 0x471   : > { %v2799_v57 = vmax.f32 %v2787_v22, 0.0  ;;  %v2857_v7 = vrot.slane %v2843_v25, %v8704_v55  ;;  %v2858_v17 = vcombine.high %v2850_v13, %v2850_v13  ;;  %v2950_v46 = vsel %vm2893_vm0, %v2850_v13, -inf }
 0x472   : > { %v2789_v56 = vpop.f32.mrf.mxu1  ;;  %v9512_v34 = vunpack.c.l.b16 %v3010_v42  ;;  %v2951_v16 = vrot.slane %v2950_v46, 4  ;;  %v3011_v21 = vpack.c.bf16 %v2935_v54, %v2935_v54  ;;  %v2949_v1 = vmax.f32 %v2947_v62, %v2948_v35 }
 0x473   : > { %v2790_v47 = vadd.f32 %v2789_v56, %v9481_v9  ;;  %v2859_v11 = vcombine.high %v2857_v7, %v2857_v7  ;;  %v2957_v40 = vsel %vm2893_vm0, %v2858_v17, -inf  ;;  %v2964_v10 = vsel %vm2893_vm0, %v2857_v7, -inf }
 0x474   : > { %v2791_v61 = vpop.f32.mrf.mxu1  ;;  %v2952_v26 = vmax.f32 %v2950_v46, %v2951_v16  ;;  %v2958_v30 = vrot.slane %v2957_v40, 4  ;;  %v2965_v59 = vrot.slane %v2964_v10, 4  ;;  %v3012_v39 = vpack.c.bf16 %v2942_v58, %v2942_v58 }
 0x475   : > { %v2800_v52 = vmax.f32 %v2790_v47, 0.0  ;;  %v2971_v29 = vsel %vm2893_vm0, %v2859_v11, -inf  ;;  %v3013_v19 = vpack.c.bf16 %v2949_v1, %v2949_v1  ;;  %v3039_v51 = vunpack.c.l.b16 %v3011_v21 }
 0x476   : > { %v2953_v24 = vrot.slane %v2952_v26, 2  ;;  %v2959_v36 = vmax.f32 %v2957_v40, %v2958_v30  ;;  %v2966_v9 = vmax.f32 %v2964_v10, %v2965_v59  ;;  %v2972_v14 = vrot.slane %v2971_v29, 4 }
 0x477   : > { %v2804_v2 = vmax.f32 %v2799_v57, %v2800_v52  ;;  %v3040_v23 = vunpack.c.l.b16 %v3012_v39  ;;  %v3041_v50 = vunpack.c.l.b16 %v3013_v19  ;;  %v3049_v27 = vsel %vm2134_vm12, %v3039_v51, %v9512_v34 }
 0x478   : > { %v2954_v31 = vmax.f32 %v2952_v26, %v2953_v24  ;;  %v2960_v60 = vrot.slane %v2959_v36, 2  ;;  %v2967_v49 = vrot.slane %v2966_v9, 2  ;;  %v2973_v32 = vmax.f32 %v2971_v29, %v2972_v14 }
 0x479   : > { %v2860_v0 = vcombine.high %v2804_v2, %v2804_v2  ;;  %v2867_v44 = vrot.slane %v2804_v2, %v8704_v55  ;;  %v3050_v33 = vsel %vm2136_vm13, %v3040_v23, %v3049_v27  ;;  %v3078_v38 = vrot.slane %v3039_v51, 7 }
 0x47a   : > { %v2955_v28 = vrot.slane %v2954_v31, 1  ;;  %v2961_v3 = vmax.f32 %v2959_v36, %v2960_v60  ;;  %v2968_v6 = vmax.f32 %v2966_v9, %v2967_v49  ;;  %v2974_v20 = vrot.slane %v2973_v32, 2 }
 0x47b   : > { %v2874_v5 = vrot.slane %v2860_v0, %v8704_v55  ;;  %v2875_v43 = vcombine.high %v2867_v44, %v2867_v44  ;;  %v2978_v48 = vsel %vm2893_vm0, %v2867_v44, -inf  ;;  %v3051_v4 = vsel %vm2138_vm14, %v3041_v50, %v3050_v33 }
 0x47c   : > { %v2956_v22 = vmax.f32 %v2954_v31, %v2955_v28  ;;  %v2962_v63 = vrot.slane %v2961_v3, 1  ;;  %v2969_v25 = vrot.slane %v2968_v6, 1  ;;  %v2975_v13 = vmax.f32 %v2973_v32, %v2974_v20 }
 0x47d   : > { %v2876_v18 = vcombine.high %v2874_v5, %v2874_v5  ;;  %v2979_v62 = vrot.slane %v2978_v48, 4  ;;  %v2985_v54 = vsel %vm2893_vm0, %v2875_v43, -inf  ;;  %v2992_v42 = vsel %vm2893_vm0, %v2874_v5, -inf }
 0x47e   : > { %v2963_v57 = vmax.f32 %v2961_v3, %v2962_v63  ;;  %v2970_v58 = vmax.f32 %v2968_v6, %v2969_v25  ;;  %v3014_v7 = vpack.c.bf16 %v2956_v22, %v2956_v22  ;;  %v2986_v17 = vrot.slane %v2985_v54, 4 }
 0x47f   : > { %v2980_v46 = vmax.f32 %v2978_v48, %v2979_v62  ;;  %v2993_v56 = vrot.slane %v2992_v42, 4  ;;  %v2999_v35 = vsel %vm2893_vm0, %v2876_v18, -inf  ;;  %v9528_v16 = vpack.c.b16 %v3051_v4, %v3051_v4 }
 0x480   : > { %v3015_v47 = vpack.c.bf16 %v2963_v57, %v2963_v57  ;;  %v3016_v21 = vpack.c.bf16 %v2970_v58, %v2970_v58  ;;  %v3042_v11 = vunpack.c.l.b16 %v3014_v7  ;;  %v2987_v40 = vmax.f32 %v2985_v54, %v2986_v17 }
 0x481   : > { %v2981_v10 = vrot.slane %v2980_v46, 2  ;;  %v2994_v61 = vmax.f32 %v2992_v42, %v2993_v56  ;;  %v3000_v1 = vrot.slane %v2999_v35, 4  ;;  %v3080_v26 = vrot.slane %v3040_v23, 6  ;;  %3072 = vrot.lane.b32.xlu1 %v9528_v16, %s8239_s22 }
 0x482   : > { %v3043_v30 = vunpack.c.l.b16 %v3015_v47  ;;  %v2988_v59 = vrot.slane %v2987_v40, 2  ;;  %v3082_v52 = vrot.slane %v3041_v50, 5  ;;  %v3079_v29 = vsel %vm2134_vm12, %v3078_v38, %v9512_v34 }
 0x483   : > { %v2982_v39 = vmax.f32 %v2980_v46, %v2981_v10  ;;  %v2995_v19 = vrot.slane %v2994_v61, 2  ;;  %v3001_v51 = vmax.f32 %v2999_v35, %v3000_v1  ;;  %v3081_v24 = vsel %vm2136_vm13, %v3080_v26, %v3079_v29  ;;  %v8139_v29 = vld [vmem:[%s11202_s3 + $0x88] sm:$0xff]  }
 0x484   : > { %v2989_v36 = vmax.f32 %v2987_v40, %v2988_v59  ;;  %v3083_v9 = vsel %vm2138_vm14, %v3082_v52, %v3081_v24  ;;  %v2976_v14 = vrot.slane %v2975_v13, 1  ;;  %v3044_v2 = vunpack.c.l.b16 %v3016_v21  ;;  %v8142_v24 = vld [vmem:[%s11202_s3 + $0x70] sm:$0xff]  }
 0x485   : > { %v2983_v23 = vrot.slane %v2982_v39, 1  ;;  %v2996_v27 = vmax.f32 %v2994_v61, %v2995_v19  ;;  %v3002_v31 = vrot.slane %v3001_v51, 2  ;;  %v3096_v60 = vpack.c.b16 %v3083_v9, %v3083_v9 }
 0x486   : > { %v2990_v49 = vrot.slane %v2989_v36, 1  ;;  %v2977_v32 = vmax.f32 %v2975_v13, %v2976_v14  ;;  %v3052_v50 = vsel %vm2134_vm12, %v3043_v30, %v3042_v11  ;;  %v3084_v0 = vrot.slane %v3043_v30, 7  ;;  %v8144_v14 = vld [vmem:[%s11202_s3 + $0x80] sm:$0xff]  }
 0x487   : > { %v2984_v34 = vmax.f32 %v2982_v39, %v2983_v23  ;;  %v2997_v44 = vrot.slane %v2996_v27, 1  ;;  %v3003_v33 = vmax.f32 %v3001_v51, %v3002_v31  ;;  %3100 = vrot.lane.b32.xlu0 %v3096_v60, %s8242_s9  ;;  %v3086_v6 = vrot.slane %v3044_v2, 6  ;;  %v8141_v51 = vld [vmem:[%s11202_s3 + $0x38] sm:$0xff]   ;;  %v8143_v31 = vld [vmem:[%s11202_s3 + $0x30] sm:$0xff]   ;;  %v8145_v60 = vld [vmem:[%s11202_s3 + $0x68] sm:$0xff]  }
 0x488   : > { %v2991_v38 = vmax.f32 %v2989_v36, %v2990_v49  ;;  %v3017_v28 = vpack.c.bf16 %v2977_v32, %v2977_v32  ;;  %v3085_v3 = vsel %vm2134_vm12, %v3084_v0, %v3042_v11  ;;  %v3053_v43 = vsel %vm2136_vm13, %v3044_v2, %v3052_v50 }
 0x489   : > { %v2998_v20 = vmax.f32 %v2996_v27, %v2997_v44  ;;  %v3018_v5 = vpack.c.bf16 %v2984_v34, %v2984_v34  ;;  %v3004_v48 = vrot.slane %v3003_v33, 1  ;;  %v3087_v25 = vsel %vm2136_vm13, %v3086_v6, %v3085_v3 }
 0x48a   : > { %v3019_v4 = vpack.c.bf16 %v2991_v38, %v2991_v38  ;;  %v3045_v22 = vunpack.c.l.b16 %v3017_v28  ;;  %v3099_v52 = vpack.c.b16 %v9315_v53, %v9315_v53  ;;  %v8243_v39 = vmov 0.0   ;;  %v8140_v53 = vld [vmem:[%s11202_s3 + $0x78] sm:$0xff]   ;;  %v8147_v38 = vld [vmem:[%s11202_s3 + $0x60] sm:$0xff]  }
 0x48b   : > { %v3020_v63 = vpack.c.bf16 %v2998_v20, %v2998_v20  ;;  %v3005_v13 = vmax.f32 %v3003_v33, %v3004_v48  ;;  %v3062_v18 = vunpack.c.l.b16 %v3018_v5  ;;  %8045 = vmatprep.subr.bf16.mxu0 %v8243_v39  ;;  %7766 = vmatprep.subr.bf16.mxu1 %v8140_v53  ;;  %v8146_v33 = vld [vmem:[%s11202_s3 + $0x28] sm:$0xff]   ;;  %v8148_v20 = vld [vmem:[%s11202_s3 + $0x20] sm:$0xff]   ;;  %v8149_v48 = vld [vmem:[%s11202_s3 + $0x58] sm:$0xff]  }
 0x48c   : > { %v3063_v62 = vunpack.c.l.b16 %v3019_v4  ;;  %v3054_v54 = vsel %vm2138_vm14, %v3045_v22, %v3053_v43  ;;  %v3088_v42 = vrot.slane %v3045_v22, 5  ;;  %8046 = vmatpush3.bf16.msra.mxu0 %v8139_v29  ;;  %7767 = vmatpush3.bf16.msra.mxu1 %v8141_v51  ;;  %v8154_v29 = vld [vmem:[%s11202_s3 + $0x8] sm:$0xff]  }
 0x48d   : > { %v9542_v57 = vpack.c.b16 %v3054_v54, %v3054_v54  ;;  %v3021_v58 = vpack.c.bf16 %v3005_v13, %v3005_v13  ;;  %v3064_v7 = vunpack.c.l.b16 %v3020_v63  ;;  %8047 = vmatprep.subr.bf16.mxu0 %v8243_v39  ;;  %7768 = vmatprep.subr.bf16.mxu1 %v8142_v24  ;;  %v8151_v54 = vld [vmem:[%s11202_s3 + $0x50] sm:$0xff]   ;;  %v8156_v24 = vld [vmem:[%s11202_s3] sm:$0xff]  }
 0x48e   : > { %v3089_v17 = vsel %vm2138_vm14, %v3088_v42, %v3087_v25  ;;  %v3066_v46 = vsel %vm2134_vm12, %v3063_v62, %v3062_v18  ;;  %v3090_v56 = vrot.slane %v3063_v62, 7  ;;  %v8150_v62 = vld [vmem:[%s11202_s3 + $0x18] sm:$0xff]   ;;  %8049 = vmatprep.mubr.msk.bf16.mxu0 %vm8244_vm3, %v8243_v39  ;;  %v8155_v39 = vld [vmem:[%s11202_s3 + $0x40] sm:$0xff]  }
 0x48f   : > { %3074 = vrot.lane.b32.xlu0 %v9542_v57, %s8239_s22  ;;  %v3097_v35 = vpack.c.b16 %v3089_v17, %v3089_v17  ;;  %v3065_v47 = vunpack.c.l.b16 %v3021_v58  ;;  %v3067_v21 = vsel %vm2136_vm13, %v3064_v7, %v3066_v46  ;;  %v3092_v11 = vrot.slane %v3064_v7, 6 }
 0x490   : > { %v3091_v40 = vsel %vm2134_vm12, %v3090_v56, %v3062_v18  ;;  %vm3119_vm12 = vcmask 523264   ;;  %8048 = vmatpush3.bf16.msra.mxu0 %v8144_v14  ;;  %7769 = vmatpush3.bf16.msra.mxu1 %v8143_v31 }
 0x491   : > { %3102 = vrot.lane.b32.xlu1 %v3097_v35, %s8242_s9  ;;  %v3068_v10 = vsel %vm2138_vm14, %v3065_v47, %v3067_v21  ;;  %v3093_v61 = vsel %vm2136_vm13, %v3092_v11, %v3091_v40  ;;  %v3094_v1 = vrot.slane %v3065_v47, 5  ;;  %vm3172_vm13 = vcmask 1041408   ;;  %7770 = vmatprep.subr.bf16.mxu1 %v8145_v60 }
 0x492   : > { %v3069_v26 = vpack.c.b16 %v3068_v10, %v3068_v10 }
 0x493   : > { %v3095_v30 = vsel %vm2138_vm14, %v3094_v1, %v3093_v61  ;;  %vm3173_vm14 = vsmask.f32 1280  ;;  %v8152_v1 = vld [vmem:[%s11202_s3 + $0x10] sm:$0xff]  }
 0x494   : > { %v3098_v59 = vpack.c.b16 %v3095_v30, %v3095_v30  ;;  %vm9585_vm2 = vmand %vm3172_vm13, %vm3173_vm14  ;;  %7771 = vmatpush3.bf16.msra.mxu1 %v8146_v33 }
 0x495   : > { %3076 = vrot.lane.b32.xlu1 %v3069_v26, %s8239_s22  ;;  %7772 = vmatprep.subr.bf16.mxu1 %v8147_v38 }
 0x496   : > { %3104 = vrot.lane.b32.xlu0 %v3098_v59, %s8242_s9 }
 0x498   : > { %7773 = vmatpush3.bf16.msra.mxu1 %v8148_v20 }
 0x499   : > { %3106 = vrot.lane.b32.xlu1 %v3099_v52, %s8242_s9  ;;  %7774 = vmatprep.subr.bf16.mxu1 %v8149_v48 }
 0x49c   : > { %7775 = vmatpush3.bf16.msra.mxu1 %v8150_v62 }
 0x49d   : > { %7776 = vmatprep.subr.bf16.mxu1 %v8151_v54 }
 0x4a0   : > { %7777 = vmatpush3.bf16.msra.mxu1 %v8152_v1  ;;  %v8160_v1 = vld [vmem:[%s11203_s4 + $0x100] sm:$0xff]  }
 0x4c3   : > { %v3071_v19 = vpop.permute.xlu0 %3070 }
 0x4c4   : > { %v3109_v36 = vsel %vm2398_vm6, 0, %v3071_v19 }
 0x4f3   : > { %v3073_v0 = vpop.permute.xlu1 %3072 }
 0x4f4   : > { %v3112_v3 = vsel %vm2398_vm6, %v9494_v45, %v3073_v0 }
 0x4f9   : > { %v3101_v9 = vpop.permute.xlu0 %3100 }
 0x4fa   : > { %v3121_v2 = vsel %vm3119_vm12, %v3109_v36, %v3101_v9 }
 0x4fb   : > { %v3128_v23 = vshrl.u32 %v3121_v2, 16  ;;  %v3131_v27 = vshll.u32 %v3121_v2, 16  ;;  %3183 = vrot.lane.b32.xlu0 %v3121_v2, %s8241_s19 }
 0x4fd   : > { %v3130_v49 = vrot.slane %v3128_v23, 7  ;;  %v3160_v32 = vrot.slane %v3131_v27, 1 }
 0x4ff   : > { %v9589_v34 = vor.u32 %v3131_v27, %v3130_v49  ;;  %v3161_v44 = vor.u32 %v3160_v32, %v3128_v23 }
 0x501   : > { %v3175_v28 = vsel %vm9585_vm2, %v3161_v44, 0  ;;  %v3075_v5 = vpop.permute.xlu0 %3074  ;;  %v3156_v31 = vsel %vm8590_vm7, 0, %v9589_v34 }
 0x502   : > { %3195 = vrot.lane.b32.xlu0 %v3175_v28, %s8242_s9  ;;  %v3115_v25 = vsel %vm2398_vm6, %v9528_v16, %v3075_v5 }
 0x503   : > { %v3103_v6 = vpop.permute.xlu1 %3102 }
 0x504   : > { %v3123_v43 = vsel %vm3119_vm12, %v3112_v3, %v3103_v6 }
 0x505   : > { %v3134_v4 = vshrl.u32 %v3123_v43, 16  ;;  %v3137_v22 = vshll.u32 %v3123_v43, 16  ;;  %3185 = vrot.lane.b32.xlu1 %v3123_v43, %s8241_s19 }
 0x507   : > { %v3136_v63 = vrot.slane %v3134_v4, 7  ;;  %v3077_v45 = vpop.permute.xlu1 %3076  ;;  %v3162_v13 = vrot.slane %v3137_v22, 1 }
 0x508   : > { %v3105_v18 = vpop.permute.xlu0 %3104  ;;  %v3118_v16 = vsel %vm2398_vm6, %v9542_v57, %v3077_v45  ;;  %v8153_v57 = vld [vmem:[%s11202_s3 + $0x48] sm:$0xff]  }
 0x509   : > { %v3139_v42 = vor.u32 %v3137_v22, %v3136_v63  ;;  %v3125_v58 = vsel %vm3119_vm12, %v3115_v25, %v3105_v18  ;;  %v3163_v21 = vor.u32 %v3162_v13, %v3134_v4  ;;  %7778 = vmatprep.subr.bf16.mxu1 %v8153_v57 }
 0x50a   : > { %v3140_v7 = vshrl.u32 %v3125_v58, 16  ;;  %v3143_v17 = vshll.u32 %v3125_v58, 16  ;;  %3187 = vrot.lane.b32.xlu0 %v3125_v58, %s8241_s19  ;;  %7779 = vmatpush3.bf16.msra.mxu1 %v8154_v29 }
 0x50b   : > { %v3107_v46 = vpop.permute.xlu1 %3106  ;;  %v3176_v59 = vsel %vm9585_vm2, %v3163_v21, 0  ;;  %7780 = vmatprep.subr.bf16.mxu1 %v8155_v39  ;;  %v3157_v32 = vsel %vm8590_vm7, 0, %v3139_v42 }
 0x50c   : > { %v3142_v56 = vrot.slane %v3140_v7, 7  ;;  %v3164_v35 = vrot.slane %v3143_v17, 1  ;;  %v3127_v47 = vsel %vm3119_vm12, %v3118_v16, %v3107_v46 }
 0x50d   : > { %v3146_v11 = vshrl.u32 %v3127_v47, 16  ;;  %v3149_v40 = vshll.u32 %v3127_v47, 16  ;;  %3189 = vrot.lane.b32.xlu1 %v3127_v47, %s8241_s19 }
 0x50e   : > { %v3145_v10 = vor.u32 %v3143_v17, %v3142_v56  ;;  %v3165_v61 = vor.u32 %v3164_v35, %v3140_v7  ;;  %7781 = vmatpush3.bf16.msra.mxu1 %v8156_v24 }
 0x50f   : > { %v3148_v26 = vrot.slane %v3146_v11, 7  ;;  %v3166_v30 = vrot.slane %v3149_v40, 1 }
 0x510   : > { %v3177_v52 = vsel %vm9585_vm2, %v3165_v61, 0  ;;  %v3158_v3 = vsel %vm8590_vm7, 0, %v3145_v10  ;;  %v8158_v10 = vld [vmem:[%s11203_s4 + $0x110] sm:$0xff]   ;;  %v8159_v61 = vld [vmem:[%s11203_s4 + $0x108] sm:$0xff]  }
 0x511   : > { %v3151_v19 = vor.u32 %v3149_v40, %v3148_v26  ;;  %3197 = vrot.lane.b32.xlu1 %v3176_v59, %s8242_s9  ;;  %3199 = vrot.lane.b32.xlu0 %v3177_v52, %s8242_s9  ;;  %v3167_v53 = vor.u32 %v3166_v30, %v3146_v11  ;;  %v8157_v40 = vld [vmem:[%s11203_s4 + $0x118] sm:$0xff]   ;;  %v3333_v26 = vsub.s32 2, %v11260_v8  ;;  %v8245_v59 = vmov 1966171168  }
 0x512   : > { %8053 = vmatprep.subr.bf16.mxu1 %v8157_v40  ;;  %v3572_v52 = vunpack.c.l.s4 %v8245_v59 }
 0x513   : > { %v3178_v51 = vsel %vm9585_vm2, %v3167_v53, 0  ;;  %v3159_v5 = vsel %vm8590_vm7, 0, %v3151_v19  ;;  %v3334_v53 = vrot.slane %v9478_v12, %v3333_v26 }
 0x515   : > { %3201 = vrot.lane.b32.xlu1 %v3178_v51, %s8242_s9 }
 0x56d   : > { %v3184_v36 = vpop.permute.xlu0 %3183 }
 0x56e   : > { %v3205_v60 = vsel %vm2587_vm15, %v3156_v31, %v3184_v36 }
 0x574   : > { %v3196_v9 = vpop.permute.xlu0 %3195 }
 0x575   : > { %v3216_v27 = vsel %vm3119_vm12, %v3184_v36, %v3196_v9  ;;  %v3245_v6 = vrot.slane %v3196_v9, %v8704_v55  ;;  %v3573_v36 = vunpack.c.0.s8 %v3572_v52 }
 0x576   : > { %v3231_v49 = vcombine.low %v3205_v60, %v3216_v27 }
 0x577   : > { %v3186_v14 = vpop.permute.xlu1 %3185  ;;  %v9694_v27 = vsub.s32 %v3573_v36, %v11260_v8 }
 0x578   : > { %v3208_v44 = vsel %vm2587_vm15, %v3157_v32, %v3186_v14  ;;  %v3238_v43 = vrot.slane %v3231_v49, %v8704_v55 }
 0x57c   : > { %v3188_v2 = vpop.permute.xlu0 %3187 }
 0x57d   : > { %v3211_v20 = vsel %vm2587_vm15, %v3158_v3, %v3188_v2 }
 0x57f   : > { %v3190_v23 = vpop.permute.xlu1 %3189 }
 0x580   : > { %v3214_v48 = vsel %vm2587_vm15, %v3159_v5, %v3190_v23 }
 0x583   : > { %v3198_v50 = vpop.permute.xlu1 %3197  ;;  %v3200_v0 = vpop.permute.xlu0 %3199 }
 0x584   : > { %v3218_v33 = vsel %vm3119_vm12, %v3186_v14, %v3198_v50  ;;  %v3261_v38 = vrot.slane %v3198_v50, %v8704_v55  ;;  %v3220_v28 = vsel %vm3119_vm12, %v3188_v2, %v3200_v0  ;;  %v3277_v25 = vrot.slane %v3200_v0, %v8704_v55 }
 0x585   : > { %v3247_v34 = vcombine.low %v3208_v44, %v3218_v33  ;;  %v3263_v22 = vcombine.low %v3211_v20, %v3220_v28 }
 0x586   : > { %v7603_v45 = vcombine.low %v3245_v6, %v3261_v38 }
 0x587   : > { %v3254_v4 = vrot.slane %v3247_v34, %v8704_v55  ;;  %v3202_v63 = vpop.permute.xlu1 %3201  ;;  %v3270_v58 = vrot.slane %v3263_v22, %v8704_v55  ;;  %v11263_v22 = vld [vmem:[#allocation5_spill] sm:$0xff] }
 0x588   : > { %v3222_v13 = vsel %vm3119_vm12, %v3190_v23, %v3202_v63  ;;  %v3293_v18 = vrot.slane %v3202_v63, %v8704_v55  ;;  %v3352_v17 = vrot.slane %v7603_v45, %v8704_v55 }
 0x589   : > { %v3279_v62 = vcombine.low %v3214_v48, %v3222_v13  ;;  %v7602_v54 = vcombine.low %v3238_v43, %v3254_v4 }
 0x58a   : > { %v7605_v42 = vcombine.low %v3277_v25, %v3293_v18 }
 0x58b   : > { %v3286_v7 = vrot.slane %v3279_v62, %v8704_v55  ;;  %v3345_v35 = vrot.slane %v7602_v54, %v8704_v55 }
 0x58c   : > { %v3366_v16 = vrot.slane %v7605_v42, %v8704_v55 }
 0x58d   : > { %v7604_v46 = vcombine.low %v3270_v58, %v3286_v7 }
 0x58e   : > { %v3369_v56 = vcombine.low %v3352_v17, %v3366_v16 }
 0x58f   : > { %v3359_v47 = vrot.slane %v7604_v46, %v8704_v55 }
 0x590   : > { %8050 = vmatmul.mubr.msk.bf16.vlgmr.msra.gmra.mxu0 %vm2398_vm6, %v3369_v56 }
 0x591   : > { %v3367_v21 = vcombine.low %v3345_v35, %v3359_v47  ;;  %v3368_v11 = vcombine.high %v3345_v35, %v3359_v47 }
 0x593   : > { %3515 = vmatprep.mubr.bf16.mxu1 %v3368_v11 }
 0x594   : > { %3516 = vmatmul.mubr.bf16.vlgmr.msra.gmra.mxu1 %v3367_v21 }
 0x595   : > { %8054 = vmatpush3.bf16.msra.mxu1 %v8157_v40 }
 0x596   : > { %8055 = vmatprep.subr.bf16.mxu1 %v8158_v10 }
 0x599   : > { %8056 = vmatpush3.bf16.msra.mxu1 %v8158_v10 }
 0x59a   : > { %8057 = vmatprep.subr.bf16.mxu1 %v8159_v61 }
 0x59d   : > { %8058 = vmatpush3.bf16.msra.mxu1 %v8159_v61 }
 0x59e   : > { %8059 = vmatprep.subr.bf16.mxu1 %v8160_v1 }
 0x5a1   : > { %8060 = vmatpush3.bf16.msra.mxu1 %v8160_v1 }
 0x650   : > { %v3558_v57 = vpop.f32.mrf.mxu0 }
 0x652   : > { %v8051_v30 = vpop.f32.mrf.mxu0 }
 0x654   : > { %v7782_v29 = vpop.f32.mrf.mxu1  ;;  %v3561_v19 = vpop.f32.mrf.mxu0 }
 0x656   : > { %v7783_v39 = vpop.f32.mrf.mxu1  ;;  %v8052_v51 = vpop.f32.mrf.mxu0 }
 0x657   : > { %v7784_v24 = vadd.f32 %v7783_v39, %v7782_v29 }
 0x658   : > { %v7785_v9 = vpop.f32.mrf.mxu1 }
 0x659   : > { %v3518_v14 = vadd.f32 %v7784_v24, %v3334_v53 }
 0x65a   : > { %v7786_v2 = vpop.f32.mrf.mxu1 }
 0x65b   : > { %v3559_v23 = vadd.f32 %v3558_v57, %v3518_v14  ;;  %v7787_v31 = vadd.f32 %v7786_v2, %v7785_v9 }
 0x65d   : > { %v3565_v60 = vmax.f32 %v3559_v23, 0.0  ;;  %v3521_v49 = vadd.f32 %v7787_v31, %v3334_v53 }
 0x65f   : > { %v3569_v32 = vcombine.high %v3565_v60, %v3565_v60  ;;  %v3577_v50 = vrot.slane %v3565_v60, %v9694_v27  ;;  %v3562_v0 = vadd.f32 %v3561_v19, %v3521_v49 }
 0x661   : > { %v3578_v44 = vcombine.high %v3577_v50, %v3577_v50  ;;  %v3585_v12 = vrot.slane %v3577_v50, %v9694_v27  ;;  %v3601_v33 = vrot.slane %v3569_v32, %v9694_v27  ;;  %v3566_v38 = vmax.f32 %v3562_v0, 0.0 }
 0x663   : > { %v3592_v28 = vrot.slane %v3578_v44, %v9694_v27  ;;  %v3593_v3 = vcombine.high %v3585_v12, %v3585_v12  ;;  %v3602_v34 = vcombine.high %v3601_v33, %v3601_v33  ;;  %v3609_v6 = vrot.slane %v3601_v33, %v9694_v27 }
 0x664   : > { %v3570_v20 = vcombine.high %v3566_v38, %v3566_v38  ;;  %v3625_v5 = vrot.slane %v3566_v38, %v9694_v27  ;;  %v3670_v45 = vrot.slane %v3585_v12, %v11263_v22 }
 0x665   : > { %v3594_v43 = vcombine.high %v3592_v28, %v3592_v28  ;;  %v3616_v48 = vrot.slane %v3602_v34, %v9694_v27  ;;  %v3617_v4 = vcombine.high %v3609_v6, %v3609_v6  ;;  %v3674_v63 = vrot.slane %v3592_v28, %v11263_v22 }
 0x666   : > { %v3678_v25 = vrot.slane %v3593_v3, %v11263_v22  ;;  %v3626_v13 = vcombine.high %v3625_v5, %v3625_v5  ;;  %v3633_v18 = vrot.slane %v3625_v5, %v9694_v27  ;;  %v3686_v42 = vrot.slane %v3609_v6, %v11263_v22 }
 0x667   : > { %v3618_v62 = vcombine.high %v3616_v48, %v3616_v48  ;;  %v3682_v54 = vrot.slane %v3594_v43, %v11263_v22  ;;  %v3690_v58 = vrot.slane %v3616_v48, %v11263_v22  ;;  %v3731_v7 = vcombine.low %v3670_v45, %v3674_v63  ;;  %v8161_v45 = vld [vmem:[%s11203_s4 + $0x78] sm:$0xff]  }
 0x668   : > { %v3640_v17 = vrot.slane %v3626_v13, %v9694_v27  ;;  %v3641_v16 = vcombine.high %v3633_v18, %v3633_v18  ;;  %v3649_v46 = vrot.slane %v3570_v20, %v9694_v27  ;;  %v3694_v56 = vrot.slane %v3617_v4, %v11263_v22  ;;  %7791 = vmatprep.subr.bf16.mxu0 %v8161_v45 }
 0x669   : > { %v3698_v35 = vrot.slane %v3618_v62, %v11263_v22  ;;  %v3732_v47 = vcombine.low %v3678_v25, %v3682_v54  ;;  %v3748_v21 = vcombine.low %v3686_v42, %v3690_v58  ;;  %v3702_v1 = vrot.slane %v3633_v18, %v11263_v22  ;;  %v8162_v25 = vld [vmem:[%s11203_s4 + $0x38] sm:$0xff]  }
 0x66a   : > { %v3642_v11 = vcombine.high %v3640_v17, %v3640_v17  ;;  %v3650_v40 = vcombine.high %v3649_v46, %v3649_v46  ;;  %v3657_v10 = vrot.slane %v3649_v46, %v9694_v27  ;;  %v3706_v61 = vrot.slane %v3640_v17, %v11263_v22  ;;  %7792 = vmatpush3.bf16.msra.mxu0 %v8162_v25 }
 0x66b   : > { %v3739_v57 = vrot.slane %v3731_v7, %v8704_v55  ;;  %v3746_v26 = vrot.slane %v3732_v47, %v8704_v55  ;;  %v3749_v30 = vcombine.low %v3694_v56, %v3698_v35  ;;  %v3710_v29 = vrot.slane %v3641_v16, %v11263_v22 }
 0x66c   : > { %v3664_v59 = vrot.slane %v3650_v40, %v9694_v27  ;;  %v3665_v52 = vcombine.high %v3657_v10, %v3657_v10  ;;  %v3714_v19 = vrot.slane %v3642_v11, %v11263_v22  ;;  %v3765_v53 = vcombine.low %v3702_v1, %v3706_v61 }
 0x66d   : > { %v3747_v39 = vcombine.low %v3739_v57, %v3746_v26  ;;  %v3756_v51 = vrot.slane %v3748_v21, %v8704_v55  ;;  %v3763_v24 = vrot.slane %v3749_v30, %v8704_v55  ;;  %v3718_v9 = vrot.slane %v3657_v10, %v11263_v22 }
 0x66e   : > { %v3666_v36 = vcombine.high %v3664_v59, %v3664_v59  ;;  %v3766_v14 = vcombine.low %v3710_v29, %v3714_v19  ;;  %v3722_v2 = vrot.slane %v3664_v59, %v11263_v22  ;;  %v3726_v60 = vrot.slane %v3665_v52, %v11263_v22 }
 0x66f   : > { %v9726_v23 = vpack.c.bf16 %v3747_v39, %v3747_v39  ;;  %v3764_v31 = vcombine.low %v3756_v51, %v3763_v24  ;;  %v3773_v49 = vrot.slane %v3765_v53, %v8704_v55  ;;  %v3963_v59 = vrot.slane %v11254_v15, 1  ;;  %v8163_v51 = vld [vmem:[%s11203_s4 + $0x70] sm:$0xff]  }
 0x670   : > { %v3780_v32 = vrot.slane %v3766_v14, %v8704_v55  ;;  %v3730_v50 = vrot.slane %v3666_v36, %v11263_v22  ;;  %v3782_v0 = vcombine.low %v3718_v9, %v3722_v2  ;;  %v8164_v24 = vld [vmem:[%s11203_s4 + $0x30] sm:$0xff]   ;;  %7793 = vmatprep.subr.bf16.mxu0 %v8163_v51  ;;  %v8165_v36 = vld [vmem:[%s11203_s4 + $0x68] sm:$0xff]   ;;  %v8167_v14 = vld [vmem:[%s11203_s4 + $0x60] sm:$0xff]  }
 0x671   : > { %3811 = vrot.lane.b32.xlu0 %v9726_v23, %s8242_s9  ;;  %v9734_v44 = vpack.c.bf16 %v3764_v31, %v3764_v31  ;;  %v3841_v12 = vshrl.u32 %v9726_v23, 16  ;;  %v3844_v33 = vshll.u32 %v9726_v23, 16  ;;  %v3990_v53 = vsel %vm9357_vm10, %v3963_v59, 0  ;;  %7794 = vmatpush3.bf16.msra.mxu0 %v8164_v24  ;;  %v8166_v9 = vld [vmem:[%s11203_s4 + $0x28] sm:$0xff]   ;;  %v8168_v2 = vld [vmem:[%s11203_s4 + $0x20] sm:$0xff]   ;;  %v8169_v31 = vld [vmem:[%s11203_s4 + $0x58] sm:$0xff]  }
 0x672   : > { %v3781_v38 = vcombine.low %v3773_v49, %v3780_v32  ;;  %v3783_v28 = vcombine.low %v3726_v60, %v3730_v50  ;;  %v3790_v43 = vrot.slane %v3782_v0, %v8704_v55  ;;  %7795 = vmatprep.subr.bf16.mxu0 %v8165_v36  ;;  %v8170_v60 = vld [vmem:[%s11203_s4 + $0x18] sm:$0xff]   ;;  %v8171_v49 = vld [vmem:[%s11203_s4 + $0x50] sm:$0xff]   ;;  %v8173_v50 = vld [vmem:[%s11203_s4 + $0x48] sm:$0xff]  }
 0x673   : > { %3813 = vrot.lane.b32.xlu1 %v9734_v44, %s8242_s9  ;;  %v3853_v3 = vshrl.u32 %v9734_v44, 16  ;;  %v3856_v34 = vshll.u32 %v9734_v44, 16  ;;  %v3941_v6 = vrot.slane %v3844_v33, 1  ;;  %v3843_v20 = vrot.slane %v3841_v12, 7  ;;  %v8172_v32 = vld [vmem:[%s11203_s4 + $0x10] sm:$0xff]   ;;  %v8174_v0 = vld [vmem:[%s11203_s4 + $0x8] sm:$0xff]  }
 0x674   : > { %v9742_v5 = vpack.c.bf16 %v3781_v38, %v3781_v38  ;;  %v3797_v48 = vrot.slane %v3783_v28, %v8704_v55  ;;  %v8177_v38 = vld [vmem:[%s11203_s4 + $0xf8] sm:$0xff]  }
 0x675   : > { %v3942_v4 = vor.u32 %v3941_v6, %v3841_v12  ;;  %v3945_v63 = vrot.slane %v3856_v34, 1  ;;  %v9752_v13 = vor.u32 %v3844_v33, %v3843_v20  ;;  %v3855_v18 = vrot.slane %v3853_v3, 7  ;;  %7796 = vmatpush3.bf16.msra.mxu0 %v8166_v9  ;;  %v8175_v12 = vld [vmem:[%s11203_s4 + $0x40] sm:$0xff]  }
 0x676   : > { %3815 = vrot.lane.b32.xlu0 %v9742_v5, %s8242_s9  ;;  %v3798_v62 = vcombine.low %v3790_v43, %v3797_v48  ;;  %v3871_v54 = vshrl.u32 %v9742_v5, 16  ;;  %v3874_v42 = vshll.u32 %v9742_v5, 16  ;;  %7797 = vmatprep.subr.bf16.mxu0 %v8167_v14  ;;  %v8176_v33 = vld [vmem:[%s11203_s4] sm:$0xff]  }
 0x677   : > { %v3946_v58 = vor.u32 %v3945_v63, %v3853_v3  ;;  %v9758_v7 = vor.u32 %v3856_v34, %v3855_v18  ;;  %v3979_v56 = vsel %vm9357_vm10, %v3942_v4, 0 }
 0x678   : > { %v9760_v17 = vpack.c.bf16 %v3798_v62, %v3798_v62  ;;  %v3951_v16 = vrot.slane %v3874_v42, 1  ;;  %v3873_v46 = vrot.slane %v3871_v54, 7 }
 0x679   : > { %v3981_v35 = vsel %vm9357_vm10, %v3946_v58, 0  ;;  %7798 = vmatpush3.bf16.msra.mxu0 %v8168_v2 }
 0x67a   : > { %3817 = vrot.lane.b32.xlu1 %v9760_v17, %s8242_s9  ;;  %v3952_v47 = vor.u32 %v3951_v16, %v3871_v54  ;;  %v7629_v21 = vcombine.low %v3979_v56, %v3981_v35  ;;  %v3889_v11 = vshrl.u32 %v9760_v17, 16  ;;  %v3892_v40 = vshll.u32 %v9760_v17, 16  ;;  %7799 = vmatprep.subr.bf16.mxu0 %v8169_v31 }
 0x67b   : > { %v9770_v10 = vor.u32 %v3874_v42, %v3873_v46 }
 0x67c   : > { %v3984_v61 = vsel %vm9357_vm10, %v3952_v47, 0  ;;  %8061 = vmatprep.mubr.msk.bf16.mxu1 %vm3119_vm12, %v7629_v21  ;;  %v3957_v1 = vrot.slane %v3892_v40, 1  ;;  %v3891_v57 = vrot.slane %v3889_v11, 7 }
 0x67d   : > { %v7634_v26 = vcombine.low %v3981_v35, %v3984_v61  ;;  %7800 = vmatpush3.bf16.msra.mxu0 %v8170_v60 }
 0x67e   : > { %v3958_v30 = vor.u32 %v3957_v1, %v3889_v11  ;;  %v9776_v52 = vor.u32 %v3892_v40, %v3891_v57  ;;  %7801 = vmatprep.subr.bf16.mxu0 %v8171_v49 }
 0x67f   : > { %8062 = vmatmul.mubr.msk.bf16.vlgmr.msra.gmra.mxu1 %vm3119_vm12, %v7634_v26 }
 0x680   : > { %v3987_v29 = vsel %vm9357_vm10, %v3958_v30, 0 }
 0x681   : > { %v7639_v19 = vcombine.low %v3984_v61, %v3987_v29  ;;  %v7644_v39 = vcombine.low %v3987_v29, %v3990_v53  ;;  %7802 = vmatpush3.bf16.msra.mxu0 %v8172_v32 }
 0x682   : > { %7803 = vmatprep.subr.bf16.mxu0 %v8173_v50 }
 0x683   : > { %8065 = vmatprep.mubr.msk.bf16.mxu1 %vm3119_vm12, %v7639_v19 }
 0x685   : > { %7804 = vmatpush3.bf16.msra.mxu0 %v8174_v0 }
 0x686   : > { %7805 = vmatprep.subr.bf16.mxu0 %v8175_v12 }
 0x687   : > { %8066 = vmatmul.mubr.msk.bf16.gmra.mxu1 %vm3119_vm12, %v7644_v39 }
 0x689   : > { %7806 = vmatpush3.bf16.msra.mxu0 %v8176_v33 }
 0x68a   : > { %7831 = vmatprep.subr.bf16.mxu0 %v8177_v38 }
 0x6e3   : > { %v9830_v28 = vpop.permute.xlu0 %3811 }
 0x6e4   : > { %v9834_v3 = vsel %vm3119_vm12, 0, %v9830_v28  ;;  %v9839_v34 = vsel %vm3119_vm12, %v9726_v23, %v9830_v28 }
 0x6e5   : > { %v9841_v6 = vpop.permute.xlu1 %3813  ;;  %v3835_v20 = vshrl.u32 %v9834_v3, 16  ;;  %v3838_v43 = vshll.u32 %v9834_v3, 16  ;;  %3999 = vrot.lane.b32.xlu0 %v9834_v3, %s8242_s9  ;;  %v3847_v48 = vshrl.u32 %v9839_v34, 16  ;;  %v3850_v4 = vshll.u32 %v9839_v34, 16  ;;  %4001 = vrot.lane.b32.xlu1 %v9839_v34, %s8242_s9 }
 0x6e6   : > { %v3824_v63 = vsel %vm3119_vm12, %v9726_v23, %v9841_v6  ;;  %v9857_v45 = vsel %vm3119_vm12, %v9734_v44, %v9841_v6 }
 0x6e7   : > { %v3837_v25 = vrot.slane %v3835_v20, 7  ;;  %v3939_v18 = vrot.slane %v3838_v43, 1  ;;  %v3849_v62 = vrot.slane %v3847_v48, 7  ;;  %v3859_v42 = vshrl.u32 %v3824_v63, 16 }
 0x6e8   : > { %v9859_v54 = vpop.permute.xlu0 %3815  ;;  %v3862_v58 = vshll.u32 %v3824_v63, 16  ;;  %v3865_v16 = vshrl.u32 %v9857_v45, 16  ;;  %v3868_v46 = vshll.u32 %v9857_v45, 16  ;;  %v3943_v47 = vrot.slane %v3850_v4, 1 }
 0x6e9   : > { %v3840_v56 = vor.u32 %v3838_v43, %v3837_v25  ;;  %v3852_v35 = vor.u32 %v3850_v4, %v3849_v62  ;;  %4003 = vrot.lane.b32.xlu0 %v3824_v63, %s8242_s9  ;;  %4005 = vrot.lane.b32.xlu1 %v9857_v45, %s8242_s9  ;;  %v3828_v23 = vsel %vm3119_vm12, %v9734_v44, %v9859_v54  ;;  %v3861_v21 = vrot.slane %v3859_v42, 7 }
 0x6ea   : > { %v3947_v11 = vrot.slane %v3862_v58, 1  ;;  %v3867_v40 = vrot.slane %v3865_v16, 7  ;;  %v3949_v61 = vrot.slane %v3868_v46, 1  ;;  %v3877_v1 = vshrl.u32 %v3828_v23, 16 }
 0x6eb   : > { %v3880_v57 = vshll.u32 %v3828_v23, 16  ;;  %v3830_v26 = vsel %vm3119_vm12, %v9742_v5, %v9859_v54  ;;  %v3926_v30 = vsel %vm8590_vm7, 0, %v3840_v56  ;;  %v3928_v44 = vsel %vm8590_vm7, 0, %v3852_v35 }
 0x6ec   : > { %v9874_v59 = vpop.permute.xlu1 %3817  ;;  %v3883_v29 = vshrl.u32 %v3830_v26, 16  ;;  %v3886_v19 = vshll.u32 %v3830_v26, 16  ;;  %v3864_v53 = vor.u32 %v3862_v58, %v3861_v21  ;;  %v3879_v39 = vrot.slane %v3877_v1, 7 }
 0x6ed   : > { %4007 = vrot.lane.b32.xlu0 %v3828_v23, %s8242_s9  ;;  %v3953_v51 = vrot.slane %v3880_v57, 1  ;;  %4009 = vrot.lane.b32.xlu1 %v3830_v26, %s8242_s9  ;;  %v3834_v24 = vsel %vm3119_vm12, %v9760_v17, %v9874_v59  ;;  %v3832_v36 = vsel %vm3119_vm12, %v9742_v5, %v9874_v59  ;;  %v7625_v32 = vcombine.low %v3926_v30, %v3928_v44 }
 0x6ee   : > { %v3885_v9 = vrot.slane %v3883_v29, 7  ;;  %v3955_v14 = vrot.slane %v3886_v19, 1  ;;  %v3901_v2 = vshrl.u32 %v3834_v24, 16  ;;  %v3904_v31 = vshll.u32 %v3834_v24, 16 }
 0x6ef   : > { %v3895_v60 = vshrl.u32 %v3832_v36, 16  ;;  %v3898_v49 = vshll.u32 %v3832_v36, 16  ;;  %v3870_v50 = vor.u32 %v3868_v46, %v3867_v40  ;;  %v3930_v33 = vsel %vm8590_vm7, 0, %v3864_v53 }
 0x6f0   : > { %v3903_v0 = vrot.slane %v3901_v2, 7  ;;  %v3961_v12 = vrot.slane %v3904_v31, 1  ;;  %v3882_v38 = vor.u32 %v3880_v57, %v3879_v39  ;;  %v3888_v34 = vor.u32 %v3886_v19, %v3885_v9 }
 0x6f1   : > { %4013 = vrot.lane.b32.xlu1 %v3834_v24, %s8242_s9  ;;  %4011 = vrot.lane.b32.xlu0 %v3832_v36, %s8242_s9  ;;  %v3897_v17 = vrot.slane %v3895_v60, 7  ;;  %v3959_v5 = vrot.slane %v3898_v49, 1  ;;  %v3931_v3 = vsel %vm8590_vm7, 0, %v3870_v50  ;;  %v3940_v45 = vor.u32 %v3939_v18, %v3835_v20 }
 0x6f2   : > { %v7630_v43 = vcombine.low %v3930_v33, %v3931_v3  ;;  %v3933_v4 = vsel %vm8590_vm7, 0, %v3882_v38  ;;  %v3906_v63 = vor.u32 %v3904_v31, %v3903_v0  ;;  %v3934_v25 = vsel %vm8590_vm7, 0, %v3888_v34  ;;  %v8181_v33 = vld [vmem:[%s11203_s4 + $0xe8] sm:$0xff]  }
 0x6f3   : > { %v3900_v62 = vor.u32 %v3898_v49, %v3897_v17  ;;  %v3944_v58 = vor.u32 %v3943_v47, %v3847_v48  ;;  %v3948_v46 = vor.u32 %v3947_v11, %v3859_v42  ;;  %v9896_v56 = vcombine.low %v3933_v4, %v3934_v25  ;;  %v8182_v34 = vld [vmem:[%s11203_s4 + $0xa8] sm:$0xff]  }
 0x6f4   : > { %v3937_v35 = vsel %vm8590_vm7, 0, %v3906_v63  ;;  %v3978_v23 = vsel %vm9357_vm10, %v3940_v45, 0  ;;  %v3950_v21 = vor.u32 %v3949_v61, %v3865_v16  ;;  %v3954_v42 = vor.u32 %v3953_v51, %v3877_v1  ;;  %v8183_v63 = vld [vmem:[%s11203_s4 + $0xe0] sm:$0xff]  }
 0x6f5   : > { %4015 = vrot.lane.b32.xlu0 %v11254_v15, %s8242_s9  ;;  %v3936_v20 = vsel %vm8590_vm7, 0, %v3900_v62  ;;  %v3980_v18 = vsel %vm9357_vm10, %v3944_v58, 0  ;;  %v3982_v48 = vsel %vm9357_vm10, %v3948_v46, 0  ;;  %v3956_v40 = vor.u32 %v3955_v14, %v3883_v29  ;;  %v8184_v62 = vld [vmem:[%s11203_s4 + $0xa0] sm:$0xff]   ;;  %v8185_v58 = vld [vmem:[%s11203_s4 + $0xd8] sm:$0xff]  }
 0x6f6   : > { %v9910_v47 = vcombine.low %v3936_v20, %v3937_v35  ;;  %v9912_v11 = vcombine.low %v3978_v23, %v3980_v18  ;;  %v3983_v16 = vsel %vm9357_vm10, %v3950_v21, 0  ;;  %v3985_v57 = vsel %vm9357_vm10, %v3954_v42, 0  ;;  %v8186_v35 = vld [vmem:[%s11203_s4 + $0x98] sm:$0xff]   ;;  %v8187_v23 = vld [vmem:[%s11203_s4 + $0xd0] sm:$0xff]   ;;  %v8189_v18 = vld [vmem:[%s11203_s4 + $0xc8] sm:$0xff]  }
 0x6f7   : > { %v9916_v61 = vcombine.low %v3982_v48, %v3983_v16  ;;  %v3960_v26 = vor.u32 %v3959_v5, %v3895_v60  ;;  %v3962_v30 = vor.u32 %v3961_v12, %v3901_v2  ;;  %v3986_v19 = vsel %vm9357_vm10, %v3956_v40, 0  ;;  %v8178_v2 = vld [vmem:[%s11203_s4 + $0xb8] sm:$0xff]   ;;  %v8180_v12 = vld [vmem:[%s11203_s4 + $0xb0] sm:$0xff]   ;;  %v8190_v48 = vld [vmem:[%s11203_s4 + $0x88] sm:$0xff]  }
 0x6f8   : > { %v9922_v44 = vcombine.low %v3985_v57, %v3986_v19  ;;  %v3927_v29 = vsel %vm8590_vm7, 0, %v9752_v13  ;;  %v3929_v24 = vsel %vm8590_vm7, 0, %v9758_v7  ;;  %v8179_v13 = vld [vmem:[%s11203_s4 + $0xf0] sm:$0xff]   ;;  %v3932_v7 = vsel %vm8590_vm7, 0, %v9770_v10  ;;  %v8192_v42 = vld [vmem:[%s11203_s4 + $0x80] sm:$0xff]  }
 0x6f9   : > { %v3988_v1 = vsel %vm9357_vm10, %v3960_v26, 0  ;;  %v3989_v53 = vsel %vm9357_vm10, %v3962_v30, 0  ;;  %v3935_v17 = vsel %vm8590_vm7, 0, %v9776_v52  ;;  %v3909_v3 = vrot.slane %v11254_v15, 7  ;;  %v8188_v20 = vld [vmem:[%s11203_s4 + $0x90] sm:$0xff]  }
 0x6fa   : > { %v9928_v39 = vcombine.low %v3988_v1, %v3989_v53 }
 0x6fb   : > { %v3938_v52 = vsel %vm8590_vm7, 0, %v3909_v3 }
 0x757   : > { %v9933_v51 = vpop.permute.xlu0 %3999  ;;  %v9938_v36 = vpop.permute.xlu1 %4001 }
 0x758   : > { %v4028_v9 = vsel %vm3119_vm12, %v3927_v29, %v9933_v51  ;;  %v4031_v37 = vsel %vm3119_vm12, %v3929_v24, %v9938_v36  ;;  %v4018_v16 = vsel %vm3119_vm12, %v9933_v51, %v9830_v28  ;;  %v4019_v40 = vsel %vm3119_vm12, %v9938_v36, %v9841_v6 }
 0x759   : > { %v7626_v14 = vcombine.low %v4028_v9, %v4031_v37  ;;  %v7627_v57 = vcombine.low %v4018_v16, %v4019_v40 }
 0x75b   : > { %v4004_v31 = vpop.permute.xlu0 %4003  ;;  %4485 = vmatprep.mubr.bf16.mxu0 %v7626_v14  ;;  %v4006_v60 = vpop.permute.xlu1 %4005 }
 0x75c   : > { %v4033_v49 = vsel %vm3119_vm12, %v3929_v24, %v4004_v31  ;;  %v4036_v50 = vsel %vm3119_vm12, %v3932_v7, %v4006_v60  ;;  %4486 = vmatmul.mubr.bf16.vlgmr.msra.gmra.mxu0 %v7625_v32 }
 0x75d   : > { %7832 = vmatpush3.bf16.msra.mxu0 %v8178_v2  ;;  %v7631_v0 = vcombine.low %v4033_v49, %v4036_v50 }
 0x75e   : > { %7833 = vmatprep.subr.bf16.mxu0 %v8179_v13 }
 0x75f   : > { %v4008_v38 = vpop.permute.xlu0 %4007  ;;  %4493 = vmatprep.mubr.bf16.mxu0 %v7631_v0  ;;  %v4010_v10 = vpop.permute.xlu1 %4009 }
 0x760   : > { %v4038_v32 = vsel %vm3119_vm12, %v3932_v7, %v4008_v38  ;;  %v4041_v5 = vsel %vm3119_vm12, %v3935_v17, %v4010_v10  ;;  %v4022_v28 = vsel %vm3119_vm12, %v4008_v38, %v9859_v54  ;;  %v4023_v30 = vsel %vm3119_vm12, %v4010_v10, %v9874_v59 }
 0x761   : > { %7834 = vmatpush3.bf16.msra.mxu0 %v8180_v12  ;;  %v7636_v4 = vcombine.low %v4038_v32, %v4041_v5  ;;  %v7637_v19 = vcombine.low %v4022_v28, %v4023_v30 }
 0x762   : > { %7835 = vmatprep.subr.bf16.mxu0 %v8181_v33 }
 0x763   : > { %v4012_v45 = vpop.permute.xlu0 %4011  ;;  %v4014_v25 = vpop.permute.xlu1 %4013 }
 0x764   : > { %4494 = vmatmul.mubr.bf16.gmra.mxu0 %v7630_v43  ;;  %v4043_v46 = vsel %vm3119_vm12, %v3935_v17, %v4012_v45  ;;  %v4046_v43 = vsel %vm3119_vm12, %v3938_v52, %v4014_v25  ;;  %v8063_v52 = vpop.f32.mrf.mxu1 }
 0x765   : > { %7836 = vmatpush3.bf16.msra.mxu0 %v8182_v34  ;;  %4501 = vmatprep.mubr.bf16.mxu0 %v7636_v4  ;;  %v7641_v21 = vcombine.low %v4043_v46, %v4046_v43 }
 0x766   : > { %7837 = vmatprep.subr.bf16.mxu0 %v8183_v63  ;;  %v4617_v43 = vpop.f32.mrf.mxu1 }
 0x767   : > { %v10023_v1 = vpop.permute.xlu0 %4015 }
 0x769   : > { %7838 = vmatpush3.bf16.msra.mxu0 %v8184_v62 }
 0x76a   : > { %7839 = vmatprep.subr.bf16.mxu0 %v8185_v58 }
 0x76c   : > { %4502 = vmatmul.mubr.bf16.gmra.mxu0 %v9896_v56  ;;  %v8191_v56 = vld [vmem:[%s11203_s4 + $0xc0] sm:$0xff]  }
 0x76d   : > { %7840 = vmatpush3.bf16.msra.mxu0 %v8186_v35  ;;  %4509 = vmatprep.mubr.bf16.mxu0 %v7641_v21 }
 0x76e   : > { %7841 = vmatprep.subr.bf16.mxu0 %v8187_v23 }
 0x771   : > { %7842 = vmatpush3.bf16.msra.mxu0 %v8188_v20 }
 0x772   : > { %7843 = vmatprep.subr.bf16.mxu0 %v8189_v18  ;;  %v8064_v18 = vpop.f32.mrf.mxu1 }
 0x774   : > { %4510 = vmatmul.mubr.bf16.gmra.mxu0 %v9910_v47  ;;  %v4020_v47 = vsel %vm3119_vm12, %v4004_v31, %v9841_v6  ;;  %v4025_v6 = vsel %vm3119_vm12, %v4014_v25, %v10023_v1 }
 0x775   : > { %7844 = vmatpush3.bf16.msra.mxu0 %v8190_v48  ;;  %4550 = vmatprep.mubr.bf16.mxu0 %v9912_v11  ;;  %v4021_v11 = vsel %vm3119_vm12, %v4006_v60, %v9859_v54 }
 0x776   : > { %7845 = vmatprep.subr.bf16.mxu0 %v8191_v56  ;;  %v7632_v26 = vcombine.low %v4020_v47, %v4021_v11 }
 0x779   : > { %7846 = vmatpush3.bf16.msra.mxu0 %v8192_v42 }
 0x77c   : > { %4551 = vmatmul.mubr.bf16.vlgmr.msra.gmra.mxu0 %v7627_v57  ;;  %v4620_v57 = vpop.f32.mrf.mxu1 }
 0x77d   : > { %4558 = vmatprep.mubr.bf16.mxu0 %v9916_v61  ;;  %v4024_v61 = vsel %vm3119_vm12, %v4012_v45, %v9874_v59  ;;  %v8221_v59 = vld [vmem:[%s11206_s7] sm:$0x3f] }
 0x77e   : > { %v7642_v53 = vcombine.low %v4024_v61, %v4025_v6 }
 0x784   : > { %4559 = vmatmul.mubr.bf16.gmra.mxu0 %v7632_v26 }
 0x785   : > { %4566 = vmatprep.mubr.bf16.mxu0 %v9922_v44 }
 0x78c   : > { %4567 = vmatmul.mubr.bf16.gmra.mxu0 %v7637_v19 }
 0x78d   : > { %4574 = vmatprep.mubr.bf16.mxu0 %v9928_v39  ;;  %v4187_v39 = vsub.s32 3, %v11260_v8 }
 0x78f   : > { %v4188_v7 = vrot.slane %v8221_v59, %v4187_v39 }
 0x794   : > { %4575 = vmatmul.mubr.bf16.gmra.mxu0 %v7642_v53 }
 0x81c   : > { %v7807_v44 = vpop.f32.mrf.mxu0 }
 0x81e   : > { %v7808_v29 = vpop.f32.mrf.mxu0 }
 0x81f   : > { %v7809_v63 = vadd.f32 %v7808_v29, %v7807_v44 }
 0x820   : > { %v7810_v54 = vpop.f32.mrf.mxu0 }
 0x821   : > { %v4488_v62 = vadd.f32 %v7809_v63, %v4188_v7 }
 0x822   : > { %v7811_v51 = vpop.f32.mrf.mxu0 }
 0x823   : > { %v7812_v46 = vadd.f32 %v7811_v51, %v7810_v54 }
 0x824   : > { %v7813_v24 = vpop.f32.mrf.mxu0 }
 0x825   : > { %v4491_v20 = vadd.f32 %v7812_v46, %v4188_v7 }
 0x826   : > { %v7814_v36 = vpop.f32.mrf.mxu0 }
 0x827   : > { %v7815_v48 = vadd.f32 %v7814_v36, %v7813_v24 }
 0x828   : > { %v7816_v9 = vpop.f32.mrf.mxu0 }
 0x829   : > { %v4496_v47 = vadd.f32 %v7815_v48, %v4188_v7 }
 0x82a   : > { %v7817_v37 = vpop.f32.mrf.mxu0 }
 0x82b   : > { %v7818_v19 = vadd.f32 %v7817_v37, %v7816_v9  ;;  %v10044_v37 = vpop.f32.mrf.mxu1 }
 0x82c   : > { %v7819_v14 = vpop.f32.mrf.mxu0 }
 0x82d   : > { %v4499_v24 = vadd.f32 %v7818_v19, %v4188_v7 }
 0x82e   : > { %v7820_v2 = vpop.f32.mrf.mxu0 }
 0x82f   : > { %v7821_v51 = vadd.f32 %v7820_v2, %v7819_v14 }
 0x830   : > { %v7822_v13 = vpop.f32.mrf.mxu0 }
 0x832   : > { %v7823_v31 = vpop.f32.mrf.mxu0 }
 0x833   : > { %v7824_v60 = vadd.f32 %v7823_v31, %v7822_v13 }
 0x834   : > { %v7825_v49 = vpop.f32.mrf.mxu0 }
 0x835   : > { %v10034_v50 = vadd.f32 %v7824_v60, %v4188_v7 }
 0x836   : > { %v7826_v0 = vpop.f32.mrf.mxu0 }
 0x837   : > { %v7827_v12 = vadd.f32 %v7826_v0, %v7825_v49  ;;  %v4504_v49 = vadd.f32 %v7821_v51, %v4188_v7 }
 0x838   : > { %v7828_v33 = vpop.f32.mrf.mxu0 }
 0x839   : > { %v10036_v38 = vadd.f32 %v7827_v12, %v4188_v7 }
 0x83a   : > { %v7829_v10 = vpop.f32.mrf.mxu0 }
 0x83b   : > { %v7830_v17 = vadd.f32 %v7829_v10, %v7828_v33 }
 0x83c   : > { %v7847_v32 = vpop.f32.mrf.mxu0 }
 0x83d   : > { %v10038_v5 = vadd.f32 %v7830_v17, %v4188_v7  ;;  %v4633_v7 = vpop.f32.mrf.mxu1 }
 0x83e   : > { %v7848_v3 = vpop.f32.mrf.mxu0 }
 0x83f   : > { %v7849_v25 = vadd.f32 %v7848_v3, %v7847_v32 }
 0x840   : > { %v7850_v34 = vpop.f32.mrf.mxu0 }
 0x841   : > { %v4553_v35 = vadd.f32 %v7849_v25, %v4488_v62 }
 0x842   : > { %v7851_v4 = vpop.f32.mrf.mxu0 }
 0x843   : > { %v7852_v23 = vadd.f32 %v7851_v4, %v7850_v34  ;;  %v4618_v56 = vadd.f32 %v4617_v43, %v4553_v35 }
 0x844   : > { %v7853_v45 = vpop.f32.mrf.mxu0 }
 0x845   : > { %v4556_v42 = vadd.f32 %v7852_v23, %v4491_v20  ;;  %v4648_v11 = vmax.f32 %v4618_v56, 0.0 }
 0x846   : > { %v7854_v58 = vpop.f32.mrf.mxu0 }
 0x847   : > { %v7855_v16 = vadd.f32 %v7854_v58, %v7853_v45  ;;  %v4621_v26 = vadd.f32 %v4620_v57, %v4556_v42  ;;  %v4664_v6 = vcombine.high %v4648_v11, %v4648_v11  ;;  %v4671_v61 = vrot.slane %v4648_v11, %v9694_v27 }
 0x848   : > { %v7856_v21 = vpop.f32.mrf.mxu0 }
 0x849   : > { %v4561_v28 = vadd.f32 %v7855_v16, %v4496_v47  ;;  %v4649_v53 = vmax.f32 %v4621_v26, 0.0  ;;  %v4678_v36 = vrot.slane %v4664_v6, %v9694_v27  ;;  %v4679_v39 = vcombine.high %v4671_v61, %v4671_v61 }
 0x84a   : > { %v7857_v40 = vpop.f32.mrf.mxu0  ;;  %v4687_v0 = vrot.slane %v4671_v61, %v9694_v27 }
 0x84b   : > { %v4626_v44 = vadd.f32 %v8063_v52, %v4561_v28  ;;  %v7858_v29 = vadd.f32 %v7857_v40, %v7856_v21  ;;  %v4713_v13 = vcombine.high %v4649_v53, %v4649_v53  ;;  %v4720_v9 = vrot.slane %v4649_v53, %v9694_v27 }
 0x84c   : > { %v7859_v30 = vpop.f32.mrf.mxu0  ;;  %v4680_v12 = vcombine.high %v4678_v36, %v4678_v36  ;;  %v4701_v33 = vrot.slane %v4679_v39, %v9694_v27  ;;  %v10048_v14 = vrot.slane %v4678_v36, %v9694_v27  ;;  %v4709_v3 = vcombine.high %v4687_v0, %v4687_v0 }
 0x84d   : > { %v4650_v59 = vmax.f32 %v4626_v44, 0.0  ;;  %v4564_v60 = vadd.f32 %v7858_v29, %v4499_v24  ;;  %v4727_v2 = vrot.slane %v4713_v13, %v9694_v27  ;;  %v4728_v34 = vcombine.high %v4720_v9, %v4720_v9 }
 0x84e   : > { %v7860_v54 = vpop.f32.mrf.mxu0  ;;  %v10052_v4 = vrot.slane %v4680_v12, %v9694_v27  ;;  %v4711_v63 = vcombine.high %v4701_v33, %v4701_v33  ;;  %v4710_v52 = vcombine.high %v10048_v14, %v10048_v14  ;;  %v4736_v62 = vrot.slane %v4720_v9, %v9694_v27 }
 0x84f   : > { %v7861_v31 = vadd.f32 %v7860_v54, %v7859_v30  ;;  %v4762_v17 = vcombine.high %v4650_v59, %v4650_v59  ;;  %v4629_v32 = vadd.f32 %v8064_v18, %v4564_v60  ;;  %v4769_v45 = vrot.slane %v4650_v59, %v9694_v27 }
 0x850   : > { %v4729_v25 = vcombine.high %v4727_v2, %v4727_v2  ;;  %v5059_v46 = vrot.slane %v4687_v0, %v11263_v22  ;;  %v10060_v43 = vrot.slane %v4727_v2, %v9694_v27  ;;  %v5063_v21 = vrot.slane %v4701_v33, %v11263_v22 }
 0x851   : > { %v4569_v10 = vadd.f32 %v7861_v31, %v4504_v49  ;;  %v4776_v35 = vrot.slane %v4762_v17, %v9694_v27  ;;  %v4651_v23 = vmax.f32 %v4629_v32, 0.0  ;;  %v10065_v20 = vrot.slane %v4709_v3, %v11263_v22 }
 0x852   : > { %v5075_v18 = vrot.slane %v10048_v14, %v11263_v22  ;;  %v4750_v48 = vrot.slane %v4728_v34, %v9694_v27  ;;  %v4712_v56 = vcombine.high %v10052_v4, %v10052_v4  ;;  %v5071_v42 = vrot.slane %v4711_v63, %v11263_v22 }
 0x853   : > { %v4634_v58 = vadd.f32 %v4633_v7, %v4569_v10  ;;  %v5079_v16 = vrot.slane %v10052_v4, %v11263_v22  ;;  %v4777_v40 = vcombine.high %v4769_v45, %v4769_v45  ;;  %v10076_v57 = vrot.slane %v4710_v52, %v11263_v22 }
 0x854   : > { %v10079_v47 = vrot.slane %v4729_v25, %v9694_v27  ;;  %v4758_v11 = vcombine.high %v4736_v62, %v4736_v62  ;;  %v4759_v28 = vcombine.high %v10060_v43, %v10060_v43  ;;  %v4778_v30 = vcombine.high %v4776_v35, %v4776_v35 }
 0x855   : > { %v4652_v26 = vmax.f32 %v4634_v58, 0.0  ;;  %v4785_v19 = vrot.slane %v4769_v45, %v9694_v27  ;;  %v4811_v6 = vcombine.high %v4651_v23, %v4651_v23  ;;  %v5312_v61 = vcombine.low %v5059_v46, %v5063_v21 }
 0x856   : > { %v4760_v53 = vcombine.high %v4750_v48, %v4750_v48  ;;  %v5095_v44 = vrot.slane %v4750_v48, %v11263_v22  ;;  %v4818_v29 = vrot.slane %v4651_v23, %v9694_v27  ;;  %v5091_v54 = vrot.slane %v4736_v62, %v11263_v22 }
 0x857   : > { %v5107_v51 = vrot.slane %v10060_v43, %v11263_v22  ;;  %v10090_v24 = vrot.slane %v4776_v35, %v9694_v27  ;;  %v4799_v36 = vrot.slane %v4777_v40, %v9694_v27  ;;  %v4761_v39 = vcombine.high %v10079_v47, %v10079_v47 }
 0x858   : > { %v10096_v13 = vrot.slane %v4758_v11, %v11263_v22  ;;  %v5111_v31 = vrot.slane %v10079_v47, %v11263_v22  ;;  %v4860_v59 = vcombine.high %v4652_v26, %v4652_v26  ;;  %v10101_v60 = vrot.slane %v4759_v28, %v11263_v22 }
 0x859   : > { %v10104_v49 = vrot.slane %v4778_v30, %v9694_v27  ;;  %v4807_v0 = vcombine.high %v4785_v19, %v4785_v19  ;;  %v4825_v9 = vrot.slane %v4811_v6, %v9694_v27  ;;  %v10108_v12 = vrot.slane %v4760_v53, %v11263_v22 }
 0x85a   : > { %v10110_v33 = vcombine.low %v5091_v54, %v5095_v44  ;;  %v4826_v14 = vcombine.high %v4818_v29, %v4818_v29  ;;  %v4867_v2 = vrot.slane %v4652_v26, %v9694_v27  ;;  %v4808_v10 = vcombine.high %v10090_v24, %v10090_v24 }
 0x85b   : > { %v4809_v17 = vcombine.high %v4799_v36, %v4799_v36  ;;  %v5123_v32 = vrot.slane %v4785_v19, %v11263_v22  ;;  %v5087_v3 = vrot.slane %v4712_v56, %v11263_v22  ;;  %v5127_v34 = vrot.slane %v4799_v36, %v11263_v22 }
 0x85c   : > { %v5139_v7 = vrot.slane %v10090_v24, %v11263_v22  ;;  %v4834_v4 = vrot.slane %v4818_v29, %v9694_v27  ;;  %v4874_v63 = vrot.slane %v4860_v59, %v9694_v27  ;;  %v4810_v45 = vcombine.high %v10104_v49, %v10104_v49 }
 0x85d   : > { %v10125_v52 = vrot.slane %v4807_v0, %v11263_v22  ;;  %v4827_v25 = vcombine.high %v4825_v9, %v4825_v9  ;;  %v5313_v62 = vcombine.low %v10065_v20, %v5071_v42  ;;  %v5143_v58 = vrot.slane %v10104_v49, %v11263_v22 }
 0x85e   : > { %v10131_v46 = vrot.slane %v4825_v9, %v9694_v27  ;;  %v4848_v35 = vrot.slane %v4826_v14, %v9694_v27  ;;  %v4875_v23 = vcombine.high %v4867_v2, %v4867_v2  ;;  %v5135_v21 = vrot.slane %v4809_v17, %v11263_v22 }
 0x85f   : > { %v10136_v48 = vrot.slane %v4808_v10, %v11263_v22  ;;  %v5329_v56 = vcombine.low %v5075_v18, %v5079_v16  ;;  %v5330_v40 = vcombine.low %v10076_v57, %v5087_v3  ;;  %v10139_v47 = vcombine.low %v5123_v32, %v5127_v34 }
 0x860   : > { %v4856_v20 = vcombine.high %v4834_v4, %v4834_v4  ;;  %v4876_v42 = vcombine.high %v4874_v63, %v4874_v63  ;;  %v4883_v11 = vrot.slane %v4867_v2, %v9694_v27  ;;  %v4855_v26 = vrot.slane %v4827_v25, %v9694_v27 }
 0x861   : > { %v5155_v28 = vrot.slane %v4834_v4, %v11263_v22  ;;  %v10145_v30 = vrot.slane %v4874_v63, %v9694_v27  ;;  %v5327_v19 = vrot.slane %v5313_v62, %v8704_v55  ;;  %v4857_v18 = vcombine.high %v10131_v46, %v10131_v46 }
 0x862   : > { %v4858_v16 = vcombine.high %v4848_v35, %v4848_v35  ;;  %v5159_v57 = vrot.slane %v4848_v35, %v11263_v22  ;;  %v4897_v6 = vrot.slane %v4875_v23, %v9694_v27  ;;  %v5320_v53 = vrot.slane %v5312_v61, %v8704_v55 }
 0x863   : > { %v5337_v44 = vrot.slane %v5329_v56, %v8704_v55  ;;  %v5344_v29 = vrot.slane %v5330_v40, %v8704_v55  ;;  %v5119_v54 = vrot.slane %v4761_v39, %v11263_v22  ;;  %v5163_v36 = vrot.slane %v4856_v20, %v11263_v22 }
 0x864   : > { %v5171_v59 = vrot.slane %v10131_v46, %v11263_v22  ;;  %v4904_v49 = vrot.slane %v4876_v42, %v9694_v27  ;;  %v4905_v0 = vcombine.high %v4883_v11, %v4883_v11  ;;  %v4859_v9 = vcombine.high %v4855_v26, %v4855_v26 }
 0x865   : > { %v5328_v14 = vcombine.low %v5320_v53, %v5327_v19  ;;  %v5345_v2 = vcombine.low %v5337_v44, %v5344_v29  ;;  %v5347_v61 = vcombine.low %v10096_v13, %v10108_v12  ;;  %v5167_v10 = vrot.slane %v4858_v16, %v11263_v22 }
 0x866   : > { %v5175_v17 = vrot.slane %v4855_v26, %v11263_v22  ;;  %v4906_v39 = vcombine.high %v10145_v30, %v10145_v30  ;;  %v4907_v32 = vcombine.high %v4897_v6, %v4897_v6  ;;  %v5179_v3 = vrot.slane %v4857_v18, %v11263_v22 }
 0x867   : > { %v10167_v34 = vpack.c.bf16 %v5345_v2, %v5328_v14  ;;  %v5363_v4 = vcombine.low %v5107_v51, %v5111_v31  ;;  %v5364_v63 = vcombine.low %v10101_v60, %v5119_v54  ;;  %v5414_v25 = vcombine.low %v5155_v28, %v5159_v57 }
 0x868   : > { %v4908_v13 = vcombine.high %v4904_v49, %v4904_v49  ;;  %v5187_v12 = vrot.slane %v4883_v11, %v11263_v22  ;;  %v5191_v62 = vrot.slane %v4897_v6, %v11263_v22  ;;  %v5195_v46 = vrot.slane %v4905_v0, %v11263_v22 }
 0x869   : > { %v5203_v35 = vrot.slane %v10145_v30, %v11263_v22  ;;  %5632 = vrot.lane.b32.xlu0 %v10167_v34, %s8242_s9  ;;  %5616 = vrot.lane.b32.xlu1 %v10167_v34, %s8239_s22  ;;  %v5361_v43 = vrot.slane %v5347_v61, %v8704_v55  ;;  %v5199_v51 = vrot.slane %v4907_v32, %v11263_v22 }
 0x86a   : > { %v5207_v31 = vrot.slane %v4904_v49, %v11263_v22  ;;  %v5211_v60 = vrot.slane %v4906_v39, %v11263_v22  ;;  %v5354_v23 = vrot.slane %v10110_v33, %v8704_v55  ;;  %v5371_v56 = vrot.slane %v5363_v4, %v8704_v55  ;;  %v8193_v4 = vld [vmem:[%s11204_s5 + $0x78] sm:$0xff]  }
 0x86b   : > { %v5378_v40 = vrot.slane %v5364_v63, %v8704_v55  ;;  %v5151_v20 = vrot.slane %v4810_v45, %v11263_v22  ;;  %v5381_v42 = vcombine.low %v10125_v52, %v5135_v21  ;;  %v5448_v11 = vcombine.low %v5187_v12, %v5191_v62  ;;  %v8194_v63 = vld [vmem:[%s11204_s5 + $0x38] sm:$0xff]   ;;  %7879 = vmatprep.subr.bf16.mxu0 %v8193_v4  ;;  %v8197_v12 = vld [vmem:[%s11204_s5 + $0x68] sm:$0xff]  }
 0x86c   : > { %v5397_v26 = vcombine.low %v5139_v7, %v5143_v58  ;;  %v5183_v28 = vrot.slane %v4859_v9, %v11263_v22  ;;  %v5415_v30 = vcombine.low %v5163_v36, %v5167_v10  ;;  %v5362_v19 = vcombine.low %v5354_v23, %v5361_v43  ;;  %7880 = vmatpush3.bf16.msra.mxu0 %v8194_v63  ;;  %v8198_v62 = vld [vmem:[%s11204_s5 + $0x28] sm:$0xff]   ;;  %v8201_v43 = vld [vmem:[%s11204_s5 + $0x58] sm:$0xff]   ;;  %v7862_v23 = vpop.f32.mrf.mxu0 }
 0x86d   : > { %v5379_v18 = vcombine.low %v5371_v56, %v5378_v40  ;;  %v5395_v33 = vrot.slane %v5381_v42, %v8704_v55  ;;  %v5398_v16 = vcombine.low %v10136_v48, %v5151_v20  ;;  %v5388_v57 = vrot.slane %v10139_v47, %v8704_v55  ;;  %v8068_v20 = vpop.f32.mrf.mxu1 }
 0x86e   : > { %v5405_v45 = vrot.slane %v5397_v26, %v8704_v55  ;;  %v5431_v52 = vcombine.low %v5171_v59, %v5175_v17  ;;  %v5432_v21 = vcombine.low %v5179_v3, %v5183_v28  ;;  %v5429_v7 = vrot.slane %v5415_v30, %v8704_v55  ;;  %v7863_v56 = vpop.f32.mrf.mxu0 }
 0x86f   : > { %v10201_v6 = vpack.c.bf16 %v5379_v18, %v5362_v19  ;;  %v5412_v24 = vrot.slane %v5398_v16, %v8704_v55  ;;  %v5215_v58 = vrot.slane %v4908_v13, %v11263_v22  ;;  %v5422_v53 = vrot.slane %v5414_v25, %v8704_v55  ;;  %v8195_v25 = vld [vmem:[%s11204_s5 + $0x70] sm:$0xff]  }
 0x870   : > { %v5439_v44 = vrot.slane %v5431_v52, %v8704_v55  ;;  %v5446_v48 = vrot.slane %v5432_v21, %v8704_v55  ;;  %v5449_v29 = vcombine.low %v5195_v46, %v5199_v51  ;;  %v5396_v47 = vcombine.low %v5388_v57, %v5395_v33  ;;  %v8196_v13 = vld [vmem:[%s11204_s5 + $0x30] sm:$0xff]   ;;  %7881 = vmatprep.subr.bf16.mxu0 %v8195_v25  ;;  %v8199_v46 = vld [vmem:[%s11204_s5 + $0x60] sm:$0xff]   ;;  %v8202_v51 = vld [vmem:[%s11204_s5 + $0x18] sm:$0xff]   ;;  %v7865_v28 = vpop.f32.mrf.mxu0 }
 0x871   : > { %5618 = vrot.lane.b32.xlu0 %v10201_v6, %s8239_s22  ;;  %5634 = vrot.lane.b32.xlu1 %v10201_v6, %s8242_s9  ;;  %v5413_v54 = vcombine.low %v5405_v45, %v5412_v24  ;;  %v5465_v36 = vcombine.low %v5203_v35, %v5207_v31  ;;  %v5466_v49 = vcombine.low %v5211_v60, %v5215_v58  ;;  %v8200_v35 = vld [vmem:[%s11204_s5 + $0x20] sm:$0xff]   ;;  %v8203_v31 = vld [vmem:[%s11204_s5 + $0x50] sm:$0xff]  }
 0x872   : > { %v5447_v59 = vcombine.low %v5439_v44, %v5446_v48  ;;  %v5430_v9 = vcombine.low %v5422_v53, %v5429_v7  ;;  %v5463_v14 = vrot.slane %v5449_v29, %v8704_v55  ;;  %v5456_v17 = vrot.slane %v5448_v11, %v8704_v55  ;;  %7882 = vmatpush3.bf16.msra.mxu0 %v8196_v13  ;;  %v8204_v60 = vld [vmem:[%s11204_s5 + $0x10] sm:$0xff]   ;;  %v4636_v11 = vpop.f32.mrf.mxu1  ;;  %v7866_v19 = vpop.f32.mrf.mxu0 }
 0x873   : > { %v10213_v0 = vpack.c.bf16 %v5413_v54, %v5396_v47  ;;  %v5473_v2 = vrot.slane %v5465_v36, %v8704_v55  ;;  %v5480_v61 = vrot.slane %v5466_v49, %v8704_v55  ;;  %7883 = vmatprep.subr.bf16.mxu0 %v8197_v12  ;;  %v7864_v40 = vadd.f32 %v7863_v56, %v7862_v23 }
 0x874   : > { %v10222_v10 = vpack.c.bf16 %v5447_v59, %v5430_v9  ;;  %v5464_v32 = vcombine.low %v5456_v17, %v5463_v14  ;;  %v7867_v33 = vadd.f32 %v7866_v19, %v7865_v28  ;;  %v7868_v16 = vpop.f32.mrf.mxu0  ;;  %v8205_v17 = vld [vmem:[%s11204_s5 + $0x48] sm:$0xff]  }
 0x875   : > { %5620 = vrot.lane.b32.xlu0 %v10213_v0, %s8239_s22  ;;  %5636 = vrot.lane.b32.xlu1 %v10213_v0, %s8242_s9  ;;  %v5481_v39 = vcombine.low %v5473_v2, %v5480_v61  ;;  %v4572_v42 = vadd.f32 %v7864_v40, %v10034_v50 }
 0x876   : > { %7884 = vmatpush3.bf16.msra.mxu0 %v8198_v62  ;;  %v4577_v45 = vadd.f32 %v7867_v33, %v10036_v38  ;;  %v7869_v52 = vpop.f32.mrf.mxu0 }
 0x877   : > { %v10229_v3 = vpack.c.bf16 %v5481_v39, %v5464_v32  ;;  %7885 = vmatprep.subr.bf16.mxu0 %v8199_v46  ;;  %v4637_v26 = vadd.f32 %v4636_v11, %v4572_v42  ;;  %v7870_v7 = vadd.f32 %v7869_v52, %v7868_v16  ;;  %v8206_v39 = vld [vmem:[%s11204_s5 + $0x8] sm:$0xff]  }
 0x878   : > { %v4642_v58 = vadd.f32 %v10044_v37, %v4577_v45  ;;  %v8207_v32 = vld [vmem:[%s11204_s5 + $0x88] sm:$0xff]  }
 0x879   : > { %5622 = vrot.lane.b32.xlu0 %v10222_v10, %s8239_s22  ;;  %5638 = vrot.lane.b32.xlu1 %v10222_v10, %s8242_s9  ;;  %v4653_v30 = vmax.f32 %v4637_v26, 0.0  ;;  %v4580_v44 = vadd.f32 %v7870_v7, %v10038_v5 }
 0x87a   : > { %7886 = vmatpush3.bf16.msra.mxu0 %v8200_v35  ;;  %v4654_v48 = vmax.f32 %v4642_v58, 0.0  ;;  %8069 = vmatprep.subr.bf16.mxu1 %v8207_v32 }
 0x87b   : > { %7887 = vmatprep.subr.bf16.mxu0 %v8201_v43  ;;  %v4909_v18 = vcombine.high %v4653_v30, %v4653_v30  ;;  %v4916_v21 = vrot.slane %v4653_v30, %v9694_v27  ;;  %v4645_v36 = vadd.f32 %v8068_v20, %v4580_v44  ;;  %8070 = vmatpush3.bf16.msra.mxu1 %v8207_v32 }
 0x87c   : > { %v4958_v59 = vcombine.high %v4654_v48, %v4654_v48  ;;  %v4965_v37 = vrot.slane %v4654_v48, %v9694_v27 }
 0x87d   : > { %5624 = vrot.lane.b32.xlu0 %v10229_v3, %s8239_s22  ;;  %5640 = vrot.lane.b32.xlu1 %v10229_v3, %s8242_s9  ;;  %v4923_v57 = vrot.slane %v4909_v18, %v9694_v27  ;;  %v4924_v50 = vcombine.high %v4916_v21, %v4916_v21  ;;  %v4932_v54 = vrot.slane %v4916_v21, %v9694_v27  ;;  %v4655_v2 = vmax.f32 %v4645_v36, 0.0  ;;  %v8210_v18 = vld [vmem:[%s11204_s5 + $0x80] sm:$0xff]  }
 0x87e   : > { %7888 = vmatpush3.bf16.msra.mxu0 %v8202_v51  ;;  %v4972_v5 = vrot.slane %v4958_v59, %v9694_v27  ;;  %v4973_v62 = vcombine.high %v4965_v37, %v4965_v37  ;;  %v8208_v51 = vld [vmem:[%s11204_s5 + $0x40] sm:$0xff]   ;;  %v4981_v40 = vrot.slane %v4965_v37, %v9694_v27  ;;  %8071 = vmatprep.subr.bf16.mxu1 %v8210_v18 }
 0x87f   : > { %7889 = vmatprep.subr.bf16.mxu0 %v8203_v31  ;;  %v4925_v24 = vcombine.high %v4923_v57, %v4923_v57  ;;  %v4939_v29 = vrot.slane %v4923_v57, %v9694_v27  ;;  %v4946_v47 = vrot.slane %v4924_v50, %v9694_v27  ;;  %v4954_v14 = vcombine.high %v4932_v54, %v4932_v54  ;;  %v8209_v31 = vld [vmem:[%s11204_s5] sm:$0xff]  }
 0x880   : > { %v5007_v35 = vcombine.high %v4655_v2, %v4655_v2  ;;  %v4974_v23 = vcombine.high %v4972_v5, %v4972_v5  ;;  %v5014_v56 = vrot.slane %v4655_v2, %v9694_v27  ;;  %v10309_v20 = vrot.slane %v4972_v5, %v9694_v27  ;;  %8072 = vmatpush3.bf16.msra.mxu1 %v8210_v18 }
 0x881   : > { %v4953_v53 = vrot.slane %v4925_v24, %v9694_v27  ;;  %v4955_v49 = vcombine.high %v4939_v29, %v4939_v29  ;;  %v4956_v9 = vcombine.high %v4946_v47, %v4946_v47  ;;  %v5223_v13 = vrot.slane %v4946_v47, %v11263_v22  ;;  %7306 = vmatprep.subr.bf16.mxu1 %v11254_v15 }
 0x882   : > { %7890 = vmatpush3.bf16.msra.mxu0 %v8204_v60  ;;  %v5227_v12 = vrot.slane %v4954_v14, %v11263_v22  ;;  %v5235_v46 = vrot.slane %v4939_v29, %v11263_v22  ;;  %v5219_v60 = vrot.slane %v4932_v54, %v11263_v22  ;;  %v4995_v26 = vrot.slane %v4973_v62, %v9694_v27 }
 0x883   : > { %v4957_v38 = vcombine.high %v4953_v53, %v4953_v53  ;;  %v5231_v4 = vrot.slane %v4956_v9, %v11263_v22  ;;  %v5239_v63 = vrot.slane %v4953_v53, %v11263_v22  ;;  %v5243_v25 = vrot.slane %v4955_v49, %v11263_v22  ;;  %7891 = vmatprep.subr.bf16.mxu0 %v8205_v17 }
 0x884   : > { %v5482_v28 = vcombine.low %v5219_v60, %v5223_v13  ;;  %v5021_v30 = vrot.slane %v5007_v35, %v9694_v27  ;;  %v10318_v33 = vrot.slane %v4974_v23, %v9694_v27  ;;  %v5022_v16 = vcombine.high %v5014_v56, %v5014_v56 }
 0x885   : > { %v5247_v61 = vrot.slane %v4957_v38, %v11263_v22  ;;  %v5483_v42 = vcombine.low %v5227_v12, %v5231_v4  ;;  %v5499_v11 = vcombine.low %v5235_v46, %v5239_v63  ;;  %v5003_v57 = vcombine.high %v4981_v40, %v4981_v40 }
 0x886   : > { %7892 = vmatpush3.bf16.msra.mxu0 %v8206_v39  ;;  %v5004_v45 = vcombine.high %v10309_v20, %v10309_v20  ;;  %v5005_v24 = vcombine.high %v4995_v26, %v4995_v26  ;;  %v5251_v7 = vrot.slane %v4981_v40, %v11263_v22  ;;  %v5267_v58 = vrot.slane %v10309_v20, %v11263_v22 }
 0x887   : > { %v5500_v43 = vcombine.low %v5243_v25, %v5247_v61  ;;  %7893 = vmatprep.subr.bf16.mxu0 %v8208_v51  ;;  %v5497_v52 = vrot.slane %v5483_v42, %v8704_v55  ;;  %v5507_v21 = vrot.slane %v5499_v11, %v8704_v55  ;;  %v10328_v50 = vrot.slane %v5014_v56, %v9694_v27 }
 0x888   : > { %v5023_v48 = vcombine.high %v5021_v30, %v5021_v30  ;;  %v5490_v47 = vrot.slane %v5482_v28, %v8704_v55  ;;  %v5006_v38 = vcombine.high %v10318_v33, %v10318_v33  ;;  %v5255_v36 = vrot.slane %v4995_v26, %v11263_v22 }
 0x889   : > { %v5514_v19 = vrot.slane %v5500_v43, %v8704_v55  ;;  %v10337_v59 = vrot.slane %v5022_v16, %v9694_v27  ;;  %v10341_v9 = vrot.slane %v5021_v30, %v9694_v27  ;;  %v5259_v61 = vrot.slane %v5003_v57, %v11263_v22 }
 0x88a   : > { %7894 = vmatpush3.bf16.msra.mxu0 %v8209_v31  ;;  %v5498_v2 = vcombine.low %v5490_v47, %v5497_v52  ;;  %v5263_v5 = vrot.slane %v5005_v24, %v11263_v22  ;;  %v5271_v17 = vrot.slane %v10318_v33, %v11263_v22  ;;  %v5052_v39 = vcombine.high %v10328_v50, %v10328_v50 }
 0x88b   : > { %v5515_v54 = vcombine.low %v5507_v21, %v5514_v19  ;;  %v10351_v32 = vrot.slane %v5023_v48, %v9694_v27  ;;  %v5275_v13 = vrot.slane %v5004_v45, %v11263_v22  ;;  %v5516_v12 = vcombine.low %v5251_v7, %v5255_v36 }
 0x88c   : > { %v5054_v62 = vcombine.high %v10337_v59, %v10337_v59  ;;  %v5283_v46 = vrot.slane %v10328_v50, %v11263_v22  ;;  %v5053_v35 = vcombine.high %v10341_v9, %v10341_v9  ;;  %v5279_v43 = vrot.slane %v5006_v38, %v11263_v22 }
 0x88d   : > { %v10353_v63 = vpack.c.bf16 %v5515_v54, %v5498_v2  ;;  %v10368_v31 = vrot.slane %v5052_v39, %v11263_v22  ;;  %v5299_v60 = vrot.slane %v10341_v9, %v11263_v22  ;;  %v5517_v20 = vcombine.low %v5259_v61, %v5263_v5 }
 0x88e   : > { %v5055_v42 = vcombine.high %v10351_v32, %v10351_v32  ;;  %v10382_v19 = vrot.slane %v5054_v62, %v11263_v22  ;;  %v5303_v57 = vrot.slane %v10351_v32, %v11263_v22  ;;  %v5533_v48 = vcombine.low %v5267_v58, %v5271_v17 }
 0x88f   : > { %v5307_v58 = vrot.slane %v5053_v35, %v11263_v22  ;;  %v5524_v2 = vrot.slane %v5516_v12, %v8704_v55 }
 0x890   : > { %v5541_v62 = vrot.slane %v5533_v48, %v8704_v55 }
 0x8db   : > { %v5633_v53 = vpop.permute.xlu0 %5632  ;;  %v5617_v44 = vpop.permute.xlu1 %5616 }
 0x8dc   : > { %v5649_v29 = vsel %vm2398_vm6, 0, %v5617_v44  ;;  %v5651_v23 = vsel %vm2398_vm6, %v10167_v34, %v5617_v44  ;;  %v5531_v44 = vrot.slane %v5517_v20, %v8704_v55 }
 0x8dd   : > { %v5681_v49 = vsel %vm3119_vm12, %v5649_v29, %v5633_v53 }
 0x8de   : > { %5913 = vrot.lane.b32.xlu1 %v5681_v49, %s8241_s19  ;;  %v5705_v14 = vshrl.u32 %v5681_v49, 16  ;;  %v5708_v37 = vshll.u32 %v5681_v49, 16 }
 0x8e0   : > { %v5707_v4 = vrot.slane %v5705_v14, 7  ;;  %v5833_v25 = vrot.slane %v5708_v37, 1 }
 0x8e2   : > { %5642 = vrot.lane.b32.xlu1 %v10353_v63, %s8242_s9  ;;  %v5834_v27 = vor.u32 %v5833_v25, %v5705_v14  ;;  %v10365_v51 = vor.u32 %v5708_v37, %v5707_v4 }
 0x8e3   : > { %v5619_v56 = vpop.permute.xlu0 %5618  ;;  %v5635_v40 = vpop.permute.xlu1 %5634 }
 0x8e4   : > { %v5653_v11 = vsel %vm2398_vm6, %v10167_v34, %v5619_v56  ;;  %v5683_v26 = vsel %vm3119_vm12, %v5651_v23, %v5635_v40  ;;  %v5881_v30 = vsel %vm8448_vm5, %v5834_v27, 0  ;;  %v5534_v34 = vcombine.low %v5275_v13, %v5279_v43 }
 0x8e5   : > { %v5711_v18 = vshrl.u32 %v5683_v26, 16  ;;  %v5714_v33 = vshll.u32 %v5683_v26, 16  ;;  %5961 = vrot.lane.b32.xlu0 %v5881_v30, %s8242_s9  ;;  %v5684_v16 = vsel %vm3119_vm12, %v5653_v11, %v5635_v40  ;;  %v5655_v29 = vsel %vm2398_vm6, %v10201_v6, %v5619_v56 }
 0x8e6   : > { %v5717_v45 = vshrl.u32 %v5684_v16, 16  ;;  %v5720_v52 = vshll.u32 %v5684_v16, 16  ;;  %v5548_v61 = vrot.slane %v5534_v34, %v8704_v55  ;;  %v5532_v27 = vcombine.low %v5524_v2, %v5531_v44 }
 0x8e7   : > { %v5713_v21 = vrot.slane %v5711_v18, 7  ;;  %v5621_v24 = vpop.permute.xlu0 %5620  ;;  %v5637_v7 = vpop.permute.xlu1 %5636  ;;  %v5835_v53 = vrot.slane %v5714_v33, 1  ;;  %v5311_v23 = vrot.slane %v5055_v42, %v11263_v22  ;;  %v5551_v44 = vcombine.low %v10368_v31, %v10382_v19 }
 0x8e8   : > { %v5657_v47 = vsel %vm2398_vm6, %v10201_v6, %v5621_v24  ;;  %v5719_v54 = vrot.slane %v5717_v45, 7  ;;  %v5837_v38 = vrot.slane %v5720_v52, 1  ;;  %v10395_v49 = vsel %vm3119_vm12, %v5655_v29, %v5637_v7 }
 0x8e9   : > { %v5836_v36 = vor.u32 %v5835_v53, %v5711_v18  ;;  %5915 = vrot.lane.b32.xlu0 %v5683_v26, %s8241_s19  ;;  %v10398_v14 = vsel %vm3119_vm12, %v5657_v47, %v5637_v7  ;;  %v10400_v37 = vor.u32 %v5714_v33, %v5713_v21  ;;  %v5726_v6 = vshll.u32 %v10395_v49, 16 }
 0x8ea   : > { %v5838_v32 = vor.u32 %v5837_v38, %v5717_v45  ;;  %v5723_v4 = vshrl.u32 %v10395_v49, 16  ;;  %v10409_v25 = vor.u32 %v5720_v52, %v5719_v54  ;;  %v5659_v13 = vsel %vm2398_vm6, %v10213_v0, %v5621_v24 }
 0x8eb   : > { %v5623_v5 = vpop.permute.xlu0 %5622  ;;  %v5639_v17 = vpop.permute.xlu1 %5638  ;;  %v5882_v39 = vsel %vm8448_vm5, %v5836_v36, 0  ;;  %v5729_v35 = vshrl.u32 %v10398_v14, 16  ;;  %v5839_v43 = vrot.slane %v5726_v6, 1  ;;  %v5549_v40 = vcombine.low %v5541_v62, %v5548_v61 }
 0x8ec   : > { %v5661_v12 = vsel %vm2398_vm6, %v10213_v0, %v5623_v5  ;;  %5963 = vrot.lane.b32.xlu1 %v5882_v39, %s8242_s9  ;;  %v10422_v56 = vsel %vm3119_vm12, %v5659_v13, %v5639_v17  ;;  %v5732_v20 = vshll.u32 %v10398_v14, 16  ;;  %v5663_v26 = vsel %vm2398_vm6, %v10222_v10, %v5623_v5 }
 0x8ed   : > { %5626 = vrot.lane.b32.xlu0 %v10353_v63, %s8239_s22  ;;  %v5735_v0 = vshrl.u32 %v10422_v56, 16  ;;  %v10427_v11 = vsel %vm3119_vm12, %v5661_v12, %v5639_v17  ;;  %v5883_v42 = vsel %vm8448_vm5, %v5838_v32, 0  ;;  %v5725_v33 = vrot.slane %v5723_v4, 7 }
 0x8ee   : > { %v5741_v45 = vshrl.u32 %v10427_v11, 16  ;;  %v5840_v21 = vor.u32 %v5839_v43, %v5723_v4  ;;  %v5731_v24 = vrot.slane %v5729_v35, 7  ;;  %v5287_v7 = vrot.slane %v10337_v59, %v11263_v22 }
 0x8ef   : > { %v10431_v30 = vpop.permute.xlu0 %5624  ;;  %v5641_v18 = vpop.permute.xlu1 %5640  ;;  %v5737_v48 = vrot.slane %v5735_v0, 7  ;;  %v10449_v29 = vpack.c.bf16 %v5549_v40, %v5532_v27  ;;  %v5841_v54 = vrot.slane %v5732_v20, 1  ;;  %v5738_v59 = vshll.u32 %v10422_v56, 16 }
 0x8f0   : > { %v5665_v52 = vsel %vm2398_vm6, %v10222_v10, %v10431_v30  ;;  %v10440_v34 = vsel %vm3119_vm12, %v5663_v26, %v5641_v18  ;;  %5917 = vrot.lane.b32.xlu1 %v5684_v16, %s8241_s19  ;;  %v5567_v10 = vcombine.low %v5299_v60, %v5303_v57  ;;  %v5568_v16 = vcombine.low %v5307_v58, %v5311_v23 }
 0x8f1   : > { %v5747_v53 = vshrl.u32 %v10440_v34, 16  ;;  %5965 = vrot.lane.b32.xlu0 %v5883_v42, %s8242_s9  ;;  %v5693_v47 = vsel %vm3119_vm12, %v5665_v52, %v5641_v18  ;;  %v5743_v38 = vrot.slane %v5741_v45, 7  ;;  %v5884_v31 = vsel %vm8448_vm5, %v5840_v21, 0 }
 0x8f2   : > { %v5753_v36 = vshrl.u32 %v5693_v47, 16  ;;  %v10460_v19 = vor.u32 %v5726_v6, %v5725_v33  ;;  %v10462_v61 = vor.u32 %v5732_v20, %v5731_v24  ;;  %v5744_v9 = vshll.u32 %v10427_v11, 16 }
 0x8f3   : > { %v5749_v2 = vrot.slane %v5747_v53, 7  ;;  %v10466_v57 = vor.u32 %v5738_v59, %v5737_v48  ;;  %v5550_v58 = vcombine.low %v5283_v46, %v5287_v7  ;;  %v5750_v5 = vshll.u32 %v10440_v34, 16 }
 0x8f4   : > { %5644 = vrot.lane.b32.xlu1 %v10449_v29, %s8242_s9  ;;  %v5755_v60 = vrot.slane %v5753_v36, 7  ;;  %v5582_v17 = vrot.slane %v5568_v16, %v8704_v55  ;;  %v5756_v39 = vshll.u32 %v5693_v47, 16  ;;  %v5565_v6 = vrot.slane %v5551_v44, %v8704_v55 }
 0x8f5   : > { %5967 = vrot.lane.b32.xlu0 %v5884_v31, %s8242_s9  ;;  %v5575_v32 = vrot.slane %v5567_v10, %v8704_v55  ;;  %v10475_v4 = vor.u32 %v5744_v9, %v5743_v38  ;;  %v5842_v13 = vor.u32 %v5841_v54, %v5729_v35  ;;  %v5843_v12 = vrot.slane %v5738_v59, 1 }
 0x8f6   : > { %v10479_v62 = vor.u32 %v5750_v5, %v5749_v2  ;;  %v10481_v22 = vor.u32 %v5756_v39, %v5755_v60  ;;  %v5558_v50 = vrot.slane %v5550_v58, %v8704_v55  ;;  %v5845_v55 = vrot.slane %v5744_v9, 1 }
 0x8f7   : > { %v5583_v46 = vcombine.low %v5575_v32, %v5582_v17  ;;  %v5885_v43 = vsel %vm8448_vm5, %v5842_v13, 0  ;;  %v5847_v40 = vrot.slane %v5750_v5, 1  ;;  %v5849_v26 = vrot.slane %v5756_v39, 1 }
 0x8f8   : > { %5919 = vrot.lane.b32.xlu1 %v10395_v49, %s8241_s19  ;;  %v5566_v27 = vcombine.low %v5558_v50, %v5565_v6  ;;  %v5844_v49 = vor.u32 %v5843_v12, %v5735_v0  ;;  %v5667_v33 = vsel %vm2398_vm6, %v10229_v3, %v10431_v30  ;;  %v5817_v7 = vsel %vm8590_vm7, 0, %v10365_v51 }
 0x8f9   : > { %5628 = vrot.lane.b32.xlu0 %v10449_v29, %s8239_s22  ;;  %v5848_v20 = vor.u32 %v5847_v40, %v5747_v53  ;;  %v5818_v2 = vsel %vm8590_vm7, 0, %v10400_v37 }
 0x8fa   : > { %v10491_v35 = vpack.c.bf16 %v5583_v46, %v5566_v27  ;;  %v5886_v23 = vsel %vm8448_vm5, %v5844_v49, 0 }
 0x8fb   : > { %v5888_v18 = vsel %vm8448_vm5, %v5848_v20, 0 }
 0x8fc   : > { %5921 = vrot.lane.b32.xlu1 %v10398_v14, %s8241_s19  ;;  %v5846_v14 = vor.u32 %v5845_v55, %v5741_v45 }
 0x8fd   : > { %5969 = vrot.lane.b32.xlu0 %v5885_v43, %s8242_s9 }
 0x8fe   : > { %v5887_v0 = vsel %vm8448_vm5, %v5846_v14, 0 }
 0x900   : > { %5646 = vrot.lane.b32.xlu1 %v10491_v35, %s8242_s9 }
 0x901   : > { %5971 = vrot.lane.b32.xlu0 %v5886_v23, %s8242_s9  ;;  %v5819_v23 = vsel %vm8590_vm7, 0, %v10409_v25 }
 0x904   : > { %5923 = vrot.lane.b32.xlu1 %v10422_v56, %s8241_s19  ;;  %v5850_v56 = vor.u32 %v5849_v26, %v5753_v36 }
 0x905   : > { %5630 = vrot.lane.b32.xlu0 %v10491_v35, %s8239_s22 }
 0x908   : > { %5925 = vrot.lane.b32.xlu1 %v10427_v11, %s8241_s19  ;;  %v5889_v11 = vsel %vm8448_vm5, %v5850_v56, 0 }
 0x909   : > { %5973 = vrot.lane.b32.xlu0 %v5887_v0, %s8242_s9 }
 0x90c   : > { %5975 = vrot.lane.b32.xlu1 %v5888_v18, %s8242_s9 }
 0x90d   : > { %5927 = vrot.lane.b32.xlu0 %v10440_v34, %s8241_s19 }
 0x910   : > { %5929 = vrot.lane.b32.xlu1 %v5693_v47, %s8241_s19 }
 0x911   : > { %5977 = vrot.lane.b32.xlu0 %v5889_v11, %s8242_s9 }
 0x950   : > { %v5914_v42 = vpop.permute.xlu1 %5913 }
 0x951   : > { %v5995_v30 = vsel %vm2587_vm15, %v5817_v7, %v5914_v42 }
 0x954   : > { %v5643_v45 = vpop.permute.xlu1 %5642 }
 0x955   : > { %v5695_v52 = vsel %vm3119_vm12, %v5667_v33, %v5643_v45 }
 0x956   : > { %5931 = vrot.lane.b32.xlu0 %v5695_v52, %s8241_s19  ;;  %v5759_v21 = vshrl.u32 %v5695_v52, 16  ;;  %v5762_v24 = vshll.u32 %v5695_v52, 16 }
 0x957   : > { %v5962_v34 = vpop.permute.xlu0 %5961 }
 0x958   : > { %v5761_v53 = vrot.slane %v5759_v21, 7  ;;  %8073 = vmatprep.mubr.msk.bf16.mxu1 %vm2398_vm6, %v5962_v34  ;;  %v6058_v44 = vsel %vm3119_vm12, %v5914_v42, %v5962_v34  ;;  %v5851_v48 = vrot.slane %v5762_v24, 1 }
 0x959   : > { %6317 = vmatprep.mubr.bf16.mxu0 %v6058_v44 }
 0x95a   : > { %6318 = vmatmul.mubr.bf16.vlgmr.msra.gmra.mxu0 %v5995_v30  ;;  %v5852_v10 = vor.u32 %v5851_v48, %v5759_v21  ;;  %v10527_v16 = vor.u32 %v5762_v24, %v5761_v53 }
 0x95b   : > { %v5916_v47 = vpop.permute.xlu0 %5915 }
 0x95c   : > { %v5890_v54 = vsel %vm8448_vm5, %v5852_v10, 0  ;;  %v5999_v9 = vsel %vm2587_vm15, %v5818_v2, %v5916_v47 }
 0x95d   : > { %5979 = vrot.lane.b32.xlu1 %v5890_v54, %s8242_s9 }
 0x95e   : > { %v5964_v51 = vpop.permute.xlu1 %5963 }
 0x95f   : > { %8074 = vmatmul.mubr.msk.bf16.vlgmr.msra.gmra.mxu1 %vm2398_vm6, %v5964_v51  ;;  %v6061_v59 = vsel %vm3119_vm12, %v5916_v47, %v5964_v51  ;;  %v5627_v38 = vpop.permute.xlu0 %5626 }
 0x960   : > { %6325 = vmatprep.mubr.bf16.mxu0 %v6061_v59  ;;  %v5669_v36 = vsel %vm2398_vm6, %v10229_v3, %v5627_v38  ;;  %v5671_v37 = vsel %vm2398_vm6, %v10353_v63, %v5627_v38 }
 0x961   : > { %v5696_v31 = vsel %vm3119_vm12, %v5669_v36, %v5643_v45 }
 0x962   : > { %v5918_v60 = vpop.permute.xlu1 %5917  ;;  %v5765_v58 = vshrl.u32 %v5696_v31, 16  ;;  %v5768_v5 = vshll.u32 %v5696_v31, 16  ;;  %5933 = vrot.lane.b32.xlu1 %v5696_v31, %s8241_s19  ;;  %6326 = vmatmul.mubr.bf16.gmra.mxu0 %v5999_v9  ;;  %v5821_v9 = vsel %vm8590_vm7, 0, %v10462_v61 }
 0x963   : > { %v5966_v17 = vpop.permute.xlu0 %5965  ;;  %v6003_v55 = vsel %vm2587_vm15, %v5819_v23, %v5918_v60 }
 0x964   : > { %v5767_v39 = vrot.slane %v5765_v58, 7  ;;  %8077 = vmatprep.mubr.msk.bf16.mxu1 %vm2398_vm6, %v5966_v17  ;;  %v6064_v3 = vsel %vm3119_vm12, %v5918_v60, %v5966_v17  ;;  %v5853_v6 = vrot.slane %v5768_v5, 1 }
 0x965   : > { %6333 = vmatprep.mubr.bf16.mxu0 %v6064_v3 }
 0x966   : > { %v5645_v32 = vpop.permute.xlu1 %5644  ;;  %v5854_v13 = vor.u32 %v5853_v6, %v5765_v58  ;;  %v10546_v12 = vor.u32 %v5768_v5, %v5767_v39 }
 0x967   : > { %v5698_v50 = vsel %vm3119_vm12, %v5671_v37, %v5645_v32  ;;  %v5968_v46 = vpop.permute.xlu0 %5967 }
 0x968   : > { %v5771_v27 = vshrl.u32 %v5698_v50, 16  ;;  %v5774_v43 = vshll.u32 %v5698_v50, 16  ;;  %8078 = vmatmul.mubr.msk.bf16.gmra.mxu1 %vm2398_vm6, %v5968_v46  ;;  %v5891_v49 = vsel %vm8448_vm5, %v5854_v13, 0 }
 0x969   : > { %5981 = vrot.lane.b32.xlu0 %v5891_v49, %s8242_s9 }
 0x96a   : > { %v5773_v40 = vrot.slane %v5771_v27, 7  ;;  %v5855_v14 = vrot.slane %v5774_v43, 1  ;;  %v5920_v20 = vpop.permute.xlu1 %5919  ;;  %6334 = vmatmul.mubr.bf16.gmra.mxu0 %v6003_v55 }
 0x96b   : > { %v5629_v0 = vpop.permute.xlu0 %5628  ;;  %v6067_v26 = vsel %vm3119_vm12, %v5920_v20, %v5968_v46 }
 0x96c   : > { %v5673_v18 = vsel %vm2398_vm6, %v10353_v63, %v5629_v0  ;;  %v5856_v56 = vor.u32 %v5855_v14, %v5771_v27  ;;  %6341 = vmatprep.mubr.bf16.mxu0 %v6067_v26  ;;  %v10560_v11 = vor.u32 %v5774_v43, %v5773_v40  ;;  %v5820_v63 = vsel %vm8590_vm7, 0, %v10460_v19 }
 0x96d   : > { %5935 = vrot.lane.b32.xlu0 %v5698_v50, %s8241_s19  ;;  %v5699_v25 = vsel %vm3119_vm12, %v5673_v18, %v5645_v32  ;;  %v6007_v7 = vsel %vm2587_vm15, %v5820_v63, %v5920_v20  ;;  %v5675_v53 = vsel %vm2398_vm6, %v10449_v29, %v5629_v0  ;;  %v5822_v18 = vsel %vm8590_vm7, 0, %v10466_v57 }
 0x96e   : > { %v5922_v42 = vpop.permute.xlu1 %5921  ;;  %v5892_v33 = vsel %vm8448_vm5, %v5856_v56, 0  ;;  %v5777_v45 = vshrl.u32 %v5699_v25, 16  ;;  %v5780_v52 = vshll.u32 %v5699_v25, 16  ;;  %v5823_v57 = vsel %vm8590_vm7, 0, %v10475_v4 }
 0x96f   : > { %5983 = vrot.lane.b32.xlu1 %v5892_v33, %s8242_s9  ;;  %v5970_v21 = vpop.permute.xlu0 %5969  ;;  %v6011_v3 = vsel %vm2587_vm15, %v5821_v9, %v5922_v42  ;;  %v5825_v4 = vsel %vm8590_vm7, 0, %v10481_v22 }
 0x970   : > { %v5779_v24 = vrot.slane %v5777_v45, 7  ;;  %8081 = vmatprep.mubr.msk.bf16.mxu1 %vm2398_vm6, %v5970_v21  ;;  %v5857_v34 = vrot.slane %v5780_v52, 1  ;;  %v6070_v48 = vsel %vm3119_vm12, %v5922_v42, %v5970_v21  ;;  %v5824_v21 = vsel %vm8590_vm7, 0, %v10479_v62 }
 0x972   : > { %v5647_v44 = vpop.permute.xlu1 %5646  ;;  %6342 = vmatmul.mubr.bf16.gmra.mxu0 %v6007_v7  ;;  %v5858_v30 = vor.u32 %v5857_v34, %v5777_v45  ;;  %v10575_v10 = vor.u32 %v5780_v52, %v5779_v24 }
 0x973   : > { %v5701_v47 = vsel %vm3119_vm12, %v5675_v53, %v5647_v44  ;;  %5937 = vrot.lane.b32.xlu1 %v5699_v25, %s8241_s19  ;;  %v5972_v54 = vpop.permute.xlu0 %5971  ;;  %6349 = vmatprep.mubr.bf16.mxu0 %v6070_v48  ;;  %v5826_v48 = vsel %vm8590_vm7, 0, %v10527_v16 }
 0x974   : > { %v5783_v19 = vshrl.u32 %v5701_v47, 16  ;;  %v5786_v51 = vshll.u32 %v5701_v47, 16  ;;  %8082 = vmatmul.mubr.msk.bf16.gmra.mxu1 %vm2398_vm6, %v5972_v54  ;;  %v5893_v59 = vsel %vm8448_vm5, %v5858_v30, 0 }
 0x975   : > { %5985 = vrot.lane.b32.xlu0 %v5893_v59, %s8242_s9 }
 0x976   : > { %v5785_v38 = vrot.slane %v5783_v19, 7  ;;  %v5859_v36 = vrot.slane %v5786_v51, 1  ;;  %v5924_v2 = vpop.permute.xlu1 %5923 }
 0x977   : > { %v5631_v31 = vpop.permute.xlu0 %5630  ;;  %v6073_v61 = vsel %vm3119_vm12, %v5924_v2, %v5972_v54  ;;  %v6015_v25 = vsel %vm2587_vm15, %v5822_v18, %v5924_v2 }
 0x978   : > { %v5677_v60 = vsel %vm2398_vm6, %v10449_v29, %v5631_v31  ;;  %v5679_v58 = vsel %vm2398_vm6, %v10491_v35, %v5631_v31  ;;  %v5860_v5 = vor.u32 %v5859_v36, %v5783_v19  ;;  %v10590_v17 = vor.u32 %v5786_v51, %v5785_v38 }
 0x979   : > { %v5704_v39 = vsel %vm3119_vm12, %v5679_v58, %v10023_v1  ;;  %5939 = vrot.lane.b32.xlu0 %v5701_v47, %s8241_s19  ;;  %v5702_v6 = vsel %vm3119_vm12, %v5677_v60, %v5647_v44  ;;  %v5827_v19 = vsel %vm8590_vm7, 0, %v10546_v12  ;;  %v5828_v36 = vsel %vm8590_vm7, 0, %v10560_v11 }
 0x97a   : > { %v5926_v37 = vpop.permute.xlu1 %5925  ;;  %v5795_v32 = vshrl.u32 %v5704_v39, 16  ;;  %v5798_v29 = vshll.u32 %v5704_v39, 16  ;;  %v5894_v35 = vsel %vm8448_vm5, %v5860_v5, 0  ;;  %6350 = vmatmul.mubr.bf16.gmra.mxu0 %v6011_v3  ;;  %v5789_v13 = vshrl.u32 %v5702_v6, 16 }
 0x97b   : > { %5987 = vrot.lane.b32.xlu1 %v5894_v35, %s8242_s9  ;;  %v5974_v50 = vpop.permute.xlu0 %5973  ;;  %v5792_v1 = vshll.u32 %v5702_v6, 16  ;;  %6357 = vmatprep.mubr.bf16.mxu0 %v6073_v61  ;;  %v6019_v45 = vsel %vm2587_vm15, %v5823_v57, %v5926_v37  ;;  %v5829_v58 = vsel %vm8590_vm7, 0, %v10575_v10 }
 0x97c   : > { %v5791_v46 = vrot.slane %v5789_v13, 7  ;;  %8085 = vmatprep.mubr.msk.bf16.mxu1 %vm2398_vm6, %v5974_v50  ;;  %v5863_v27 = vrot.slane %v5798_v29, 1  ;;  %v5797_v43 = vrot.slane %v5795_v32, 7  ;;  %v6076_v42 = vsel %vm3119_vm12, %v5926_v37, %v5974_v50 }
 0x97d   : > { %v5861_v49 = vrot.slane %v5792_v1, 1 }
 0x97e   : > { %v5976_v23 = vpop.permute.xlu1 %5975  ;;  %v5864_v55 = vor.u32 %v5863_v27, %v5795_v32  ;;  %v10602_v40 = vor.u32 %v5792_v1, %v5791_v46  ;;  %v10604_v14 = vor.u32 %v5798_v29, %v5797_v43  ;;  %v6143_v46 = vsub.s32 4, %v11260_v8 }
 0x97f   : > { %5941 = vrot.lane.b32.xlu1 %v5702_v6, %s8241_s19  ;;  %8086 = vmatmul.mubr.msk.bf16.gmra.mxu1 %vm2398_vm6, %v5976_v23  ;;  %v5928_v20 = vpop.permute.xlu0 %5927  ;;  %v5862_v0 = vor.u32 %v5861_v49, %v5789_v13  ;;  %v5830_v6 = vsel %vm8590_vm7, 0, %v10590_v17  ;;  %v8222_v49 = vld [vmem:[%s11206_s7] sm:$0x3f] }
 0x980   : > { %v5896_v26 = vsel %vm8448_vm5, %v5864_v55, 0  ;;  %v6079_v52 = vsel %vm3119_vm12, %v5928_v20, %v5976_v23  ;;  %v6023_v63 = vsel %vm2587_vm15, %v5824_v21, %v5928_v20  ;;  %v5831_v35 = vsel %vm8590_vm7, 0, %v10602_v40 }
 0x981   : > { %v5895_v56 = vsel %vm8448_vm5, %v5862_v0, 0  ;;  %v5832_v50 = vsel %vm8590_vm7, 0, %v10604_v14  ;;  %v10681_v23 = vrot.slane %v8222_v49, %v6143_v46 }
 0x982   : > { %5989 = vrot.lane.b32.xlu0 %v5895_v56, %s8242_s9  ;;  %6358 = vmatmul.mubr.bf16.gmra.mxu0 %v6015_v25  ;;  %v5930_v24 = vpop.permute.xlu1 %5929 }
 0x983   : > { %5991 = vrot.lane.b32.xlu1 %v5896_v26, %s8242_s9  ;;  %v5978_v33 = vpop.permute.xlu0 %5977  ;;  %6365 = vmatprep.mubr.bf16.mxu0 %v6076_v42  ;;  %v6027_v7 = vsel %vm2587_vm15, %v5825_v4, %v5930_v24 }
 0x984   : > { %8089 = vmatprep.mubr.msk.bf16.mxu1 %vm2398_vm6, %v5978_v33  ;;  %v6082_v34 = vsel %vm3119_vm12, %v5930_v24, %v5978_v33 }
 0x986   : > { %5943 = vrot.lane.b32.xlu0 %v5704_v39, %s8241_s19 }
 0x98a   : > { %6366 = vmatmul.mubr.bf16.gmra.mxu0 %v6019_v45 }
 0x98b   : > { %6373 = vmatprep.mubr.bf16.mxu0 %v6079_v52 }
 0x992   : > { %6374 = vmatmul.mubr.bf16.gmra.mxu0 %v6023_v63 }
 0x993   : > { %6381 = vmatprep.mubr.bf16.mxu0 %v6082_v34 }
 0x99a   : > { %6382 = vmatmul.mubr.bf16.gmra.mxu0 %v6027_v7 }
 0x9c8   : > { %v5932_v53 = vpop.permute.xlu0 %5931 }
 0x9c9   : > { %v6031_v30 = vsel %vm2587_vm15, %v5826_v48, %v5932_v53 }
 0x9cf   : > { %v5980_v44 = vpop.permute.xlu1 %5979 }
 0x9d0   : > { %8090 = vmatmul.mubr.msk.bf16.gmra.mxu1 %vm2398_vm6, %v5980_v44  ;;  %v6085_v62 = vsel %vm3119_vm12, %v5932_v53, %v5980_v44 }
 0x9d1   : > { %6389 = vmatprep.mubr.bf16.mxu0 %v6085_v62 }
 0x9d2   : > { %6390 = vmatmul.mubr.bf16.gmra.mxu0 %v6031_v30 }
 0x9d4   : > { %v5934_v47 = vpop.permute.xlu1 %5933 }
 0x9d5   : > { %v6035_v51 = vsel %vm2587_vm15, %v5827_v19, %v5934_v47 }
 0x9db   : > { %v5982_v54 = vpop.permute.xlu0 %5981 }
 0x9dc   : > { %8093 = vmatprep.mubr.msk.bf16.mxu1 %vm2398_vm6, %v5982_v54  ;;  %v6088_v22 = vsel %vm3119_vm12, %v5934_v47, %v5982_v54 }
 0x9dd   : > { %6397 = vmatprep.mubr.bf16.mxu0 %v6088_v22 }
 0x9de   : > { %6398 = vmatmul.mubr.bf16.gmra.mxu0 %v6035_v51 }
 0x9df   : > { %v5936_v59 = vpop.permute.xlu0 %5935 }
 0x9e0   : > { %v6039_v2 = vsel %vm2587_vm15, %v5828_v36, %v5936_v59 }
 0x9e1   : > { %v5984_v16 = vpop.permute.xlu1 %5983 }
 0x9e2   : > { %8094 = vmatmul.mubr.msk.bf16.gmra.mxu1 %vm2398_vm6, %v5984_v16  ;;  %v6091_v38 = vsel %vm3119_vm12, %v5936_v59, %v5984_v16 }
 0x9e3   : > { %6405 = vmatprep.mubr.bf16.mxu0 %v6091_v38 }
 0x9e5   : > { %v5938_v31 = vpop.permute.xlu1 %5937 }
 0x9e6   : > { %6406 = vmatmul.mubr.bf16.gmra.mxu0 %v6039_v2  ;;  %v6043_v5 = vsel %vm2587_vm15, %v5829_v58, %v5938_v31 }
 0x9e7   : > { %v5986_v12 = vpop.permute.xlu0 %5985 }
 0x9e8   : > { %8097 = vmatprep.mubr.msk.bf16.mxu1 %vm2398_vm6, %v5986_v12  ;;  %v6094_v9 = vsel %vm3119_vm12, %v5938_v31, %v5986_v12 }
 0x9e9   : > { %6413 = vmatprep.mubr.bf16.mxu0 %v6094_v9 }
 0x9eb   : > { %v5940_v60 = vpop.permute.xlu0 %5939 }
 0x9ec   : > { %v6047_v37 = vsel %vm2587_vm15, %v5830_v6, %v5940_v60 }
 0x9ed   : > { %v5988_v39 = vpop.permute.xlu1 %5987 }
 0x9ee   : > { %8098 = vmatmul.mubr.msk.bf16.gmra.mxu1 %vm2398_vm6, %v5988_v39  ;;  %6414 = vmatmul.mubr.bf16.gmra.mxu0 %v6043_v5  ;;  %v6097_v11 = vsel %vm3119_vm12, %v5940_v60, %v5988_v39 }
 0x9ef   : > { %6421 = vmatprep.mubr.bf16.mxu0 %v6097_v11 }
 0x9f1   : > { %v5942_v3 = vpop.permute.xlu1 %5941 }
 0x9f2   : > { %v6051_v13 = vsel %vm2587_vm15, %v5831_v35, %v5942_v3 }
 0x9f4   : > { %v5990_v61 = vpop.permute.xlu0 %5989 }
 0x9f5   : > { %v5992_v32 = vpop.permute.xlu1 %5991  ;;  %8101 = vmatprep.mubr.msk.bf16.mxu1 %vm2398_vm6, %v5990_v61  ;;  %v6100_v10 = vsel %vm3119_vm12, %v5942_v3, %v5990_v61 }
 0x9f6   : > { %8102 = vmatmul.mubr.msk.bf16.gmra.mxu1 %vm2398_vm6, %v5992_v32  ;;  %6422 = vmatmul.mubr.bf16.gmra.mxu0 %v6047_v37 }
 0x9f7   : > { %6429 = vmatprep.mubr.bf16.mxu0 %v6100_v10 }
 0x9f8   : > { %v5944_v29 = vpop.permute.xlu0 %5943 }
 0x9f9   : > { %v6103_v17 = vsel %vm3119_vm12, %v5944_v29, %v5992_v32  ;;  %v6055_v1 = vsel %vm2587_vm15, %v5832_v50, %v5944_v29 }
 0x9fe   : > { %6430 = vmatmul.mubr.bf16.gmra.mxu0 %v6051_v13 }
 0x9ff   : > { %6437 = vmatprep.mubr.bf16.mxu0 %v6103_v17 }
 0xa06   : > { %6438 = vmatmul.mubr.bf16.gmra.mxu0 %v6055_v1 }
 0xa1a   : > { %v7895_v27 = vpop.f32.mrf.mxu0 }
 0xa1c   : > { %v7896_v43 = vpop.f32.mrf.mxu0 }
 0xa1d   : > { %v7897_v55 = vadd.f32 %v7896_v43, %v7895_v27 }
 0xa1e   : > { %v7898_v40 = vpop.f32.mrf.mxu0 }
 0xa1f   : > { %v8075_v20 = vpop.f32.mrf.mxu1  ;;  %v6320_v0 = vadd.f32 %v7897_v55, %v10681_v23 }
 0xa20   : > { %v7899_v26 = vpop.f32.mrf.mxu0 }
 0xa21   : > { %v6480_v14 = vpop.f32.mrf.mxu1  ;;  %v7900_v18 = vadd.f32 %v7899_v26, %v7898_v40 }
 0xa22   : > { %v7901_v56 = vpop.f32.mrf.mxu0  ;;  %v6481_v33 = vadd.f32 %v6480_v14, %v6320_v0 }
 0xa23   : > { %v8076_v25 = vpop.f32.mrf.mxu1  ;;  %v6323_v42 = vadd.f32 %v7900_v18, %v10681_v23 }
 0xa24   : > { %v7902_v57 = vpop.f32.mrf.mxu0  ;;  %v6607_v34 = vmax.f32 %v6481_v33, 0.0 }
 0xa25   : > { %v6483_v45 = vpop.f32.mrf.mxu1  ;;  %v7903_v52 = vadd.f32 %v7902_v57, %v7901_v56 }
 0xa26   : > { %v6484_v21 = vadd.f32 %v6483_v45, %v6323_v42  ;;  %v7904_v24 = vpop.f32.mrf.mxu0 }
 0xa27   : > { %v6328_v63 = vadd.f32 %v7903_v52, %v10681_v23 }
 0xa28   : > { %v6608_v4 = vmax.f32 %v6484_v21, 0.0  ;;  %v7905_v7 = vpop.f32.mrf.mxu0  ;;  %v8079_v53 = vpop.f32.mrf.mxu1 }
 0xa29   : > { %v7906_v44 = vadd.f32 %v7905_v7, %v7904_v24  ;;  %v6489_v30 = vadd.f32 %v8075_v20, %v6328_v63 }
 0xa2a   : > { %v10686_v62 = vpack.c.bf16 %v6608_v4, %v6607_v34  ;;  %v7907_v48 = vpop.f32.mrf.mxu0  ;;  %v6496_v54 = vpop.f32.mrf.mxu1 }
 0xa2b   : > { %v6331_v47 = vadd.f32 %v7906_v44, %v10681_v23  ;;  %v6609_v16 = vmax.f32 %v6489_v30, 0.0 }
 0xa2c   : > { %6671 = vrot.lane.b32.xlu1 %v10686_v62, %s8238_s21  ;;  %v7908_v22 = vpop.f32.mrf.mxu0  ;;  %v8080_v2 = vpop.f32.mrf.mxu1 }
 0xa2d   : > { %v6492_v19 = vadd.f32 %v8076_v25, %v6331_v47  ;;  %v7909_v51 = vadd.f32 %v7908_v22, %v7907_v48 }
 0xa2e   : > { %v7910_v59 = vpop.f32.mrf.mxu0  ;;  %v6499_v39 = vpop.f32.mrf.mxu1 }
 0xa2f   : > { %v6610_v38 = vmax.f32 %v6492_v19, 0.0  ;;  %v6336_v36 = vadd.f32 %v7909_v51, %v10681_v23 }
 0xa30   : > { %v7911_v31 = vpop.f32.mrf.mxu0 }
 0xa31   : > { %v10692_v12 = vpack.c.bf16 %v6610_v38, %v6609_v16  ;;  %v7912_v9 = vadd.f32 %v7911_v31, %v7910_v59  ;;  %v6497_v58 = vadd.f32 %v6496_v54, %v6336_v36 }
 0xa32   : > { %v7913_v60 = vpop.f32.mrf.mxu0 }
 0xa33   : > { %v6339_v5 = vadd.f32 %v7912_v9, %v10681_v23  ;;  %6703 = vrot.lane.b32.xlu0 %v10692_v12, %s8239_s22  ;;  %6673 = vrot.lane.b32.xlu1 %v10692_v12, %s8238_s21  ;;  %v6611_v37 = vmax.f32 %v6497_v58, 0.0 }
 0xa34   : > { %v7914_v11 = vpop.f32.mrf.mxu0  ;;  %v8083_v29 = vpop.f32.mrf.mxu1 }
 0xa35   : > { %v6500_v3 = vadd.f32 %v6499_v39, %v6339_v5  ;;  %v7915_v6 = vadd.f32 %v7914_v11, %v7913_v60 }
 0xa36   : > { %v7916_v61 = vpop.f32.mrf.mxu0  ;;  %v6512_v27 = vpop.f32.mrf.mxu1 }
 0xa37   : > { %v6612_v32 = vmax.f32 %v6500_v3, 0.0  ;;  %v6344_v10 = vadd.f32 %v7915_v6, %v10681_v23 }
 0xa38   : > { %v7917_v35 = vpop.f32.mrf.mxu0  ;;  %v8084_v14 = vpop.f32.mrf.mxu1 }
 0xa39   : > { %v10700_v13 = vpack.c.bf16 %v6612_v32, %v6611_v37  ;;  %v7918_v17 = vadd.f32 %v7917_v35, %v7916_v61  ;;  %v6505_v1 = vadd.f32 %v8079_v53, %v6344_v10 }
 0xa3a   : > { %v7919_v50 = vpop.f32.mrf.mxu0  ;;  %v6515_v45 = vpop.f32.mrf.mxu1 }
 0xa3b   : > { %v6347_v46 = vadd.f32 %v7918_v17, %v10681_v23  ;;  %6705 = vrot.lane.b32.xlu0 %v10700_v13, %s8239_s22  ;;  %6675 = vrot.lane.b32.xlu1 %v10700_v13, %s8238_s21  ;;  %v6613_v20 = vmax.f32 %v6505_v1, 0.0 }
 0xa3c   : > { %v7920_v43 = vpop.f32.mrf.mxu0 }
 0xa3d   : > { %v6508_v49 = vadd.f32 %v8080_v2, %v6347_v46  ;;  %v7921_v55 = vadd.f32 %v7920_v43, %v7919_v50 }
 0xa3e   : > { %v7922_v40 = vpop.f32.mrf.mxu0 }
 0xa3f   : > { %v6614_v0 = vmax.f32 %v6508_v49, 0.0  ;;  %v6352_v26 = vadd.f32 %v7921_v55, %v10681_v23  ;;  %v8087_v53 = vpop.f32.mrf.mxu1 }
 0xa40   : > { %v7923_v18 = vpop.f32.mrf.mxu0 }
 0xa41   : > { %v10708_v56 = vpack.c.bf16 %v6614_v0, %v6613_v20  ;;  %v7924_v25 = vadd.f32 %v7923_v18, %v7922_v40  ;;  %v6513_v33 = vadd.f32 %v6512_v27, %v6352_v26  ;;  %v6528_v19 = vpop.f32.mrf.mxu1  ;;  %v8211_v0 = vld [vmem:[%s11205_s6 + $0x38] sm:$0xff]   ;;  %v8212_v26 = vld [vmem:[%s11205_s6 + $0x30] sm:$0xff]   ;;  %v8214_v18 = vld [vmem:[%s11205_s6 + $0x20] sm:$0xff]  }
 0xa42   : > { %v7925_v42 = vpop.f32.mrf.mxu0  ;;  %7307 = vmatpush1.bf16.msra.mxu1 %v8211_v0 }
 0xa43   : > { %v6355_v57 = vadd.f32 %v7924_v25, %v10681_v23  ;;  %6707 = vrot.lane.b32.xlu0 %v10708_v56, %s8239_s22  ;;  %6677 = vrot.lane.b32.xlu1 %v10708_v56, %s8238_s21  ;;  %v6615_v34 = vmax.f32 %v6513_v33, 0.0  ;;  %v8088_v9 = vpop.f32.mrf.mxu1  ;;  %v8215_v25 = vld [vmem:[%s11205_s6 + $0x18] sm:$0xff]  }
 0xa44   : > { %v7926_v52 = vpop.f32.mrf.mxu0  ;;  %7308 = vmatprep.subr.bf16.mxu1 %v11254_v15 }
 0xa45   : > { %v6516_v21 = vadd.f32 %v6515_v45, %v6355_v57  ;;  %v7927_v24 = vadd.f32 %v7926_v52, %v7925_v42  ;;  %v6531_v6 = vpop.f32.mrf.mxu1 }
 0xa46   : > { %v7928_v63 = vpop.f32.mrf.mxu0  ;;  %7309 = vmatpush1.bf16.msra.mxu1 %v8212_v26 }
 0xa47   : > { %v6616_v4 = vmax.f32 %v6516_v21, 0.0  ;;  %v6360_v7 = vadd.f32 %v7927_v24, %v10681_v23  ;;  %7310 = vmatprep.subr.bf16.mxu1 %v11254_v15 }
 0xa48   : > { %v7929_v44 = vpop.f32.mrf.mxu0 }
 0xa49   : > { %v10716_v48 = vpack.c.bf16 %v6616_v4, %v6615_v34  ;;  %v7930_v30 = vadd.f32 %v7929_v44, %v7928_v63  ;;  %v6521_v54 = vadd.f32 %v8083_v29, %v6360_v7  ;;  %v8216_v7 = vld [vmem:[%s11205_s6 + $0x10] sm:$0xff]  }
 0xa4a   : > { %v7931_v47 = vpop.f32.mrf.mxu0 }
 0xa4b   : > { %v6363_v22 = vadd.f32 %v7930_v30, %v10681_v23  ;;  %6709 = vrot.lane.b32.xlu0 %v10716_v48, %s8239_s22  ;;  %6679 = vrot.lane.b32.xlu1 %v10716_v48, %s8238_s21  ;;  %v6617_v36 = vmax.f32 %v6521_v54, 0.0 }
 0xa4c   : > { %v7932_v51 = vpop.f32.mrf.mxu0 }
 0xa4d   : > { %v6524_v59 = vadd.f32 %v8084_v14, %v6363_v22  ;;  %v7933_v16 = vadd.f32 %v7932_v51, %v7931_v47  ;;  %v8213_v14 = vld [vmem:[%s11205_s6 + $0x28] sm:$0xff]  }
 0xa4e   : > { %v7934_v38 = vpop.f32.mrf.mxu0  ;;  %7311 = vmatpush1.bf16.msra.mxu1 %v8213_v14 }
 0xa4f   : > { %v6618_v2 = vmax.f32 %v6524_v59, 0.0  ;;  %v6368_v31 = vadd.f32 %v7933_v16, %v10681_v23  ;;  %7312 = vmatprep.subr.bf16.mxu1 %v11254_v15 }
 0xa50   : > { %v7935_v60 = vpop.f32.mrf.mxu0 }
 0xa51   : > { %v10724_v58 = vpack.c.bf16 %v6618_v2, %v6617_v36  ;;  %v7936_v5 = vadd.f32 %v7935_v60, %v7934_v38  ;;  %v6529_v11 = vadd.f32 %v6528_v19, %v6368_v31  ;;  %v8217_v31 = vld [vmem:[%s11205_s6 + $0x8] sm:$0xff]  }
 0xa52   : > { %v7937_v39 = vpop.f32.mrf.mxu0  ;;  %7313 = vmatpush1.bf16.msra.mxu1 %v8214_v18 }
 0xa53   : > { %v6371_v3 = vadd.f32 %v7936_v5, %v10681_v23  ;;  %6681 = vrot.lane.b32.xlu1 %v10724_v58, %s8238_s21  ;;  %6711 = vrot.lane.b32.xlu0 %v10724_v58, %s8239_s22  ;;  %v6619_v29 = vmax.f32 %v6529_v11, 0.0 }
 0xa54   : > { %v7938_v61 = vpop.f32.mrf.mxu0  ;;  %7314 = vmatprep.subr.bf16.mxu1 %v11254_v15 }
 0xa55   : > { %v6532_v37 = vadd.f32 %v6531_v6, %v6371_v3  ;;  %v7939_v32 = vadd.f32 %v7938_v61, %v7937_v39  ;;  %v8218_v39 = vld [vmem:[%s11205_s6] sm:$0xff]  }
 0xa56   : > { %v7940_v10 = vpop.f32.mrf.mxu0  ;;  %7315 = vmatpush1.bf16.msra.mxu1 %v8215_v25 }
 0xa57   : > { %v6620_v35 = vmax.f32 %v6532_v37, 0.0  ;;  %v6376_v17 = vadd.f32 %v7939_v32, %v10681_v23  ;;  %7316 = vmatprep.subr.bf16.mxu1 %v11254_v15  ;;  %v8219_v37 = vld [vmem:[%s11205_s6 + $0x40] sm:$0xff]  }
 0xa58   : > { %v7941_v50 = vpop.f32.mrf.mxu0 }
 0xa59   : > { %v10732_v1 = vpack.c.bf16 %v6620_v35, %v6619_v29  ;;  %v7942_v46 = vadd.f32 %v7941_v50, %v7940_v10  ;;  %v6537_v27 = vadd.f32 %v8087_v53, %v6376_v17 }
 0xa5a   : > { %v7943_v42 = vpop.f32.mrf.mxu0  ;;  %7317 = vmatpush1.bf16.msra.mxu1 %v8216_v7 }
 0xa5b   : > { %v6379_v43 = vadd.f32 %v7942_v46, %v10681_v23  ;;  %6683 = vrot.lane.b32.xlu1 %v10732_v1, %s8238_s21  ;;  %6713 = vrot.lane.b32.xlu0 %v10732_v1, %s8239_s22  ;;  %v6621_v55 = vmax.f32 %v6537_v27, 0.0 }
 0xa5c   : > { %v7944_v33 = vpop.f32.mrf.mxu0  ;;  %7318 = vmatprep.subr.bf16.mxu1 %v11254_v15 }
 0xa5d   : > { %v6540_v49 = vadd.f32 %v8088_v9, %v6379_v43  ;;  %v7945_v52 = vadd.f32 %v7944_v33, %v7943_v42 }
 0xa5e   : > { %v7946_v57 = vpop.f32.mrf.mxu0  ;;  %7319 = vmatpush1.bf16.msra.mxu1 %v8217_v31 }
 0xa5f   : > { %v6622_v40 = vmax.f32 %v6540_v49, 0.0  ;;  %v6384_v4 = vadd.f32 %v7945_v52, %v10681_v23  ;;  %7320 = vmatprep.subr.bf16.mxu1 %v11254_v15 }
 0xa60   : > { %v7947_v45 = vpop.f32.mrf.mxu0 }
 0xa61   : > { %v10739_v20 = vpack.c.bf16 %v6622_v40, %v6621_v55  ;;  %v7948_v24 = vadd.f32 %v7947_v45, %v7946_v57 }
 0xa62   : > { %7321 = vmatpush1.bf16.msra.mxu1 %v8218_v39 }
 0xa63   : > { %6685 = vrot.lane.b32.xlu1 %v10739_v20, %s8238_s21  ;;  %6715 = vrot.lane.b32.xlu0 %v10739_v20, %s8239_s22  ;;  %v6387_v54 = vadd.f32 %v7948_v24, %v10681_v23 }
 0xa64   : > { %7336 = vmatprep.subr.bf16.mxu1 %v11254_v15 }
 0xa66   : > { %7337 = vmatpush2.bf16.msra.mxu1 %v8219_v37 }
 0xa90   : > { %v8091_v21 = vpop.f32.mrf.mxu1 }
 0xa92   : > { %v7949_v63 = vpop.f32.mrf.mxu0  ;;  %v6544_v34 = vpop.f32.mrf.mxu1 }
 0xa93   : > { %v6545_v30 = vadd.f32 %v6544_v34, %v6384_v4 }
 0xa94   : > { %v7950_v53 = vpop.f32.mrf.mxu0  ;;  %v8092_v44 = vpop.f32.mrf.mxu1 }
 0xa95   : > { %v7951_v47 = vadd.f32 %v7950_v53, %v7949_v63  ;;  %v6623_v38 = vmax.f32 %v6545_v30, 0.0 }
 0xa96   : > { %v7952_v22 = vpop.f32.mrf.mxu0  ;;  %v6547_v19 = vpop.f32.mrf.mxu1 }
 0xa97   : > { %v6392_v51 = vadd.f32 %v7951_v47, %v10681_v23  ;;  %v6548_v59 = vadd.f32 %v6547_v19, %v6387_v54 }
 0xa98   : > { %v7953_v16 = vpop.f32.mrf.mxu0 }
 0xa99   : > { %v6624_v36 = vmax.f32 %v6548_v59, 0.0  ;;  %v7954_v2 = vadd.f32 %v7953_v16, %v7952_v22  ;;  %v6553_v9 = vadd.f32 %v8091_v21, %v6392_v51 }
 0xa9b   : > { %v10775_v60 = vpack.c.bf16 %v6624_v36, %v6623_v38  ;;  %v6395_v5 = vadd.f32 %v7954_v2, %v10681_v23  ;;  %v6625_v6 = vmax.f32 %v6553_v9, 0.0 }
 0xa9d   : > { %v6556_v11 = vadd.f32 %v8092_v44, %v6395_v5  ;;  %6687 = vrot.lane.b32.xlu1 %v10775_v60, %s8238_s21  ;;  %6717 = vrot.lane.b32.xlu0 %v10775_v60, %s8239_s22 }
 0xa9e   : > { %v7955_v3 = vpop.f32.mrf.mxu0  ;;  %v6672_v29 = vpop.permute.xlu1 %6671 }
 0xa9f   : > { %v6626_v61 = vmax.f32 %v6556_v11, 0.0  ;;  %v6736_v43 = vsel %vm2374_vm4, 0, %v6672_v29 }
 0xaa0   : > { %v7956_v32 = vpop.f32.mrf.mxu0 }
 0xaa1   : > { %v10790_v10 = vpack.c.bf16 %v6626_v61, %v6625_v6  ;;  %v7957_v17 = vadd.f32 %v7956_v32, %v7955_v3 }
 0xaa2   : > { %v8095_v35 = vpop.f32.mrf.mxu1  ;;  %v7958_v50 = vpop.f32.mrf.mxu0 }
 0xaa3   : > { %6719 = vrot.lane.b32.xlu0 %v10790_v10, %s8239_s22  ;;  %v6400_v40 = vadd.f32 %v7957_v17, %v10681_v23 }
 0xaa4   : > { %v6560_v46 = vpop.f32.mrf.mxu1  ;;  %v7959_v27 = vpop.f32.mrf.mxu0 }
 0xaa5   : > { %v7960_v49 = vadd.f32 %v7959_v27, %v7958_v50  ;;  %v6704_v55 = vpop.permute.xlu0 %6703  ;;  %v6561_v24 = vadd.f32 %v6560_v46, %v6400_v40  ;;  %v6674_v63 = vpop.permute.xlu1 %6673 }
 0xaa6   : > { %v8096_v0 = vpop.f32.mrf.mxu1  ;;  %v6783_v26 = vsel %vm2398_vm6, %v6736_v43, %v6704_v55  ;;  %v7961_v14 = vpop.f32.mrf.mxu0  ;;  %v6739_v47 = vsel %vm2374_vm4, %v10686_v62, %v6674_v63 }
 0xaa7   : > { %v6403_v18 = vadd.f32 %v7960_v49, %v10681_v23  ;;  %v6814_v25 = vshrl.u32 %v6783_v26, 16  ;;  %v6817_v42 = vshll.u32 %v6783_v26, 16  ;;  %7022 = vrot.lane.b32.xlu1 %v6783_v26, %s8240_s18  ;;  %v6627_v51 = vmax.f32 %v6561_v24, 0.0 }
 0xaa8   : > { %v6563_v33 = vpop.f32.mrf.mxu1  ;;  %v7962_v57 = vpop.f32.mrf.mxu0 }
 0xaa9   : > { %v6564_v45 = vadd.f32 %v6563_v33, %v6403_v18  ;;  %v6816_v52 = vrot.slane %v6814_v25, 7  ;;  %v6942_v21 = vrot.slane %v6817_v42, 1  ;;  %v7963_v34 = vadd.f32 %v7962_v57, %v7961_v14 }
 0xaaa   : > { %v7964_v4 = vpop.f32.mrf.mxu0 }
 0xaab   : > { %6689 = vrot.lane.b32.xlu1 %v10790_v10, %s8238_s21  ;;  %v6943_v7 = vor.u32 %v6942_v21, %v6814_v25  ;;  %v10801_v53 = vor.u32 %v6817_v42, %v6816_v52  ;;  %v6628_v44 = vmax.f32 %v6564_v45, 0.0  ;;  %v6408_v59 = vadd.f32 %v7963_v34, %v10681_v23 }
 0xaac   : > { %v7965_v30 = vpop.f32.mrf.mxu0 }
 0xaad   : > { %v7966_v54 = vadd.f32 %v7965_v30, %v7964_v4  ;;  %v6706_v22 = vpop.permute.xlu0 %6705  ;;  %v6990_v19 = vsel %vm8448_vm5, %v6943_v7, 0  ;;  %v10814_v62 = vpack.c.bf16 %v6628_v44, %v6627_v51  ;;  %v6569_v61 = vadd.f32 %v8095_v35, %v6408_v59  ;;  %v6676_v37 = vpop.permute.xlu1 %6675 }
 0xaae   : > { %v10808_v16 = vpop.f32.mrf.mxu1  ;;  %v6785_v38 = vsel %vm2398_vm6, %v6739_v47, %v6706_v22  ;;  %v7967_v36 = vpop.f32.mrf.mxu0  ;;  %7070 = vrot.lane.b32.xlu0 %v6990_v19, %s8241_s19  ;;  %v6742_v49 = vsel %vm2374_vm4, %v10692_v12, %v6676_v37 }
 0xaaf   : > { %v6411_v2 = vadd.f32 %v7966_v54, %v10681_v23  ;;  %v6820_v31 = vshrl.u32 %v6785_v38, 16  ;;  %v6823_v9 = vshll.u32 %v6785_v38, 16  ;;  %7024 = vrot.lane.b32.xlu1 %v6785_v38, %s8240_s18 }
 0xab0   : > { %v6576_v5 = vpop.f32.mrf.mxu1  ;;  %v7968_v39 = vpop.f32.mrf.mxu0 }
 0xab1   : > { %v6572_v11 = vadd.f32 %v8096_v0, %v6411_v2  ;;  %v6822_v3 = vrot.slane %v6820_v31, 7  ;;  %v6944_v6 = vrot.slane %v6823_v9, 1  ;;  %v7969_v32 = vadd.f32 %v7968_v39, %v7967_v36 }
 0xab2   : > { %v7970_v29 = vpop.f32.mrf.mxu0  ;;  %6721 = vrot.lane.b32.xlu0 %v10814_v62, %s8239_s22  ;;  %v8100_v27 = vpop.f32.mrf.mxu1  ;;  %v6629_v0 = vmax.f32 %v6569_v61, 0.0 }
 0xab3   : > { %6691 = vrot.lane.b32.xlu1 %v10814_v62, %s8238_s21  ;;  %v6945_v17 = vor.u32 %v6944_v6, %v6820_v31  ;;  %v10820_v50 = vor.u32 %v6823_v9, %v6822_v3  ;;  %v6630_v46 = vmax.f32 %v6572_v11, 0.0  ;;  %v6416_v26 = vadd.f32 %v7969_v32, %v10681_v23 }
 0xab4   : > { %v7971_v43 = vpop.f32.mrf.mxu0  ;;  %v6579_v57 = vpop.f32.mrf.mxu1 }
 0xab5   : > { %v7972_v55 = vadd.f32 %v7971_v43, %v7970_v29  ;;  %v6708_v35 = vpop.permute.xlu0 %6707  ;;  %v6991_v40 = vsel %vm8448_vm5, %v6945_v17, 0  ;;  %v10831_v12 = vpack.c.bf16 %v6630_v46, %v6629_v0  ;;  %v6577_v63 = vadd.f32 %v6576_v5, %v6416_v26  ;;  %v6678_v34 = vpop.permute.xlu1 %6677 }
 0xab6   : > { %v6787_v14 = vsel %vm2398_vm6, %v6742_v49, %v6708_v35  ;;  %v7973_v18 = vpop.f32.mrf.mxu0  ;;  %7072 = vrot.lane.b32.xlu0 %v6991_v40, %s8241_s19  ;;  %v10839_v54 = vpop.f32.mrf.mxu1  ;;  %v6745_v19 = vsel %vm2374_vm4, %v10700_v13, %v6678_v34 }
 0xab7   : > { %v6419_v25 = vadd.f32 %v7972_v55, %v10681_v23  ;;  %v6826_v42 = vshrl.u32 %v6787_v14, 16  ;;  %v6829_v33 = vshll.u32 %v6787_v14, 16  ;;  %7026 = vrot.lane.b32.xlu1 %v6787_v14, %s8240_s18  ;;  %v6631_v36 = vmax.f32 %v6577_v63, 0.0 }
 0xab8   : > { %v7974_v45 = vpop.f32.mrf.mxu0  ;;  %v6592_v3 = vpop.f32.mrf.mxu1 }
 0xab9   : > { %v6580_v52 = vadd.f32 %v6579_v57, %v6419_v25  ;;  %v6828_v21 = vrot.slane %v6826_v42, 7  ;;  %v6946_v24 = vrot.slane %v6829_v33, 1  ;;  %v7975_v4 = vadd.f32 %v7974_v45, %v7973_v18 }
 0xaba   : > { %v7976_v7 = vpop.f32.mrf.mxu0  ;;  %6723 = vrot.lane.b32.xlu0 %v10831_v12, %s8239_s22  ;;  %v8104_v35 = vpop.f32.mrf.mxu1 }
 0xabb   : > { %6693 = vrot.lane.b32.xlu1 %v10831_v12, %s8238_s21  ;;  %v6947_v44 = vor.u32 %v6946_v24, %v6826_v42  ;;  %v10837_v30 = vor.u32 %v6829_v33, %v6828_v21  ;;  %v6632_v47 = vmax.f32 %v6580_v52, 0.0  ;;  %v6424_v2 = vadd.f32 %v7975_v4, %v10681_v23 }
 0xabc   : > { %v7977_v22 = vpop.f32.mrf.mxu0 }
 0xabd   : > { %v7978_v51 = vadd.f32 %v7977_v22, %v7976_v7  ;;  %v6710_v59 = vpop.permute.xlu0 %6709  ;;  %v6992_v38 = vsel %vm8448_vm5, %v6947_v44, 0  ;;  %v10850_v13 = vpack.c.bf16 %v6632_v47, %v6631_v36  ;;  %v6585_v29 = vadd.f32 %v10808_v16, %v6424_v2  ;;  %v6680_v17 = vpop.permute.xlu1 %6679 }
 0xabe   : > { %v6789_v31 = vsel %vm2398_vm6, %v6745_v19, %v6710_v59  ;;  %v7979_v9 = vpop.f32.mrf.mxu0  ;;  %7074 = vrot.lane.b32.xlu0 %v6992_v38, %s8241_s19 }
 0xabf   : > { %v6427_v5 = vadd.f32 %v7978_v51, %v10681_v23  ;;  %v6832_v39 = vshrl.u32 %v6789_v31, 16  ;;  %v6835_v11 = vshll.u32 %v6789_v31, 16  ;;  %7028 = vrot.lane.b32.xlu1 %v6789_v31, %s8240_s18  ;;  %v6633_v18 = vmax.f32 %v6585_v29, 0.0 }
 0xac0   : > { %v7980_v6 = vpop.f32.mrf.mxu0 }
 0xac1   : > { %v6588_v61 = vadd.f32 %v8100_v27, %v6427_v5  ;;  %v6834_v37 = vrot.slane %v6832_v39, 7  ;;  %v6948_v32 = vrot.slane %v6835_v11, 1  ;;  %v7981_v46 = vadd.f32 %v7980_v6, %v7979_v9 }
 0xac2   : > { %v7982_v43 = vpop.f32.mrf.mxu0  ;;  %6725 = vrot.lane.b32.xlu0 %v10850_v13, %s8239_s22  ;;  %v6748_v27 = vsel %vm2374_vm4, %v10708_v56, %v6680_v17  ;;  %v6595_v56 = vpop.f32.mrf.mxu1 }
 0xac3   : > { %6695 = vrot.lane.b32.xlu1 %v10850_v13, %s8238_s21  ;;  %v6949_v49 = vor.u32 %v6948_v32, %v6832_v39  ;;  %v10857_v55 = vor.u32 %v6835_v11, %v6834_v37  ;;  %v6634_v40 = vmax.f32 %v6588_v61, 0.0  ;;  %v6432_v25 = vadd.f32 %v7981_v46, %v10681_v23 }
 0xac4   : > { %v7983_v0 = vpop.f32.mrf.mxu0 }
 0xac5   : > { %v7984_v26 = vadd.f32 %v7983_v0, %v7982_v43  ;;  %v6712_v16 = vpop.permute.xlu0 %6711  ;;  %v6993_v14 = vsel %vm8448_vm5, %v6949_v49, 0  ;;  %v10868_v21 = vpack.c.bf16 %v6634_v40, %v6633_v18  ;;  %v6593_v7 = vadd.f32 %v6592_v3, %v6432_v25  ;;  %v6682_v44 = vpop.permute.xlu1 %6681 }
 0xac6   : > { %v6791_v42 = vsel %vm2398_vm6, %v6748_v27, %v6712_v16  ;;  %v7985_v33 = vpop.f32.mrf.mxu0  ;;  %7076 = vrot.lane.b32.xlu0 %v6993_v14, %s8241_s19  ;;  %v6751_v36 = vsel %vm2374_vm4, %v10716_v48, %v6682_v44 }
 0xac7   : > { %v6435_v57 = vadd.f32 %v7984_v26, %v10681_v23  ;;  %v6838_v45 = vshrl.u32 %v6791_v42, 16  ;;  %v6841_v52 = vshll.u32 %v6791_v42, 16  ;;  %7030 = vrot.lane.b32.xlu1 %v6791_v42, %s8240_s18  ;;  %v6635_v5 = vmax.f32 %v6593_v7, 0.0 }
 0xac8   : > { %v7986_v24 = vpop.f32.mrf.mxu0 }
 0xac9   : > { %v6596_v63 = vadd.f32 %v6595_v56, %v6435_v57  ;;  %v6840_v34 = vrot.slane %v6838_v45, 7  ;;  %v6950_v4 = vrot.slane %v6841_v52, 1  ;;  %v7987_v47 = vadd.f32 %v7986_v24, %v7985_v33 }
 0xaca   : > { %v7988_v22 = vpop.f32.mrf.mxu0  ;;  %6727 = vrot.lane.b32.xlu0 %v10868_v21, %s8239_s22 }
 0xacb   : > { %6697 = vrot.lane.b32.xlu1 %v10868_v21, %s8238_s21  ;;  %v6951_v19 = vor.u32 %v6950_v4, %v6838_v45  ;;  %v10874_v51 = vor.u32 %v6841_v52, %v6840_v34  ;;  %v6636_v59 = vmax.f32 %v6596_v63, 0.0  ;;  %v6440_v39 = vadd.f32 %v7987_v47, %v10681_v23 }
 0xacc   : > { %v7989_v38 = vpop.f32.mrf.mxu0 }
 0xacd   : > { %v7990_v2 = vadd.f32 %v7989_v38, %v7988_v22  ;;  %v6714_v31 = vpop.permute.xlu0 %6713  ;;  %v6994_v9 = vsel %vm8448_vm5, %v6951_v19, 0  ;;  %v10885_v37 = vpack.c.bf16 %v6636_v59, %v6635_v5  ;;  %v6601_v17 = vadd.f32 %v10839_v54, %v6440_v39  ;;  %v6684_v46 = vpop.permute.xlu1 %6683 }
 0xace   : > { %v6793_v11 = vsel %vm2398_vm6, %v6751_v36, %v6714_v31  ;;  %7078 = vrot.lane.b32.xlu0 %v6994_v9, %s8241_s19  ;;  %v6754_v40 = vsel %vm2374_vm4, %v10724_v58, %v6684_v46 }
 0xacf   : > { %v6443_v3 = vadd.f32 %v7990_v2, %v10681_v23  ;;  %v6844_v6 = vshrl.u32 %v6793_v11, 16  ;;  %v6847_v61 = vshll.u32 %v6793_v11, 16  ;;  %7032 = vrot.lane.b32.xlu1 %v6793_v11, %s8240_s18  ;;  %v6637_v27 = vmax.f32 %v6601_v17, 0.0 }
 0xad0   : > { %v6926_v11 = vsel %vm8590_vm7, 0, %v10801_v53  ;;  %v6927_v53 = vsel %vm8590_vm7, 0, %v10820_v50 }
 0xad1   : > { %v6604_v48 = vadd.f32 %v8104_v35, %v6443_v3  ;;  %v6846_v32 = vrot.slane %v6844_v6, 7  ;;  %v6952_v29 = vrot.slane %v6847_v61, 1 }
 0xad2   : > { %6729 = vrot.lane.b32.xlu0 %v10885_v37, %s8239_s22 }
 0xad3   : > { %6699 = vrot.lane.b32.xlu1 %v10885_v37, %s8238_s21  ;;  %v6953_v43 = vor.u32 %v6952_v29, %v6844_v6  ;;  %v10892_v23 = vor.u32 %v6847_v61, %v6846_v32  ;;  %v6638_v49 = vmax.f32 %v6604_v48, 0.0 }
 0xad5   : > { %v6716_v0 = vpop.permute.xlu0 %6715  ;;  %v6995_v35 = vsel %vm8448_vm5, %v6953_v43, 0  ;;  %v6654_v14 = vpack.c.bf16 %v6638_v49, %v6637_v27  ;;  %v6686_v57 = vpop.permute.xlu1 %6685 }
 0xad6   : > { %v6795_v54 = vsel %vm2398_vm6, %v6754_v40, %v6716_v0  ;;  %7080 = vrot.lane.b32.xlu0 %v6995_v35, %s8241_s19  ;;  %v6757_v45 = vsel %vm2374_vm4, %v10732_v1, %v6686_v57 }
 0xad7   : > { %v6850_v26 = vshrl.u32 %v6795_v54, 16  ;;  %v6853_v16 = vshll.u32 %v6795_v54, 16  ;;  %7034 = vrot.lane.b32.xlu1 %v6795_v54, %s8240_s18 }
 0xad9   : > { %v6852_v18 = vrot.slane %v6850_v26, 7  ;;  %v6954_v25 = vrot.slane %v6853_v16, 1 }
 0xada   : > { %6731 = vrot.lane.b32.xlu0 %v6654_v14, %s8239_s22 }
 0xadb   : > { %6701 = vrot.lane.b32.xlu1 %v6654_v14, %s8238_s21  ;;  %v6955_v58 = vor.u32 %v6954_v25, %v6850_v26  ;;  %v10903_v42 = vor.u32 %v6853_v16, %v6852_v18 }
 0xadd   : > { %v6996_v33 = vsel %vm8448_vm5, %v6955_v58, 0 }
 0xade   : > { %7082 = vrot.lane.b32.xlu0 %v6996_v33, %s8241_s19 }
 0xae2   : > { %6733 = vrot.lane.b32.xlu0 %v11254_v15, %s8239_s22 }
 0xb0f   : > { %v6718_v52 = vpop.permute.xlu0 %6717  ;;  %v6688_v34 = vpop.permute.xlu1 %6687 }
 0xb10   : > { %v6797_v56 = vsel %vm2398_vm6, %v6757_v45, %v6718_v52  ;;  %v6760_v44 = vsel %vm2374_vm4, %v10739_v20, %v6688_v34  ;;  %v6928_v45 = vsel %vm8590_vm7, 0, %v10837_v30 }
 0xb11   : > { %v6856_v24 = vshrl.u32 %v6797_v56, 16  ;;  %v6859_v63 = vshll.u32 %v6797_v56, 16  ;;  %7036 = vrot.lane.b32.xlu1 %v6797_v56, %s8240_s18 }
 0xb13   : > { %v6858_v4 = vrot.slane %v6856_v24, 7  ;;  %v6956_v7 = vrot.slane %v6859_v63, 1 }
 0xb15   : > { %v6720_v47 = vpop.permute.xlu0 %6719  ;;  %v6957_v22 = vor.u32 %v6956_v7, %v6856_v24  ;;  %v10916_v15 = vor.u32 %v6859_v63, %v6858_v4 }
 0xb16   : > { %v6799_v19 = vsel %vm2398_vm6, %v6760_v44, %v6720_v47 }
 0xb17   : > { %v6862_v1 = vshrl.u32 %v6799_v19, 16  ;;  %v6865_v59 = vshll.u32 %v6799_v19, 16  ;;  %7038 = vrot.lane.b32.xlu1 %v6799_v19, %s8240_s18  ;;  %v6997_v38 = vsel %vm8448_vm5, %v6957_v22, 0 }
 0xb18   : > { %7084 = vrot.lane.b32.xlu0 %v6997_v38, %s8241_s19  ;;  %v6929_v38 = vsel %vm8590_vm7, 0, %v10857_v55 }
 0xb19   : > { %v6864_v36 = vrot.slane %v6862_v1, 7  ;;  %v6958_v2 = vrot.slane %v6865_v59, 1  ;;  %v7023_v31 = vpop.permute.xlu1 %7022 }
 0xb1a   : > { %v7104_v3 = vsel %vm2562_vm11, %v6926_v11, %v7023_v31 }
 0xb1b   : > { %v6959_v9 = vor.u32 %v6958_v2, %v6862_v1  ;;  %v10923_v20 = vor.u32 %v6865_v59, %v6864_v36 }
 0xb1d   : > { %v6690_v5 = vpop.permute.xlu1 %6689  ;;  %v6998_v39 = vsel %vm8448_vm5, %v6959_v9, 0  ;;  %v6934_v28 = vsel %vm8590_vm7, 0, %v10923_v20 }
 0xb1e   : > { %7086 = vrot.lane.b32.xlu0 %v6998_v39, %s8241_s19  ;;  %v6763_v32 = vsel %vm2374_vm4, %v10775_v60, %v6690_v5 }
 0xb20   : > { %v7071_v6 = vpop.permute.xlu0 %7070 }
 0xb21   : > { %v7151_v61 = vsel %vm2587_vm15, %v7104_v3, %v7071_v6  ;;  %7728 = vmatprep.mubr.msk.bf16.mxu1 %vm2374_vm4, %v7071_v6  ;;  %v7025_v48 = vpop.permute.xlu1 %7024 }
 0xb22   : > { %7339 = vmatmul.mubr.bf16.vlgmr.msra.gmra.mxu1 %v7151_v61  ;;  %v7107_v40 = vsel %vm2562_vm11, %v6927_v53, %v7025_v48 }
 0xb24   : > { %v6722_v29 = vpop.permute.xlu0 %6721 }
 0xb25   : > { %v6801_v17 = vsel %vm2398_vm6, %v6763_v32, %v6722_v29  ;;  %v6692_v46 = vpop.permute.xlu1 %6691 }
 0xb26   : > { %v6868_v43 = vshrl.u32 %v6801_v17, 16  ;;  %v6871_v49 = vshll.u32 %v6801_v17, 16  ;;  %7040 = vrot.lane.b32.xlu1 %v6801_v17, %s8240_s18  ;;  %v6766_v14 = vsel %vm2374_vm4, %v10790_v10, %v6692_v46  ;;  %v6930_v17 = vsel %vm8590_vm7, 0, %v10874_v51 }
 0xb28   : > { %v6870_v0 = vrot.slane %v6868_v43, 7  ;;  %v6960_v35 = vrot.slane %v6871_v49, 1  ;;  %v7073_v27 = vpop.permute.xlu0 %7072 }
 0xb29   : > { %7729 = vmatprep.mubr.msk.bf16.mxu1 %vm2374_vm4, %v7073_v27  ;;  %v7027_v60 = vpop.permute.xlu1 %7026  ;;  %v7154_v54 = vsel %vm2587_vm15, %v7107_v40, %v7073_v27 }
 0xb2a   : > { %7347 = vmatmul.mubr.bf16.gmra.mxu1 %v7154_v54  ;;  %v6961_v26 = vor.u32 %v6960_v35, %v6868_v43  ;;  %v10944_v16 = vor.u32 %v6871_v49, %v6870_v0  ;;  %v7110_v52 = vsel %vm2562_vm11, %v6928_v45, %v7027_v60 }
 0xb2c   : > { %v6724_v18 = vpop.permute.xlu0 %6723  ;;  %v6999_v50 = vsel %vm8448_vm5, %v6961_v26, 0 }
 0xb2d   : > { %v6803_v25 = vsel %vm2398_vm6, %v6766_v14, %v6724_v18  ;;  %7088 = vrot.lane.b32.xlu0 %v6999_v50, %s8241_s19  ;;  %v6694_v58 = vpop.permute.xlu1 %6693  ;;  %v6931_v50 = vsel %vm8590_vm7, 0, %v10892_v23 }
 0xb2e   : > { %v6874_v33 = vshrl.u32 %v6803_v25, 16  ;;  %v6877_v57 = vshll.u32 %v6803_v25, 16  ;;  %7042 = vrot.lane.b32.xlu1 %v6803_v25, %s8240_s18  ;;  %v6769_v44 = vsel %vm2374_vm4, %v10814_v62, %v6694_v58 }
 0xb30   : > { %v6876_v10 = vrot.slane %v6874_v33, 7  ;;  %v6962_v56 = vrot.slane %v6877_v57, 1  ;;  %v7075_v24 = vpop.permute.xlu0 %7074 }
 0xb31   : > { %7730 = vmatprep.mubr.msk.bf16.mxu1 %vm2374_vm4, %v7075_v24  ;;  %v7029_v63 = vpop.permute.xlu1 %7028  ;;  %v7157_v34 = vsel %vm2587_vm15, %v7110_v52, %v7075_v24 }
 0xb32   : > { %7355 = vmatmul.mubr.bf16.gmra.mxu1 %v7157_v34  ;;  %v6963_v4 = vor.u32 %v6962_v56, %v6874_v33  ;;  %v10959_v7 = vor.u32 %v6877_v57, %v6876_v10  ;;  %v7113_v36 = vsel %vm2562_vm11, %v6929_v38, %v7029_v63 }
 0xb34   : > { %v6726_v47 = vpop.permute.xlu0 %6725  ;;  %v7000_v30 = vsel %vm8448_vm5, %v6963_v4, 0 }
 0xb35   : > { %v6805_v22 = vsel %vm2398_vm6, %v6769_v44, %v6726_v47  ;;  %7090 = vrot.lane.b32.xlu0 %v7000_v30, %s8241_s19  ;;  %v6696_v19 = vpop.permute.xlu1 %6695  ;;  %v6932_v44 = vsel %vm8590_vm7, 0, %v10903_v42 }
 0xb36   : > { %v6880_v1 = vshrl.u32 %v6805_v22, 16  ;;  %v6883_v59 = vshll.u32 %v6805_v22, 16  ;;  %7044 = vrot.lane.b32.xlu1 %v6805_v22, %s8240_s18  ;;  %v6772_v3 = vsel %vm2374_vm4, %v10831_v12, %v6696_v19 }
 0xb38   : > { %v6882_v62 = vrot.slane %v6880_v1, 7  ;;  %v6964_v2 = vrot.slane %v6883_v59, 1  ;;  %v7077_v31 = vpop.permute.xlu0 %7076 }
 0xb39   : > { %7731 = vmatprep.mubr.msk.bf16.mxu1 %vm2374_vm4, %v7077_v31  ;;  %v7031_v9 = vpop.permute.xlu1 %7030  ;;  %v7160_v5 = vsel %vm2587_vm15, %v7113_v36, %v7077_v31 }
 0xb3a   : > { %7363 = vmatmul.mubr.bf16.gmra.mxu1 %v7160_v5  ;;  %v6965_v39 = vor.u32 %v6964_v2, %v6880_v1  ;;  %v10974_v11 = vor.u32 %v6883_v59, %v6882_v62  ;;  %v7116_v46 = vsel %vm2562_vm11, %v6930_v17, %v7031_v9 }
 0xb3c   : > { %v6728_v6 = vpop.permute.xlu0 %6727  ;;  %v7001_v55 = vsel %vm8448_vm5, %v6965_v39, 0 }
 0xb3d   : > { %v6807_v61 = vsel %vm2398_vm6, %v6772_v3, %v6728_v6  ;;  %7092 = vrot.lane.b32.xlu0 %v7001_v55, %s8241_s19  ;;  %v6698_v48 = vpop.permute.xlu1 %6697 }
 0xb3e   : > { %v6886_v32 = vshrl.u32 %v6807_v61, 16  ;;  %v6889_v29 = vshll.u32 %v6807_v61, 16  ;;  %7046 = vrot.lane.b32.xlu1 %v6807_v61, %s8240_s18  ;;  %v6775_v27 = vsel %vm2374_vm4, %v10850_v13, %v6698_v48  ;;  %v6933_v61 = vsel %vm8590_vm7, 0, %v10916_v15 }
 0xb40   : > { %v6888_v12 = vrot.slane %v6886_v32, 7  ;;  %v6966_v43 = vrot.slane %v6889_v29, 1  ;;  %v7079_v49 = vpop.permute.xlu0 %7078 }
 0xb41   : > { %7732 = vmatprep.mubr.msk.bf16.mxu1 %vm2374_vm4, %v7079_v49  ;;  %v7033_v53 = vpop.permute.xlu1 %7032  ;;  %v7163_v40 = vsel %vm2587_vm15, %v7116_v46, %v7079_v49  ;;  %v6935_v49 = vsel %vm8590_vm7, 0, %v10944_v16 }
 0xb42   : > { %7371 = vmatmul.mubr.bf16.gmra.mxu1 %v7163_v40  ;;  %v6967_v0 = vor.u32 %v6966_v43, %v6886_v32  ;;  %v10989_v35 = vor.u32 %v6889_v29, %v6888_v12  ;;  %v7119_v25 = vsel %vm2562_vm11, %v6931_v50, %v7033_v53 }
 0xb44   : > { %v6730_v60 = vpop.permute.xlu0 %6729  ;;  %v7002_v51 = vsel %vm8448_vm5, %v6967_v0, 0 }
 0xb45   : > { %v6809_v54 = vsel %vm2398_vm6, %v6775_v27, %v6730_v60  ;;  %7094 = vrot.lane.b32.xlu0 %v7002_v51, %s8241_s19  ;;  %v6700_v26 = vpop.permute.xlu1 %6699  ;;  %v6936_v27 = vsel %vm8590_vm7, 0, %v10959_v7 }
 0xb46   : > { %v6892_v14 = vshrl.u32 %v6809_v54, 16  ;;  %v6895_v18 = vshll.u32 %v6809_v54, 16  ;;  %7048 = vrot.lane.b32.xlu1 %v6809_v54, %s8240_s18  ;;  %v6778_v56 = vsel %vm2374_vm4, %v10868_v21, %v6700_v26  ;;  %v6937_v26 = vsel %vm8590_vm7, 0, %v10974_v11 }
 0xb48   : > { %v6894_v13 = vrot.slane %v6892_v14, 7  ;;  %v6968_v58 = vrot.slane %v6895_v18, 1  ;;  %v7081_v33 = vpop.permute.xlu0 %7080 }
 0xb49   : > { %7733 = vmatprep.mubr.msk.bf16.mxu1 %vm2374_vm4, %v7081_v33  ;;  %v7166_v57 = vsel %vm2587_vm15, %v7119_v25, %v7081_v33  ;;  %v7035_v10 = vpop.permute.xlu1 %7034  ;;  %v6938_v25 = vsel %vm8590_vm7, 0, %v10989_v35 }
 0xb4a   : > { %7379 = vmatmul.mubr.bf16.gmra.mxu1 %v7166_v57  ;;  %v6969_v45 = vor.u32 %v6968_v58, %v6892_v14  ;;  %v11004_v52 = vor.u32 %v6895_v18, %v6894_v13  ;;  %v7122_v47 = vsel %vm2562_vm11, %v6932_v44, %v7035_v10 }
 0xb4c   : > { %v6732_v24 = vpop.permute.xlu0 %6731  ;;  %v7003_v23 = vsel %vm8448_vm5, %v6969_v45, 0  ;;  %v6939_v57 = vsel %vm8590_vm7, 0, %v11004_v52 }
 0xb4d   : > { %v6811_v63 = vsel %vm2398_vm6, %v6778_v56, %v6732_v24  ;;  %7096 = vrot.lane.b32.xlu0 %v7003_v23, %s8241_s19  ;;  %v6702_v19 = vpop.permute.xlu1 %6701 }
 0xb4e   : > { %v6898_v34 = vshrl.u32 %v6811_v63, 16  ;;  %v6901_v4 = vshll.u32 %v6811_v63, 16  ;;  %7050 = vrot.lane.b32.xlu1 %v6811_v63, %s8240_s18  ;;  %v6781_v36 = vsel %vm2374_vm4, %v10885_v37, %v6702_v19 }
 0xb50   : > { %v6900_v30 = vrot.slane %v6898_v34, 7  ;;  %v6970_v21 = vrot.slane %v6901_v4, 1  ;;  %v7083_v22 = vpop.permute.xlu0 %7082 }
 0xb51   : > { %7734 = vmatprep.mubr.msk.bf16.mxu1 %vm2374_vm4, %v7083_v22  ;;  %v7169_v1 = vsel %vm2587_vm15, %v7122_v47, %v7083_v22  ;;  %v8223_v22 = vld [vmem:[%s11206_s7] sm:$0x3f] }
 0xb52   : > { %7387 = vmatmul.mubr.bf16.gmra.mxu1 %v7169_v1  ;;  %v6971_v59 = vor.u32 %v6970_v21, %v6898_v34  ;;  %v11019_v38 = vor.u32 %v6901_v4, %v6900_v30  ;;  %v7218_v21 = vsub.s32 5, %v11260_v8 }
 0xb54   : > { %v6734_v62 = vpop.permute.xlu0 %6733  ;;  %v7004_v42 = vsel %vm8448_vm5, %v6971_v59, 0  ;;  %v6940_v24 = vsel %vm8590_vm7, 0, %v11019_v38  ;;  %v11091_v19 = vrot.slane %v8223_v22, %v7218_v21 }
 0xb55   : > { %v6813_v2 = vsel %vm2398_vm6, %v6781_v36, %v6734_v62  ;;  %7098 = vrot.lane.b32.xlu0 %v7004_v42, %s8241_s19 }
 0xb56   : > { %v6904_v31 = vshrl.u32 %v6813_v2, 16  ;;  %v6907_v9 = vshll.u32 %v6813_v2, 16  ;;  %7052 = vrot.lane.b32.xlu1 %v6813_v2, %s8240_s18 }
 0xb58   : > { %v6906_v5 = vrot.slane %v6904_v31, 7  ;;  %v6972_v39 = vrot.slane %v6907_v9, 1 }
 0xb5a   : > { %v6973_v3 = vor.u32 %v6972_v39, %v6904_v31  ;;  %v11028_v6 = vor.u32 %v6907_v9, %v6906_v5 }
 0xb5c   : > { %v7005_v37 = vsel %vm8448_vm5, %v6973_v3, 0  ;;  %v6941_v4 = vsel %vm8590_vm7, 0, %v11028_v6 }
 0xb5d   : > { %7100 = vrot.lane.b32.xlu0 %v7005_v37, %s8241_s19 }
 0xb83   : > { %v7037_v55 = vpop.permute.xlu1 %7036 }
 0xb84   : > { %v7125_v48 = vsel %vm2562_vm11, %v6933_v61, %v7037_v55 }
 0xb89   : > { %v7039_v17 = vpop.permute.xlu1 %7038 }
 0xb8a   : > { %v7085_v32 = vpop.permute.xlu0 %7084  ;;  %v7128_v12 = vsel %vm2562_vm11, %v6934_v28, %v7039_v17 }
 0xb8b   : > { %7735 = vmatprep.mubr.msk.bf16.mxu1 %vm2374_vm4, %v7085_v32  ;;  %v7172_v29 = vsel %vm2587_vm15, %v7125_v48, %v7085_v32 }
 0xb8c   : > { %7395 = vmatmul.mubr.bf16.gmra.mxu1 %v7172_v29 }
 0xb90   : > { %v7087_v46 = vpop.permute.xlu0 %7086 }
 0xb91   : > { %7736 = vmatprep.mubr.msk.bf16.mxu1 %vm2374_vm4, %v7087_v46  ;;  %v7175_v15 = vsel %vm2587_vm15, %v7128_v12, %v7087_v46 }
 0xb94   : > { %7403 = vmatmul.mubr.bf16.gmra.mxu1 %v7175_v15 }
 0xb98   : > { %v7041_v43 = vpop.permute.xlu1 %7040 }
 0xb99   : > { %v7131_v53 = vsel %vm2562_vm11, %v6935_v49, %v7041_v43 }
 0xb9f   : > { %v7089_v40 = vpop.permute.xlu0 %7088 }
 0xba0   : > { %7737 = vmatprep.mubr.msk.bf16.mxu1 %vm2374_vm4, %v7089_v40  ;;  %v7178_v0 = vsel %vm2587_vm15, %v7131_v53, %v7089_v40  ;;  %v7043_v20 = vpop.permute.xlu1 %7042 }
 0xba1   : > { %7411 = vmatmul.mubr.bf16.gmra.mxu1 %v7178_v0  ;;  %v7134_v60 = vsel %vm2562_vm11, %v6936_v27, %v7043_v20 }
 0xba7   : > { %v7091_v51 = vpop.permute.xlu0 %7090 }
 0xba8   : > { %7738 = vmatprep.mubr.msk.bf16.mxu1 %vm2374_vm4, %v7091_v51  ;;  %v7181_v16 = vsel %vm2587_vm15, %v7134_v60, %v7091_v51  ;;  %v7045_v54 = vpop.permute.xlu1 %7044 }
 0xba9   : > { %7419 = vmatmul.mubr.bf16.gmra.mxu1 %v7181_v16  ;;  %v7137_v14 = vsel %vm2562_vm11, %v6937_v26, %v7045_v54 }
 0xbaf   : > { %v7093_v18 = vpop.permute.xlu0 %7092 }
 0xbb0   : > { %7739 = vmatprep.mubr.msk.bf16.mxu1 %vm2374_vm4, %v7093_v18  ;;  %v7184_v7 = vsel %vm2587_vm15, %v7137_v14, %v7093_v18  ;;  %v7047_v50 = vpop.permute.xlu1 %7046 }
 0xbb1   : > { %7427 = vmatmul.mubr.bf16.gmra.mxu1 %v7184_v7  ;;  %v7140_v13 = vsel %vm2562_vm11, %v6938_v25, %v7047_v50 }
 0xbb7   : > { %v7095_v58 = vpop.permute.xlu0 %7094 }
 0xbb8   : > { %7740 = vmatprep.mubr.msk.bf16.mxu1 %vm2374_vm4, %v7095_v58  ;;  %v7187_v11 = vsel %vm2587_vm15, %v7140_v13, %v7095_v58  ;;  %v7049_v33 = vpop.permute.xlu1 %7048 }
 0xbb9   : > { %7435 = vmatmul.mubr.bf16.gmra.mxu1 %v7187_v11  ;;  %v7143_v45 = vsel %vm2562_vm11, %v6939_v57, %v7049_v33 }
 0xbbf   : > { %v7097_v10 = vpop.permute.xlu0 %7096 }
 0xbc0   : > { %v7190_v56 = vsel %vm2587_vm15, %v7143_v45, %v7097_v10  ;;  %7741 = vmatprep.mubr.msk.bf16.mxu1 %vm2374_vm4, %v7097_v10  ;;  %v7051_v35 = vpop.permute.xlu1 %7050 }
 0xbc1   : > { %7443 = vmatmul.mubr.bf16.gmra.mxu1 %v7190_v56  ;;  %v7146_v23 = vsel %vm2562_vm11, %v6940_v24, %v7051_v35 }
 0xbc7   : > { %v7099_v63 = vpop.permute.xlu0 %7098 }
 0xbc8   : > { %v7193_v34 = vsel %vm2587_vm15, %v7146_v23, %v7099_v63  ;;  %7742 = vmatprep.mubr.msk.bf16.mxu1 %vm2374_vm4, %v7099_v63  ;;  %v7053_v52 = vpop.permute.xlu1 %7052 }
 0xbc9   : > { %7451 = vmatmul.mubr.bf16.gmra.mxu1 %v7193_v34  ;;  %v7149_v44 = vsel %vm2562_vm11, %v6941_v4, %v7053_v52 }
 0xbcf   : > { %v7101_v47 = vpop.permute.xlu0 %7100 }
 0xbd0   : > { %v7196_v30 = vsel %vm2587_vm15, %v7149_v44, %v7101_v47  ;;  %7743 = vmatprep.mubr.msk.bf16.mxu1 %vm2374_vm4, %v7101_v47 }
 0xbd1   : > { %7459 = vmatmul.mubr.bf16.gmra.mxu1 %v7196_v30 }
 0xbe2   : > { %v7340_v41 = vpop.f32.mrf.mxu1 }
 0xbe3   : > { %v7341_v1 = vadd.f32 %v7340_v41, %v11091_v19 }
 0xbe4   : > { %v7342_v8 = vpop.f32.mrf.mxu1 }
 0xbe5   : > { %7467 = vst.msk [vmem:[%s11098_s24] sm:$0xff] %vm437_vm1, %v7341_v1 }
 0xbe6   : > { %v7343_v59 = vpop.f32.mrf.mxu1 }
 0xbe7   : > { %v7344_v38 = vadd.f32 %v7343_v59, %v11091_v19 }
 0xbe8   : > { %v7345_v36 = vpop.f32.mrf.mxu1 }
 0xbe9   : > { %7468 = vst.msk [vmem:[%s11098_s24 + $0x8] sm:$0xff] %vm437_vm1, %v7344_v38 }
 0xbea   : > { %v7348_v62 = vpop.f32.mrf.mxu1 }
 0xbeb   : > { %v7349_v42 = vadd.f32 %v7348_v62, %v11091_v19 }
 0xbec   : > { %v7350_v2 = vpop.f32.mrf.mxu1 }
 0xbed   : > { %7469 = vst.msk [vmem:[%s11098_s24 + $0x10] sm:$0xff] %vm437_vm1, %v7349_v42 }
 0xbee   : > { %v7351_v31 = vpop.f32.mrf.mxu1 }
 0xbef   : > { %v7352_v9 = vadd.f32 %v7351_v31, %v11091_v19 }
 0xbf0   : > { %v7353_v5 = vpop.f32.mrf.mxu1 }
 0xbf1   : > { %7470 = vst.msk [vmem:[%s11098_s24 + $0x18] sm:$0xff] %vm437_vm1, %v7352_v9 }
 0xbf2   : > { %v7356_v39 = vpop.f32.mrf.mxu1 }
 0xbf3   : > { %v7357_v3 = vadd.f32 %v7356_v39, %v11091_v19 }
 0xbf4   : > { %v7358_v6 = vpop.f32.mrf.mxu1 }
 0xbf5   : > { %7471 = vst.msk [vmem:[%s11098_s24 + $0x20] sm:$0xff] %vm437_vm1, %v7357_v3 }
 0xbf6   : > { %v7359_v37 = vpop.f32.mrf.mxu1 }
 0xbf7   : > { %v7360_v55 = vadd.f32 %v7359_v37, %v11091_v19 }
 0xbf8   : > { %v7361_v61 = vpop.f32.mrf.mxu1 }
 0xbf9   : > { %7472 = vst.msk [vmem:[%s11098_s24 + $0x28] sm:$0xff] %vm437_vm1, %v7360_v55 }
 0xbfa   : > { %v7364_v48 = vpop.f32.mrf.mxu1 }
 0xbfb   : > { %v7365_v32 = vadd.f32 %v7364_v48, %v11091_v19 }
 0xbfc   : > { %v7366_v29 = vpop.f32.mrf.mxu1 }
 0xbfd   : > { %7473 = vst.msk [vmem:[%s11098_s24 + $0x30] sm:$0xff] %vm437_vm1, %v7365_v32 }
 0xbfe   : > { %v7367_v17 = vpop.f32.mrf.mxu1 }
 0xbff   : > { %v7368_v46 = vadd.f32 %v7367_v17, %v11091_v19 }
 0xc00   : > { %v7369_v28 = vpop.f32.mrf.mxu1 }
 0xc01   : > { %7474 = vst.msk [vmem:[%s11098_s24 + $0x38] sm:$0xff] %vm437_vm1, %v7368_v46 }
 0xc02   : > { %v7372_v12 = vpop.f32.mrf.mxu1 }
 0xc03   : > { %v7373_v15 = vadd.f32 %v7372_v12, %v11091_v19 }
 0xc04   : > { %v7374_v43 = vpop.f32.mrf.mxu1 }
 0xc05   : > { %7475 = vst.msk [vmem:[%s11098_s24 + $0x40] sm:$0xff] %vm437_vm1, %v7373_v15 }
 0xc06   : > { %v7375_v49 = vpop.f32.mrf.mxu1 }
 0xc07   : > { %v7376_v53 = vadd.f32 %v7375_v49, %v11091_v19 }
 0xc08   : > { %v7377_v40 = vpop.f32.mrf.mxu1 }
 0xc09   : > { %7476 = vst.msk [vmem:[%s11098_s24 + $0x48] sm:$0xff] %vm437_vm1, %v7376_v53 }
 0xc0a   : > { %v7380_v0 = vpop.f32.mrf.mxu1 }
 0xc0b   : > { %v7381_v20 = vadd.f32 %v7380_v0, %v11091_v19 }
 0xc0c   : > { %v7382_v27 = vpop.f32.mrf.mxu1 }
 0xc0d   : > { %7477 = vst.msk [vmem:[%s11098_s24 + $0x50] sm:$0xff] %vm437_vm1, %v7381_v20 }
 0xc0e   : > { %v7383_v60 = vpop.f32.mrf.mxu1 }
 0xc0f   : > { %v7384_v51 = vadd.f32 %v7383_v60, %v11091_v19 }
 0xc10   : > { %v7385_v16 = vpop.f32.mrf.mxu1 }
 0xc11   : > { %7478 = vst.msk [vmem:[%s11098_s24 + $0x58] sm:$0xff] %vm437_vm1, %v7384_v51 }
 0xc12   : > { %v7388_v54 = vpop.f32.mrf.mxu1 }
 0xc13   : > { %v7389_v26 = vadd.f32 %v7388_v54, %v11091_v19 }
 0xc14   : > { %v7390_v14 = vpop.f32.mrf.mxu1 }
 0xc15   : > { %7479 = vst.msk [vmem:[%s11098_s24 + $0x60] sm:$0xff] %vm437_vm1, %v7389_v26 }
 0xc16   : > { %v7391_v18 = vpop.f32.mrf.mxu1 }
 0xc17   : > { %v7392_v7 = vadd.f32 %v7391_v18, %v11091_v19 }
 0xc18   : > { %v7393_v50 = vpop.f32.mrf.mxu1 }
 0xc19   : > { %7480 = vst.msk [vmem:[%s11098_s24 + $0x68] sm:$0xff] %vm437_vm1, %v7392_v7 }
 0xc4c   : > { %v7396_v25 = vpop.f32.mrf.mxu1 }
 0xc4d   : > { %v7397_v13 = vadd.f32 %v7396_v25, %v11091_v19 }
 0xc4e   : > { %v7398_v58 = vpop.f32.mrf.mxu1 }
 0xc4f   : > { %7481 = vst.msk [vmem:[%s11098_s24 + $0x70] sm:$0xff] %vm437_vm1, %v7397_v13 }
 0xc50   : > { %v7399_v11 = vpop.f32.mrf.mxu1 }
 0xc51   : > { %v7400_v33 = vadd.f32 %v7399_v11, %v11091_v19 }
 0xc52   : > { %v7401_v57 = vpop.f32.mrf.mxu1 }
 0xc53   : > { %7482 = vst.msk [vmem:[%s11098_s24 + $0x78] sm:$0xff] %vm437_vm1, %v7400_v33 }
 0xc54   : > { %v7404_v45 = vpop.f32.mrf.mxu1 }
 0xc55   : > { %v7405_v10 = vadd.f32 %v7404_v45, %v11091_v19 }
 0xc56   : > { %v7406_v56 = vpop.f32.mrf.mxu1 }
 0xc57   : > { %7483 = vst.msk [vmem:[%s11098_s24 + $0x80] sm:$0xff] %vm437_vm1, %v7405_v10 }
 0xc58   : > { %v7407_v35 = vpop.f32.mrf.mxu1 }
 0xc59   : > { %v7408_v24 = vadd.f32 %v7407_v35, %v11091_v19 }
 0xc5a   : > { %v7409_v23 = vpop.f32.mrf.mxu1 }
 0xc5b   : > { %7484 = vst.msk [vmem:[%s11098_s24 + $0x88] sm:$0xff] %vm437_vm1, %v7408_v24 }
 0xc61   : > { %v7412_v63 = vpop.f32.mrf.mxu1 }
 0xc62   : > { %v7413_v34 = vadd.f32 %v7412_v63, %v11091_v19 }
 0xc63   : > { %v7414_v52 = vpop.f32.mrf.mxu1 }
 0xc64   : > { %7485 = vst.msk [vmem:[%s11098_s24 + $0x90] sm:$0xff] %vm437_vm1, %v7413_v34 }
 0xc65   : > { %v7415_v4 = vpop.f32.mrf.mxu1 }
 0xc66   : > { %v7416_v44 = vadd.f32 %v7415_v4, %v11091_v19 }
 0xc67   : > { %v7417_v47 = vpop.f32.mrf.mxu1 }
 0xc68   : > { %7486 = vst.msk [vmem:[%s11098_s24 + $0x98] sm:$0xff] %vm437_vm1, %v7416_v44 }
 0xc69   : > { %v7420_v30 = vpop.f32.mrf.mxu1 }
 0xc6a   : > { %v7421_v21 = vadd.f32 %v7420_v30, %v11091_v19 }
 0xc6b   : > { %v7422_v22 = vpop.f32.mrf.mxu1 }
 0xc6c   : > { %7487 = vst.msk [vmem:[%s11098_s24 + $0xa0] sm:$0xff] %vm437_vm1, %v7421_v21 }
 0xc6d   : > { %v7423_v41 = vpop.f32.mrf.mxu1 }
 0xc6e   : > { %v7424_v1 = vadd.f32 %v7423_v41, %v11091_v19 }
 0xc6f   : > { %v7425_v8 = vpop.f32.mrf.mxu1 }
 0xc70   : > { %7488 = vst.msk [vmem:[%s11098_s24 + $0xa8] sm:$0xff] %vm437_vm1, %v7424_v1 }
 0xc71   : > { %v7428_v59 = vpop.f32.mrf.mxu1 }
 0xc72   : > { %v7429_v38 = vadd.f32 %v7428_v59, %v11091_v19 }
 0xc73   : > { %v7430_v36 = vpop.f32.mrf.mxu1 }
 0xc74   : > { %7489 = vst.msk [vmem:[%s11098_s24 + $0xb0] sm:$0xff] %vm437_vm1, %v7429_v38 }
 0xc75   : > { %v7431_v62 = vpop.f32.mrf.mxu1 }
 0xc76   : > { %v7432_v42 = vadd.f32 %v7431_v62, %v11091_v19 }
 0xc77   : > { %v7433_v2 = vpop.f32.mrf.mxu1 }
 0xc78   : > { %7490 = vst.msk [vmem:[%s11098_s24 + $0xb8] sm:$0xff] %vm437_vm1, %v7432_v42 }
 0xc79   : > { %v7436_v31 = vpop.f32.mrf.mxu1 }
 0xc7a   : > { %v7437_v9 = vadd.f32 %v7436_v31, %v11091_v19 }
 0xc7b   : > { %v7438_v5 = vpop.f32.mrf.mxu1 }
 0xc7c   : > { %7491 = vst.msk [vmem:[%s11098_s24 + $0xc0] sm:$0xff] %vm437_vm1, %v7437_v9 }
 0xc7d   : > { %v7439_v39 = vpop.f32.mrf.mxu1 }
 0xc7e   : > { %v7440_v3 = vadd.f32 %v7439_v39, %v11091_v19 }
 0xc7f   : > { %v7441_v6 = vpop.f32.mrf.mxu1 }
 0xc80   : > { %7492 = vst.msk [vmem:[%s11098_s24 + $0xc8] sm:$0xff] %vm437_vm1, %v7440_v3 }
 0xc81   : > { %v7444_v37 = vpop.f32.mrf.mxu1 }
 0xc82   : > { %v7445_v55 = vadd.f32 %v7444_v37, %v11091_v19 }
 0xc83   : > { %v7446_v61 = vpop.f32.mrf.mxu1 }
 0xc84   : > { %7493 = vst.msk [vmem:[%s11098_s24 + $0xd0] sm:$0xff] %vm437_vm1, %v7445_v55 }
 0xc85   : > { %v7447_v48 = vpop.f32.mrf.mxu1 }
 0xc86   : > { %v7448_v32 = vadd.f32 %v7447_v48, %v11091_v19 }
 0xc87   : > { %v7449_v29 = vpop.f32.mrf.mxu1 }
 0xc88   : > { %7494 = vst.msk [vmem:[%s11098_s24 + $0xd8] sm:$0xff] %vm437_vm1, %v7448_v32 }
 0xc89   : > { %v7452_v17 = vpop.f32.mrf.mxu1 }
 0xc8a   : > { %v7453_v46 = vadd.f32 %v7452_v17, %v11091_v19 }
 0xc8b   : > { %v7454_v28 = vpop.f32.mrf.mxu1 }
 0xc8c   : > { %7495 = vst.msk [vmem:[%s11098_s24 + $0xe0] sm:$0xff] %vm437_vm1, %v7453_v46 }
 0xc8d   : > { %v7455_v12 = vpop.f32.mrf.mxu1 }
 0xc8e   : > { %v7456_v15 = vadd.f32 %v7455_v12, %v11091_v19 }
 0xc8f   : > { %v7457_v43 = vpop.f32.mrf.mxu1 }
 0xc90   : > { %7496 = vst.msk [vmem:[%s11098_s24 + $0xe8] sm:$0xff] %vm437_vm1, %v7456_v15 }
 0xc91   : > { %v7460_v49 = vpop.f32.mrf.mxu1 }
 0xc92   : > { %v7461_v53 = vadd.f32 %v7460_v49, %v11091_v19 }
 0xc93   : > { %v7462_v40 = vpop.f32.mrf.mxu1 }
 0xc94   : > { %7497 = vst.msk [vmem:[%s11098_s24 + $0xf0] sm:$0xff] %vm437_vm1, %v7461_v53 }
 0xc95   : > { %v7463_v0 = vpop.f32.mrf.mxu1 }
 0xc96   : > { %v7464_v20 = vadd.f32 %v7463_v0, %v11091_v19 }
 0xc97   : > { %v7465_v27 = vpop.f32.mrf.mxu1 }
 0xc98   : > { %7498 = vst.msk [vmem:[%s11098_s24 + $0xf8] sm:$0xff] %vm437_vm1, %v7464_v20 }
 0xc99 PF: > { %s18_s27 = sadd.s32 1, %s8230_s27  }
 0xc9a   : > { %p15_p4 = scmp.ge.s32.totalorder %s18_s27, 4  }
 0xc9c   :  { %17 = sbr.rel (!%p15_p4) target bundleno = 1 (0x1), region = 82 }

</bundles_post_ra>
